<compile_context>
chip_gen: v7x
topology: tpu7x:2x2x1
jax: 0.10.0
libtpu: 0.0.40
codegen_flags: <defaults>
</compile_context>

<pallas_src>
import functools
import numpy as np

import jax
import jax.numpy as jnp
from jax.experimental import pallas as pl
from jax.experimental.pallas import tpu as pltpu


def _pair(v):
    return (v, v) if isinstance(v, int) else tuple(v)


def _round_up(x, m):
    return ((x + m - 1) // m) * m


# ---------------------------------------------------------------------------
# Pallas kernel: fused Conv2d (im2col-in-VMEM, single MXU dot) + bias/BN + act
# ---------------------------------------------------------------------------
def _conv_bn_act_kernel(x_ref, w_ref, b_ref, o_ref, *,
                        k, sh, sw, dh, dw, th, Wo, act, slope):
    """One (batch, H-tile, Cout-tile) grid cell.

    x_ref: (sh*sw, Hs, Ws, Cin)   bf16  stride-phase decomposed padded input
    w_ref: (k*k*Cin, CT)          bf16  BN-folded, tap-major conv weights
    b_ref: (1, CT)                f32   BN-folded bias
    o_ref: (th*Wo, CT)            bf16  lane-dense output tile
    """
    cin = x_ref.shape[-1]
    h0 = pl.program_id(1) * th                      # first output row of tile

    # Gather the k*k shifted windows and fold them into the contraction dim:
    # K = k*k*Cin, so the whole conv for this tile is ONE MXU matmul.
    cols = []
    for t in range(k * k):                          # static unroll over taps
        kh, kw = divmod(t, k)
        qh, rh = divmod(kh * dh, sh)                # phase + contiguous offset
        qw, rw = divmod(kw * dw, sw)
        cols.append(x_ref[rh * sw + rw, pl.ds(h0 + qh, th), pl.ds(qw, Wo), :])
    lhs = cols[0] if len(cols) == 1 else jnp.concatenate(cols, axis=-1)
    lhs = lhs.reshape(th * Wo, k * k * cin)         # (M, K) bf16

    acc = jnp.dot(lhs, w_ref[...], preferred_element_type=jnp.float32)
    acc = acc + b_ref[...]                          # f32 bias / folded BN shift
    if act == "relu":
        acc = jnp.maximum(acc, 0.0)
    elif act == "leakyrelu":
        acc = jnp.where(acc >= 0.0, acc, acc * slope)
    elif act == "tanh":
        acc = jnp.tanh(acc)
    elif act == "sigmoid":                          # EUP exp + approx recip
        acc = pl.reciprocal(1.0 + jnp.exp(-acc), approx=True)
    o_ref[...] = acc.astype(o_ref.dtype)


# ---------------------------------------------------------------------------
# Module wrapper (mirrors the PyTorch convNxN interface, inference semantics)
# ---------------------------------------------------------------------------
class ConvNxN:
    def __init__(self, key, channel_in, channel_out, N,
                 stride=1, padding=0, dilation=1, bias=True,
                 set_bn=True, set_activation=True, activation="relu",
                 param=0.2, bn_eps=1e-5):
        self.cin, self.cout, self.k = channel_in, channel_out, N
        self.stride = _pair(stride)
        self.padding = _pair(padding)
        self.dilation = _pair(dilation)
        self.act = activation if set_activation else "none"
        self.slope = float(param)

        kw_, kb_, kg_, kbe_, km_, kv_ = jax.random.split(key, 6)
        fan_in = channel_in * N * N
        w = jax.random.normal(kw_, (channel_out, channel_in, N, N),
                              jnp.float32) / np.sqrt(fan_in)
        b = (0.1 * jax.random.normal(kb_, (channel_out,), jnp.float32)
             if bias else jnp.zeros((channel_out,), jnp.float32))
        if set_bn:   # fold inference BatchNorm2d (running stats) into the conv
            gamma = 1.0 + 0.1 * jax.random.normal(kg_, (channel_out,), jnp.float32)
            beta = 0.1 * jax.random.normal(kbe_, (channel_out,), jnp.float32)
            mean = 0.1 * jax.random.normal(km_, (channel_out,), jnp.float32)
            var = jax.random.uniform(kv_, (channel_out,), jnp.float32, 0.5, 1.5)
            scale = gamma / jnp.sqrt(var + bn_eps)
            w = w * scale[:, None, None, None]
            b = (b - mean) * scale + beta

        # (Cout, Cin, kh, kw) -> (k*k*Cin, Cout): tap-major contraction layout
        # matching the in-kernel concat order; pad Cout to a 128-lane multiple.
        self.coutp = _round_up(channel_out, 128)
        self.ct = 128                 # native MXU width on v5e, fine on v6e/v7x
        w = jnp.transpose(w, (2, 3, 1, 0)).reshape(N * N * channel_in, channel_out)
        self.w = jnp.pad(w, ((0, 0), (0, self.coutp - channel_out))
                         ).astype(jnp.bfloat16)
        self.b = jnp.pad(b, (0, self.coutp - channel_out)
                         ).reshape(1, self.coutp).astype(jnp.float32)

    def __call__(self, x_nchw):
        B, Cin, H, W = x_nchw.shape
        assert Cin == self.cin
        k = self.k
        (sh, sw), (ph, pw), (dh, dw) = self.stride, self.padding, self.dilation
        Hp, Wp = H + 2 * ph, W + 2 * pw
        Ho = (Hp - dh * (k - 1) - 1) // sh + 1
        Wo = (Wp - dw * (k - 1) - 1) // sw + 1
        Hs, Ws = -(-Hp // sh), -(-Wp // sw)

        # NCHW -> NHWC bf16, zero-pad, stride-phase decompose: (B, sh*sw, Hs, Ws, Cin)
        x = jnp.transpose(x_nchw.astype(jnp.bfloat16), (0, 2, 3, 1))
        x = jnp.pad(x, ((0, 0), (ph, ph + Hs * sh - Hp),
                        (pw, pw + Ws * sw - Wp), (0, 0)))
        x = x.reshape(B, Hs, sh, Ws, sw, Cin)
        x = jnp.transpose(x, (0, 2, 4, 1, 3, 5)).reshape(B, sh * sw, Hs, Ws, Cin)

        n_ct = self.coutp // self.ct
        K = k * k * Cin

        # ---- M (output-row) tiling: keep one tile's f32 result ~<= 256 rows.
        target_m = 256
        cand = [t for t in range(1, Ho + 1)
                if Ho % t == 0 and (t == Ho or (t * Wo) % 8 == 0)]
        small = [t for t in cand if t * Wo <= target_m]
        th = max(small) if small else min(cand)
        # Dual-TensorCore chips want >= 2 independent parallel grid cells.
        if B * n_ct * (Ho // th) < 2:
            sub = [t for t in cand if Ho // t >= 2]
            if sub:
                s2 = [t for t in sub if t * Wo <= target_m]
                th = max(s2) if s2 else min(sub)
        n_h = Ho // th

        kern = functools.partial(
            _conv_bn_act_kernel, k=k, sh=sh, sw=sw, dh=dh, dw=dw,
            th=th, Wo=Wo, act=self.act, slope=self.slope)

        # VMEM budget computed from the actual (double-buffered) blocks so the
        # compiler is not throttled by default scoped limits (v6e) and we stay
        # aware of v7x's smaller physical VMEM.
        in_block = sh * sw * Hs * Ws * Cin * 2
        w_block = K * self.ct * 2
        b_block = self.ct * 4
        out_block = th * Wo * self.ct * 2
        live = th * Wo * (K * 2 + self.ct * 4)        # im2col LHS + f32 result
        needed = 2 * (in_block + w_block + b_block + out_block) + live
        vmem_limit = int(min(100 * 2**20, max(32 * 2**20, 2 * needed)))

        cost = pl.CostEstimate(
            flops=2 * B * Ho * Wo * K * self.coutp,
            transcendentals=(B * Ho * Wo * self.coutp
                             if self.act in ("tanh", "sigmoid") else 0),
            bytes_accessed=(B * in_block                     # input once per b
                            + B * n_h * n_ct * w_block       # tiny weight refetch
                            + B * Ho * Wo * self.coutp * 2), # bf16 output
        )

        out = pl.pallas_call(
            kern,
            out_shape=jax.ShapeDtypeStruct((B, Ho * Wo, self.coutp), jnp.bfloat16),
            grid=(B, n_h, n_ct),              # Cout tile innermost: the big
            in_specs=[                        # input DMA is elided across h, c
                pl.BlockSpec((None, sh * sw, Hs, Ws, Cin),
                             lambda b, h, c: (b, 0, 0, 0, 0)),
                pl.BlockSpec((K, self.ct), lambda b, h, c: (0, c)),
                pl.BlockSpec((1, self.ct), lambda b, h, c: (0, c)),
            ],
            out_specs=pl.BlockSpec((None, th * Wo, self.ct),
                                   lambda b, h, c: (b, h, c)),
            compiler_params=pltpu.CompilerParams(
                dimension_semantics=("parallel", "parallel", "parallel"),
                vmem_limit_bytes=vmem_limit),
            cost_estimate=cost,
        )(x, self.w, self.b)

        out = out.reshape(B, Ho, Wo, self.coutp)[..., :self.cout]
        # NCHW to match the PyTorch module; transpose in bf16, cast to f32 last.
        return jnp.transpose(out, (0, 3, 1, 2)).astype(jnp.float32)


# ---------------------------------------------------------------------------
# Pure-JAX reference (uses the same bf16-rounded, BN-folded weights)
# ---------------------------------------------------------------------------
def _reference(x_nchw, m: ConvNxN):
    k = m.k
    w = m.w[:, :m.cout].astype(jnp.float32).reshape(k, k, m.cin, m.cout)
    b = m.b[0, :m.cout].astype(jnp.float32)
    x = jnp.transpose(x_nchw.astype(jnp.bfloat16).astype(jnp.float32), (0, 2, 3, 1))
    y = jax.lax.conv_general_dilated(
        x, w, window_strides=m.stride,
        padding=[(m.padding[0], m.padding[0]), (m.padding[1], m.padding[1])],
        rhs_dilation=m.dilation,
        dimension_numbers=("NHWC", "HWIO", "NHWC"),
        precision=jax.lax.Precision.HIGHEST)
    y = y + b
    if m.act == "relu":
        y = jnp.maximum(y, 0.0)
    elif m.act == "leakyrelu":
        y = jnp.where(y >= 0.0, y, y * m.slope)
    elif m.act == "tanh":
        y = jnp.tanh(y)
    elif m.act == "sigmoid":
        y = 1.0 / (1.0 + jnp.exp(-y))
    return jnp.transpose(y, (0, 3, 1, 2))


if __name__ == "__main__":
    key = jax.random.PRNGKey(0)
    k1, k2, kx = jax.random.split(key, 3)

    B, CIN, H, W = 2, 4, 16, 16
    x = jax.random.normal(kx, (B, CIN, H, W), jnp.float32)

    # convNxN(4, 32, 3, stride=1, padding=1, bias=True) + BN + ReLU
    conv_a = ConvNxN(k1, CIN, 32, 3, stride=1, padding=1, bias=True,
                     set_bn=True, activation="relu")
    # convNxN(4, 16, 5, stride=2, padding=2, bias=False) + BN + LeakyReLU(0.2)
    conv_b = ConvNxN(k2, CIN, 16, 5, stride=2, padding=2, bias=False,
                     set_bn=True, activation="leakyrelu", param=0.2)

    fwd = jax.jit(lambda t: (conv_a(t), conv_b(t)))
    y_a, y_b = fwd(x)
    jax.block_until_ready((y_a, y_b))

    assert y_a.shape == (B, 32, 16, 16), y_a.shape
    assert y_b.shape == (B, 16, 8, 8), y_b.shape
    assert bool(jnp.all(jnp.isfinite(y_a))) and bool(jnp.all(jnp.isfinite(y_b)))

    r_a, r_b = _reference(x, conv_a), _reference(x, conv_b)
    err_a = float(jnp.max(jnp.abs(y_a - r_a)) / (jnp.max(jnp.abs(r_a)) + 1e-6))
    err_b = float(jnp.max(jnp.abs(y_b - r_b)) / (jnp.max(jnp.abs(r_b)) + 1e-6))
    assert err_a < 5e-2 and err_b < 5e-2, (err_a, err_b)

    print("KERNEL_OK")
</pallas_src>

<mosaic_0001>
module attributes {stable_mosaic.version = 11 : i64} {
  func.func @_conv_bn_act_kernel(%arg0: i32, %arg1: i32, %arg2: i32, %arg3: memref<1x4x10x10x4xbf16, #tpu.memory_space<vmem>>, %arg4: memref<100x128xbf16, #tpu.memory_space<vmem>>, %arg5: memref<1x128xf32, #tpu.memory_space<vmem>>, %arg6: memref<1x64x128xbf16, #tpu.memory_space<vmem>>) attributes {dimension_semantics = [#tpu.dimension_semantics<parallel>, #tpu.dimension_semantics<parallel>, #tpu.dimension_semantics<parallel>], iteration_bounds = array<i64: 2, 1, 1>, scalar_prefetch = 0 : i64, scratch_operands = 0 : i64, tpu.core_type = #tpu.core_type<tc>, window_params = [{transform_indices = @transform_0, window_bounds = array<i64: 1, 4, 10, 10, 4>}, {transform_indices = @transform_1, window_bounds = array<i64: 100, 128>}, {transform_indices = @transform_2, window_bounds = array<i64: 1, 128>}, {transform_indices = @transform_3, window_bounds = array<i64: 1, 64, 128>}]} {
    %c8_i32 = arith.constant 8 : i32
    %0 = arith.muli %arg1, %c8_i32 : i32
    %c0_i32 = arith.constant 0 : i32
    %1 = arith.addi %0, %c0_i32 : i32
    %c0 = arith.constant 0 : index
    %c0_0 = arith.constant 0 : index
    %2 = arith.index_cast %1 : i32 to index
    %c0_1 = arith.constant 0 : index
    %c0_2 = arith.constant 0 : index
    %3 = vector.load %arg3[%c0, %c0_0, %2, %c0_1, %c0_2] : memref<1x4x10x10x4xbf16, #tpu.memory_space<vmem>>, vector<1x1x8x8x4xbf16>
    %4 = vector.shape_cast %3 : vector<1x1x8x8x4xbf16> to vector<8x8x4xbf16>
    %c0_i32_3 = arith.constant 0 : i32
    %5 = arith.addi %0, %c0_i32_3 : i32
    %c0_4 = arith.constant 0 : index
    %c1 = arith.constant 1 : index
    %6 = arith.index_cast %5 : i32 to index
    %c0_5 = arith.constant 0 : index
    %c0_6 = arith.constant 0 : index
    %7 = vector.load %arg3[%c0_4, %c1, %6, %c0_5, %c0_6] : memref<1x4x10x10x4xbf16, #tpu.memory_space<vmem>>, vector<1x1x8x8x4xbf16>
    %8 = vector.shape_cast %7 : vector<1x1x8x8x4xbf16> to vector<8x8x4xbf16>
    %c0_i32_7 = arith.constant 0 : i32
    %9 = arith.addi %0, %c0_i32_7 : i32
    %c0_8 = arith.constant 0 : index
    %c0_9 = arith.constant 0 : index
    %10 = arith.index_cast %9 : i32 to index
    %c1_10 = arith.constant 1 : index
    %c0_11 = arith.constant 0 : index
    %11 = vector.load %arg3[%c0_8, %c0_9, %10, %c1_10, %c0_11] : memref<1x4x10x10x4xbf16, #tpu.memory_space<vmem>>, vector<1x1x8x8x4xbf16>
    %12 = vector.shape_cast %11 : vector<1x1x8x8x4xbf16> to vector<8x8x4xbf16>
    %c0_i32_12 = arith.constant 0 : i32
    %13 = arith.addi %0, %c0_i32_12 : i32
    %c0_13 = arith.constant 0 : index
    %c1_14 = arith.constant 1 : index
    %14 = arith.index_cast %13 : i32 to index
    %c1_15 = arith.constant 1 : index
    %c0_16 = arith.constant 0 : index
    %15 = vector.load %arg3[%c0_13, %c1_14, %14, %c1_15, %c0_16] : memref<1x4x10x10x4xbf16, #tpu.memory_space<vmem>>, vector<1x1x8x8x4xbf16>
    %16 = vector.shape_cast %15 : vector<1x1x8x8x4xbf16> to vector<8x8x4xbf16>
    %c0_i32_17 = arith.constant 0 : i32
    %17 = arith.addi %0, %c0_i32_17 : i32
    %c0_18 = arith.constant 0 : index
    %c0_19 = arith.constant 0 : index
    %18 = arith.index_cast %17 : i32 to index
    %c2 = arith.constant 2 : index
    %c0_20 = arith.constant 0 : index
    %19 = vector.load %arg3[%c0_18, %c0_19, %18, %c2, %c0_20] : memref<1x4x10x10x4xbf16, #tpu.memory_space<vmem>>, vector<1x1x8x8x4xbf16>
    %20 = vector.shape_cast %19 : vector<1x1x8x8x4xbf16> to vector<8x8x4xbf16>
    %c0_i32_21 = arith.constant 0 : i32
    %21 = arith.addi %0, %c0_i32_21 : i32
    %c0_22 = arith.constant 0 : index
    %c2_23 = arith.constant 2 : index
    %22 = arith.index_cast %21 : i32 to index
    %c0_24 = arith.constant 0 : index
    %c0_25 = arith.constant 0 : index
    %23 = vector.load %arg3[%c0_22, %c2_23, %22, %c0_24, %c0_25] : memref<1x4x10x10x4xbf16, #tpu.memory_space<vmem>>, vector<1x1x8x8x4xbf16>
    %24 = vector.shape_cast %23 : vector<1x1x8x8x4xbf16> to vector<8x8x4xbf16>
    %c0_i32_26 = arith.constant 0 : i32
    %25 = arith.addi %0, %c0_i32_26 : i32
    %c0_27 = arith.constant 0 : index
    %c3 = arith.constant 3 : index
    %26 = arith.index_cast %25 : i32 to index
    %c0_28 = arith.constant 0 : index
    %c0_29 = arith.constant 0 : index
    %27 = vector.load %arg3[%c0_27, %c3, %26, %c0_28, %c0_29] : memref<1x4x10x10x4xbf16, #tpu.memory_space<vmem>>, vector<1x1x8x8x4xbf16>
    %28 = vector.shape_cast %27 : vector<1x1x8x8x4xbf16> to vector<8x8x4xbf16>
    %c0_i32_30 = arith.constant 0 : i32
    %29 = arith.addi %0, %c0_i32_30 : i32
    %c0_31 = arith.constant 0 : index
    %c2_32 = arith.constant 2 : index
    %30 = arith.index_cast %29 : i32 to index
    %c1_33 = arith.constant 1 : index
    %c0_34 = arith.constant 0 : index
    %31 = vector.load %arg3[%c0_31, %c2_32, %30, %c1_33, %c0_34] : memref<1x4x10x10x4xbf16, #tpu.memory_space<vmem>>, vector<1x1x8x8x4xbf16>
    %32 = vector.shape_cast %31 : vector<1x1x8x8x4xbf16> to vector<8x8x4xbf16>
    %c0_i32_35 = arith.constant 0 : i32
    %33 = arith.addi %0, %c0_i32_35 : i32
    %c0_36 = arith.constant 0 : index
    %c3_37 = arith.constant 3 : index
    %34 = arith.index_cast %33 : i32 to index
    %c1_38 = arith.constant 1 : index
    %c0_39 = arith.constant 0 : index
    %35 = vector.load %arg3[%c0_36, %c3_37, %34, %c1_38, %c0_39] : memref<1x4x10x10x4xbf16, #tpu.memory_space<vmem>>, vector<1x1x8x8x4xbf16>
    %36 = vector.shape_cast %35 : vector<1x1x8x8x4xbf16> to vector<8x8x4xbf16>
    %c0_i32_40 = arith.constant 0 : i32
    %37 = arith.addi %0, %c0_i32_40 : i32
    %c0_41 = arith.constant 0 : index
    %c2_42 = arith.constant 2 : index
    %38 = arith.index_cast %37 : i32 to index
    %c2_43 = arith.constant 2 : index
    %c0_44 = arith.constant 0 : index
    %39 = vector.load %arg3[%c0_41, %c2_42, %38, %c2_43, %c0_44] : memref<1x4x10x10x4xbf16, #tpu.memory_space<vmem>>, vector<1x1x8x8x4xbf16>
    %40 = vector.shape_cast %39 : vector<1x1x8x8x4xbf16> to vector<8x8x4xbf16>
    %c1_i32 = arith.constant 1 : i32
    %41 = arith.addi %0, %c1_i32 : i32
    %c0_45 = arith.constant 0 : index
    %c0_46 = arith.constant 0 : index
    %42 = arith.index_cast %41 : i32 to index
    %c0_47 = arith.constant 0 : index
    %c0_48 = arith.constant 0 : index
    %43 = vector.load %arg3[%c0_45, %c0_46, %42, %c0_47, %c0_48] : memref<1x4x10x10x4xbf16, #tpu.memory_space<vmem>>, vector<1x1x8x8x4xbf16>
    %44 = vector.shape_cast %43 : vector<1x1x8x8x4xbf16> to vector<8x8x4xbf16>
    %c1_i32_49 = arith.constant 1 : i32
    %45 = arith.addi %0, %c1_i32_49 : i32
    %c0_50 = arith.constant 0 : index
    %c1_51 = arith.constant 1 : index
    %46 = arith.index_cast %45 : i32 to index
    %c0_52 = arith.constant 0 : index
    %c0_53 = arith.constant 0 : index
    %47 = vector.load %arg3[%c0_50, %c1_51, %46, %c0_52, %c0_53] : memref<1x4x10x10x4xbf16, #tpu.memory_space<vmem>>, vector<1x1x8x8x4xbf16>
    %48 = vector.shape_cast %47 : vector<1x1x8x8x4xbf16> to vector<8x8x4xbf16>
    %c1_i32_54 = arith.constant 1 : i32
    %49 = arith.addi %0, %c1_i32_54 : i32
    %c0_55 = arith.constant 0 : index
    %c0_56 = arith.constant 0 : index
    %50 = arith.index_cast %49 : i32 to index
    %c1_57 = arith.constant 1 : index
    %c0_58 = arith.constant 0 : index
    %51 = vector.load %arg3[%c0_55, %c0_56, %50, %c1_57, %c0_58] : memref<1x4x10x10x4xbf16, #tpu.memory_space<vmem>>, vector<1x1x8x8x4xbf16>
    %52 = vector.shape_cast %51 : vector<1x1x8x8x4xbf16> to vector<8x8x4xbf16>
    %c1_i32_59 = arith.constant 1 : i32
    %53 = arith.addi %0, %c1_i32_59 : i32
    %c0_60 = arith.constant 0 : index
    %c1_61 = arith.constant 1 : index
    %54 = arith.index_cast %53 : i32 to index
    %c1_62 = arith.constant 1 : index
    %c0_63 = arith.constant 0 : index
    %55 = vector.load %arg3[%c0_60, %c1_61, %54, %c1_62, %c0_63] : memref<1x4x10x10x4xbf16, #tpu.memory_space<vmem>>, vector<1x1x8x8x4xbf16>
    %56 = vector.shape_cast %55 : vector<1x1x8x8x4xbf16> to vector<8x8x4xbf16>
    %c1_i32_64 = arith.constant 1 : i32
    %57 = arith.addi %0, %c1_i32_64 : i32
    %c0_65 = arith.constant 0 : index
    %c0_66 = arith.constant 0 : index
    %58 = arith.index_cast %57 : i32 to index
    %c2_67 = arith.constant 2 : index
    %c0_68 = arith.constant 0 : index
    %59 = vector.load %arg3[%c0_65, %c0_66, %58, %c2_67, %c0_68] : memref<1x4x10x10x4xbf16, #tpu.memory_space<vmem>>, vector<1x1x8x8x4xbf16>
    %60 = vector.shape_cast %59 : vector<1x1x8x8x4xbf16> to vector<8x8x4xbf16>
    %c1_i32_69 = arith.constant 1 : i32
    %61 = arith.addi %0, %c1_i32_69 : i32
    %c0_70 = arith.constant 0 : index
    %c2_71 = arith.constant 2 : index
    %62 = arith.index_cast %61 : i32 to index
    %c0_72 = arith.constant 0 : index
    %c0_73 = arith.constant 0 : index
    %63 = vector.load %arg3[%c0_70, %c2_71, %62, %c0_72, %c0_73] : memref<1x4x10x10x4xbf16, #tpu.memory_space<vmem>>, vector<1x1x8x8x4xbf16>
    %64 = vector.shape_cast %63 : vector<1x1x8x8x4xbf16> to vector<8x8x4xbf16>
    %c1_i32_74 = arith.constant 1 : i32
    %65 = arith.addi %0, %c1_i32_74 : i32
    %c0_75 = arith.constant 0 : index
    %c3_76 = arith.constant 3 : index
    %66 = arith.index_cast %65 : i32 to index
    %c0_77 = arith.constant 0 : index
    %c0_78 = arith.constant 0 : index
    %67 = vector.load %arg3[%c0_75, %c3_76, %66, %c0_77, %c0_78] : memref<1x4x10x10x4xbf16, #tpu.memory_space<vmem>>, vector<1x1x8x8x4xbf16>
    %68 = vector.shape_cast %67 : vector<1x1x8x8x4xbf16> to vector<8x8x4xbf16>
    %c1_i32_79 = arith.constant 1 : i32
    %69 = arith.addi %0, %c1_i32_79 : i32
    %c0_80 = arith.constant 0 : index
    %c2_81 = arith.constant 2 : index
    %70 = arith.index_cast %69 : i32 to index
    %c1_82 = arith.constant 1 : index
    %c0_83 = arith.constant 0 : index
    %71 = vector.load %arg3[%c0_80, %c2_81, %70, %c1_82, %c0_83] : memref<1x4x10x10x4xbf16, #tpu.memory_space<vmem>>, vector<1x1x8x8x4xbf16>
    %72 = vector.shape_cast %71 : vector<1x1x8x8x4xbf16> to vector<8x8x4xbf16>
    %c1_i32_84 = arith.constant 1 : i32
    %73 = arith.addi %0, %c1_i32_84 : i32
    %c0_85 = arith.constant 0 : index
    %c3_86 = arith.constant 3 : index
    %74 = arith.index_cast %73 : i32 to index
    %c1_87 = arith.constant 1 : index
    %c0_88 = arith.constant 0 : index
    %75 = vector.load %arg3[%c0_85, %c3_86, %74, %c1_87, %c0_88] : memref<1x4x10x10x4xbf16, #tpu.memory_space<vmem>>, vector<1x1x8x8x4xbf16>
    %76 = vector.shape_cast %75 : vector<1x1x8x8x4xbf16> to vector<8x8x4xbf16>
    %c1_i32_89 = arith.constant 1 : i32
    %77 = arith.addi %0, %c1_i32_89 : i32
    %c0_90 = arith.constant 0 : index
    %c2_91 = arith.constant 2 : index
    %78 = arith.index_cast %77 : i32 to index
    %c2_92 = arith.constant 2 : index
    %c0_93 = arith.constant 0 : index
    %79 = vector.load %arg3[%c0_90, %c2_91, %78, %c2_92, %c0_93] : memref<1x4x10x10x4xbf16, #tpu.memory_space<vmem>>, vector<1x1x8x8x4xbf16>
    %80 = vector.shape_cast %79 : vector<1x1x8x8x4xbf16> to vector<8x8x4xbf16>
    %c2_i32 = arith.constant 2 : i32
    %81 = arith.addi %0, %c2_i32 : i32
    %c0_94 = arith.constant 0 : index
    %c0_95 = arith.constant 0 : index
    %82 = arith.index_cast %81 : i32 to index
    %c0_96 = arith.constant 0 : index
    %c0_97 = arith.constant 0 : index
    %83 = vector.load %arg3[%c0_94, %c0_95, %82, %c0_96, %c0_97] : memref<1x4x10x10x4xbf16, #tpu.memory_space<vmem>>, vector<1x1x8x8x4xbf16>
    %84 = vector.shape_cast %83 : vector<1x1x8x8x4xbf16> to vector<8x8x4xbf16>
    %c2_i32_98 = arith.constant 2 : i32
    %85 = arith.addi %0, %c2_i32_98 : i32
    %c0_99 = arith.constant 0 : index
    %c1_100 = arith.constant 1 : index
    %86 = arith.index_cast %85 : i32 to index
    %c0_101 = arith.constant 0 : index
    %c0_102 = arith.constant 0 : index
    %87 = vector.load %arg3[%c0_99, %c1_100, %86, %c0_101, %c0_102] : memref<1x4x10x10x4xbf16, #tpu.memory_space<vmem>>, vector<1x1x8x8x4xbf16>
    %88 = vector.shape_cast %87 : vector<1x1x8x8x4xbf16> to vector<8x8x4xbf16>
    %c2_i32_103 = arith.constant 2 : i32
    %89 = arith.addi %0, %c2_i32_103 : i32
    %c0_104 = arith.constant 0 : index
    %c0_105 = arith.constant 0 : index
    %90 = arith.index_cast %89 : i32 to index
    %c1_106 = arith.constant 1 : index
    %c0_107 = arith.constant 0 : index
    %91 = vector.load %arg3[%c0_104, %c0_105, %90, %c1_106, %c0_107] : memref<1x4x10x10x4xbf16, #tpu.memory_space<vmem>>, vector<1x1x8x8x4xbf16>
    %92 = vector.shape_cast %91 : vector<1x1x8x8x4xbf16> to vector<8x8x4xbf16>
    %c2_i32_108 = arith.constant 2 : i32
    %93 = arith.addi %0, %c2_i32_108 : i32
    %c0_109 = arith.constant 0 : index
    %c1_110 = arith.constant 1 : index
    %94 = arith.index_cast %93 : i32 to index
    %c1_111 = arith.constant 1 : index
    %c0_112 = arith.constant 0 : index
    %95 = vector.load %arg3[%c0_109, %c1_110, %94, %c1_111, %c0_112] : memref<1x4x10x10x4xbf16, #tpu.memory_space<vmem>>, vector<1x1x8x8x4xbf16>
    %96 = vector.shape_cast %95 : vector<1x1x8x8x4xbf16> to vector<8x8x4xbf16>
    %c2_i32_113 = arith.constant 2 : i32
    %97 = arith.addi %0, %c2_i32_113 : i32
    %c0_114 = arith.constant 0 : index
    %c0_115 = arith.constant 0 : index
    %98 = arith.index_cast %97 : i32 to index
    %c2_116 = arith.constant 2 : index
    %c0_117 = arith.constant 0 : index
    %99 = vector.load %arg3[%c0_114, %c0_115, %98, %c2_116, %c0_117] : memref<1x4x10x10x4xbf16, #tpu.memory_space<vmem>>, vector<1x1x8x8x4xbf16>
    %100 = vector.shape_cast %99 : vector<1x1x8x8x4xbf16> to vector<8x8x4xbf16>
    %101 = tpu.concatenate %4, %8, %12, %16, %20, %24, %28, %32, %36, %40, %44, %48, %52, %56, %60, %64 in 2 : vector<8x8x4xbf16>, vector<8x8x4xbf16>, vector<8x8x4xbf16>, vector<8x8x4xbf16>, vector<8x8x4xbf16>, vector<8x8x4xbf16>, vector<8x8x4xbf16>, vector<8x8x4xbf16>, vector<8x8x4xbf16>, vector<8x8x4xbf16>, vector<8x8x4xbf16>, vector<8x8x4xbf16>, vector<8x8x4xbf16>, vector<8x8x4xbf16>, vector<8x8x4xbf16>, vector<8x8x4xbf16> -> vector<8x8x64xbf16>
    %102 = tpu.concatenate %68, %72, %76, %80, %84, %88, %92, %96, %100 in 2 : vector<8x8x4xbf16>, vector<8x8x4xbf16>, vector<8x8x4xbf16>, vector<8x8x4xbf16>, vector<8x8x4xbf16>, vector<8x8x4xbf16>, vector<8x8x4xbf16>, vector<8x8x4xbf16>, vector<8x8x4xbf16> -> vector<8x8x36xbf16>
    %103 = tpu.concatenate %101, %102 in 2 : vector<8x8x64xbf16>, vector<8x8x36xbf16> -> vector<8x8x100xbf16>
    %104 = vector.shape_cast %103 : vector<8x8x100xbf16> to vector<64x100xbf16>
    %c0_118 = arith.constant 0 : index
    %c0_119 = arith.constant 0 : index
    %105 = vector.load %arg4[%c0_118, %c0_119] : memref<100x128xbf16, #tpu.memory_space<vmem>>, vector<100x128xbf16>
    %cst = arith.constant dense<0.000000e+00> : vector<64x128xf32>
    %106 = tpu.matmul %104, %105, %cst {dimension_numbers = #tpu.dot_dimension_numbers<[1], [0], [0], [1], [0, 0, 1, 1], [], []>} : vector<64x100xbf16>, vector<100x128xbf16>, vector<64x128xf32> -> vector<64x128xf32>
    %c0_120 = arith.constant 0 : index
    %c0_121 = arith.constant 0 : index
    %107 = vector.load %arg5[%c0_120, %c0_121] : memref<1x128xf32, #tpu.memory_space<vmem>>, vector<1x128xf32>
    %108 = vector.broadcast %107 : vector<1x128xf32> to vector<64x128xf32>
    %109 = arith.addf %106, %108 : vector<64x128xf32>
    %cst_122 = arith.constant 0.000000e+00 : f32
    %110 = vector.broadcast %cst_122 : f32 to vector<64x128xf32>
    %111 = arith.cmpf oge, %109, %110 : vector<64x128xf32>
    %cst_123 = arith.constant 2.000000e-01 : f32
    %112 = vector.broadcast %cst_123 : f32 to vector<64x128xf32>
    %113 = arith.mulf %109, %112 : vector<64x128xf32>
    %114 = arith.select %111, %109, %113 : vector<64x128xi1>, vector<64x128xf32>
    %115 = arith.truncf %114 : vector<64x128xf32> to vector<64x128xbf16>
    %c0_124 = arith.constant 0 : index
    %c0_125 = arith.constant 0 : index
    %c0_126 = arith.constant 0 : index
    %116 = vector.load %arg6[%c0_124, %c0_125, %c0_126] : memref<1x64x128xbf16, #tpu.memory_space<vmem>>, vector<1x64x128xbf16>
    %117 = vector.shape_cast %116 : vector<1x64x128xbf16> to vector<64x128xbf16>
    %118 = vector.shape_cast %115 : vector<64x128xbf16> to vector<1x64x128xbf16>
    tpu.vector_store %arg6[%c0_124, %c0_125, %c0_126], %118 {strides = array<i32>} : memref<1x64x128xbf16, #tpu.memory_space<vmem>>, vector<1x64x128xbf16>,
    return
  }
  func.func @transform_0(%arg0: i32, %arg1: i32, %arg2: i32) -> (i32, i32, i32, i32, i32) {
    %c0_i32 = arith.constant 0 : i32
    %c0_i32_0 = arith.constant 0 : i32
    %c0_i32_1 = arith.constant 0 : i32
    %c0_i32_2 = arith.constant 0 : i32
    %c0_i32_3 = arith.constant 0 : i32
    return %arg0, %c0_i32, %c0_i32_0, %c0_i32_1, %c0_i32_2 : i32, i32, i32, i32, i32
  }
  func.func @transform_1(%arg0: i32, %arg1: i32, %arg2: i32) -> (i32, i32) {
    %c0_i32 = arith.constant 0 : i32
    %c0_i32_0 = arith.constant 0 : i32
    return %c0_i32, %arg2 : i32, i32
  }
  func.func @transform_2(%arg0: i32, %arg1: i32, %arg2: i32) -> (i32, i32) {
    %c0_i32 = arith.constant 0 : i32
    %c0_i32_0 = arith.constant 0 : i32
    return %c0_i32, %arg2 : i32, i32
  }
  func.func @transform_3(%arg0: i32, %arg1: i32, %arg2: i32) -> (i32, i32, i32) {
    %c0_i32 = arith.constant 0 : i32
    return %arg0, %arg1, %arg2 : i32, i32, i32
  }
}

module attributes {stable_mosaic.version = 11 : i64} {
  func.func @_conv_bn_act_kernel(%arg0: i32, %arg1: i32, %arg2: i32, %arg3: memref<1x1x18x18x4xbf16, #tpu.memory_space<vmem>>, %arg4: memref<36x128xbf16, #tpu.memory_space<vmem>>, %arg5: memref<1x128xf32, #tpu.memory_space<vmem>>, %arg6: memref<1x256x128xbf16, #tpu.memory_space<vmem>>) attributes {dimension_semantics = [#tpu.dimension_semantics<parallel>, #tpu.dimension_semantics<parallel>, #tpu.dimension_semantics<parallel>], iteration_bounds = array<i64: 2, 1, 1>, scalar_prefetch = 0 : i64, scratch_operands = 0 : i64, tpu.core_type = #tpu.core_type<tc>, window_params = [{transform_indices = @transform_0, window_bounds = array<i64: 1, 1, 18, 18, 4>}, {transform_indices = @transform_1, window_bounds = array<i64: 36, 128>}, {transform_indices = @transform_2, window_bounds = array<i64: 1, 128>}, {transform_indices = @transform_3, window_bounds = array<i64: 1, 256, 128>}]} {
    %c16_i32 = arith.constant 16 : i32
    %0 = arith.muli %arg1, %c16_i32 : i32
    %c0_i32 = arith.constant 0 : i32
    %1 = arith.addi %0, %c0_i32 : i32
    %c0 = arith.constant 0 : index
    %c0_0 = arith.constant 0 : index
    %2 = arith.index_cast %1 : i32 to index
    %c0_1 = arith.constant 0 : index
    %c0_2 = arith.constant 0 : index
    %3 = vector.load %arg3[%c0, %c0_0, %2, %c0_1, %c0_2] : memref<1x1x18x18x4xbf16, #tpu.memory_space<vmem>>, vector<1x1x16x16x4xbf16>
    %4 = vector.shape_cast %3 : vector<1x1x16x16x4xbf16> to vector<16x16x4xbf16>
    %c0_i32_3 = arith.constant 0 : i32
    %5 = arith.addi %0, %c0_i32_3 : i32
    %c0_4 = arith.constant 0 : index
    %c0_5 = arith.constant 0 : index
    %6 = arith.index_cast %5 : i32 to index
    %c1 = arith.constant 1 : index
    %c0_6 = arith.constant 0 : index
    %7 = vector.load %arg3[%c0_4, %c0_5, %6, %c1, %c0_6] : memref<1x1x18x18x4xbf16, #tpu.memory_space<vmem>>, vector<1x1x16x16x4xbf16>
    %8 = vector.shape_cast %7 : vector<1x1x16x16x4xbf16> to vector<16x16x4xbf16>
    %c0_i32_7 = arith.constant 0 : i32
    %9 = arith.addi %0, %c0_i32_7 : i32
    %c0_8 = arith.constant 0 : index
    %c0_9 = arith.constant 0 : index
    %10 = arith.index_cast %9 : i32 to index
    %c2 = arith.constant 2 : index
    %c0_10 = arith.constant 0 : index
    %11 = vector.load %arg3[%c0_8, %c0_9, %10, %c2, %c0_10] : memref<1x1x18x18x4xbf16, #tpu.memory_space<vmem>>, vector<1x1x16x16x4xbf16>
    %12 = vector.shape_cast %11 : vector<1x1x16x16x4xbf16> to vector<16x16x4xbf16>
    %c1_i32 = arith.constant 1 : i32
    %13 = arith.addi %0, %c1_i32 : i32
    %c0_11 = arith.constant 0 : index
    %c0_12 = arith.constant 0 : index
    %14 = arith.index_cast %13 : i32 to index
    %c0_13 = arith.constant 0 : index
    %c0_14 = arith.constant 0 : index
    %15 = vector.load %arg3[%c0_11, %c0_12, %14, %c0_13, %c0_14] : memref<1x1x18x18x4xbf16, #tpu.memory_space<vmem>>, vector<1x1x16x16x4xbf16>
    %16 = vector.shape_cast %15 : vector<1x1x16x16x4xbf16> to vector<16x16x4xbf16>
    %c1_i32_15 = arith.constant 1 : i32
    %17 = arith.addi %0, %c1_i32_15 : i32
    %c0_16 = arith.constant 0 : index
    %c0_17 = arith.constant 0 : index
    %18 = arith.index_cast %17 : i32 to index
    %c1_18 = arith.constant 1 : index
    %c0_19 = arith.constant 0 : index
    %19 = vector.load %arg3[%c0_16, %c0_17, %18, %c1_18, %c0_19] : memref<1x1x18x18x4xbf16, #tpu.memory_space<vmem>>, vector<1x1x16x16x4xbf16>
    %20 = vector.shape_cast %19 : vector<1x1x16x16x4xbf16> to vector<16x16x4xbf16>
    %c1_i32_20 = arith.constant 1 : i32
    %21 = arith.addi %0, %c1_i32_20 : i32
    %c0_21 = arith.constant 0 : index
    %c0_22 = arith.constant 0 : index
    %22 = arith.index_cast %21 : i32 to index
    %c2_23 = arith.constant 2 : index
    %c0_24 = arith.constant 0 : index
    %23 = vector.load %arg3[%c0_21, %c0_22, %22, %c2_23, %c0_24] : memref<1x1x18x18x4xbf16, #tpu.memory_space<vmem>>, vector<1x1x16x16x4xbf16>
    %24 = vector.shape_cast %23 : vector<1x1x16x16x4xbf16> to vector<16x16x4xbf16>
    %c2_i32 = arith.constant 2 : i32
    %25 = arith.addi %0, %c2_i32 : i32
    %c0_25 = arith.constant 0 : index
    %c0_26 = arith.constant 0 : index
    %26 = arith.index_cast %25 : i32 to index
    %c0_27 = arith.constant 0 : index
    %c0_28 = arith.constant 0 : index
    %27 = vector.load %arg3[%c0_25, %c0_26, %26, %c0_27, %c0_28] : memref<1x1x18x18x4xbf16, #tpu.memory_space<vmem>>, vector<1x1x16x16x4xbf16>
    %28 = vector.shape_cast %27 : vector<1x1x16x16x4xbf16> to vector<16x16x4xbf16>
    %c2_i32_29 = arith.constant 2 : i32
    %29 = arith.addi %0, %c2_i32_29 : i32
    %c0_30 = arith.constant 0 : index
    %c0_31 = arith.constant 0 : index
    %30 = arith.index_cast %29 : i32 to index
    %c1_32 = arith.constant 1 : index
    %c0_33 = arith.constant 0 : index
    %31 = vector.load %arg3[%c0_30, %c0_31, %30, %c1_32, %c0_33] : memref<1x1x18x18x4xbf16, #tpu.memory_space<vmem>>, vector<1x1x16x16x4xbf16>
    %32 = vector.shape_cast %31 : vector<1x1x16x16x4xbf16> to vector<16x16x4xbf16>
    %c2_i32_34 = arith.constant 2 : i32
    %33 = arith.addi %0, %c2_i32_34 : i32
    %c0_35 = arith.constant 0 : index
    %c0_36 = arith.constant 0 : index
    %34 = arith.index_cast %33 : i32 to index
    %c2_37 = arith.constant 2 : index
    %c0_38 = arith.constant 0 : index
    %35 = vector.load %arg3[%c0_35, %c0_36, %34, %c2_37, %c0_38] : memref<1x1x18x18x4xbf16, #tpu.memory_space<vmem>>, vector<1x1x16x16x4xbf16>
    %36 = vector.shape_cast %35 : vector<1x1x16x16x4xbf16> to vector<16x16x4xbf16>
    %37 = tpu.concatenate %4, %8, %12, %16, %20, %24, %28, %32, %36 in 2 : vector<16x16x4xbf16>, vector<16x16x4xbf16>, vector<16x16x4xbf16>, vector<16x16x4xbf16>, vector<16x16x4xbf16>, vector<16x16x4xbf16>, vector<16x16x4xbf16>, vector<16x16x4xbf16>, vector<16x16x4xbf16> -> vector<16x16x36xbf16>
    %38 = vector.shape_cast %37 : vector<16x16x36xbf16> to vector<256x36xbf16>
    %c0_39 = arith.constant 0 : index
    %c0_40 = arith.constant 0 : index
    %39 = vector.load %arg4[%c0_39, %c0_40] : memref<36x128xbf16, #tpu.memory_space<vmem>>, vector<36x128xbf16>
    %cst = arith.constant dense<0.000000e+00> : vector<256x128xf32>
    %40 = tpu.matmul %38, %39, %cst {dimension_numbers = #tpu.dot_dimension_numbers<[1], [0], [0], [1], [0, 0, 1, 1], [], []>} : vector<256x36xbf16>, vector<36x128xbf16>, vector<256x128xf32> -> vector<256x128xf32>
    %c0_41 = arith.constant 0 : index
    %c0_42 = arith.constant 0 : index
    %41 = vector.load %arg5[%c0_41, %c0_42] : memref<1x128xf32, #tpu.memory_space<vmem>>, vector<1x128xf32>
    %42 = vector.broadcast %41 : vector<1x128xf32> to vector<256x128xf32>
    %43 = arith.addf %40, %42 : vector<256x128xf32>
    %cst_43 = arith.constant 0.000000e+00 : f32
    %44 = vector.broadcast %cst_43 : f32 to vector<256x128xf32>
    %45 = arith.maximumf %43, %44 : vector<256x128xf32>
    %46 = arith.truncf %45 : vector<256x128xf32> to vector<256x128xbf16>
    %c0_44 = arith.constant 0 : index
    %c0_45 = arith.constant 0 : index
    %c0_46 = arith.constant 0 : index
    %47 = vector.load %arg6[%c0_44, %c0_45, %c0_46] : memref<1x256x128xbf16, #tpu.memory_space<vmem>>, vector<1x256x128xbf16>
    %48 = vector.shape_cast %47 : vector<1x256x128xbf16> to vector<256x128xbf16>
    %49 = vector.shape_cast %46 : vector<256x128xbf16> to vector<1x256x128xbf16>
    tpu.vector_store %arg6[%c0_44, %c0_45, %c0_46], %49 {strides = array<i32>} : memref<1x256x128xbf16, #tpu.memory_space<vmem>>, vector<1x256x128xbf16>,
    return
  }
  func.func @transform_0(%arg0: i32, %arg1: i32, %arg2: i32) -> (i32, i32, i32, i32, i32) {
    %c0_i32 = arith.constant 0 : i32
    %c0_i32_0 = arith.constant 0 : i32
    %c0_i32_1 = arith.constant 0 : i32
    %c0_i32_2 = arith.constant 0 : i32
    %c0_i32_3 = arith.constant 0 : i32
    return %arg0, %c0_i32, %c0_i32_0, %c0_i32_1, %c0_i32_2 : i32, i32, i32, i32, i32
  }
  func.func @transform_1(%arg0: i32, %arg1: i32, %arg2: i32) -> (i32, i32) {
    %c0_i32 = arith.constant 0 : i32
    %c0_i32_0 = arith.constant 0 : i32
    return %c0_i32, %arg2 : i32, i32
  }
  func.func @transform_2(%arg0: i32, %arg1: i32, %arg2: i32) -> (i32, i32) {
    %c0_i32 = arith.constant 0 : i32
    %c0_i32_0 = arith.constant 0 : i32
    return %c0_i32, %arg2 : i32, i32
  }
  func.func @transform_3(%arg0: i32, %arg1: i32, %arg2: i32) -> (i32, i32, i32) {
    %c0_i32 = arith.constant 0 : i32
    return %arg0, %arg1, %arg2 : i32, i32, i32
  }
}

</mosaic_0001>

<bundles_post_ra>
// kernel: _lambda_.3
= control target key start
LH: loop header
LB: loop body
LE: loop exit
PB: predicated region body
PF: predicated region fallthrough
CT: control target
= control target key end

     0   :  { %s3647_s12 = smov 0   ;;  %s3649_s13 = smov 0   ;;  %s5029_s0 = inlined_call_operand.vmem [shape: bf16[2,4,10,10,4], index: 0, kind: input, shape index: {}]   ;;  %s5030_s1 = inlined_call_operand.vmem [shape: bf16[100,128], index: 1, kind: input, shape index: {}]   ;;  %s5031_s2 = inlined_call_operand.vmem [shape: f32[1,128], index: 2, kind: input, shape index: {}]   ;;  %s5032_s3 = inlined_call_operand.vmem [shape: bf16[2,64,128], index: 3, kind: output, shape index: {}]  }
   0x1   :  { %s3651_s14 = smov 0  }
   0x2 LB: > { %s32_s15 = sadd.s32 1, %s3605_s13  ;;  %p2860_p0 = scmp.ge.s32.totalorder %s3609_s14, 1  ;;  %s3609_s14 = sphi %s3651_s14, %s13_s14   ;;  %s3605_s13 = sphi %s3649_s13, %s5160_s13   ;;  %s3601_s12 = sphi %s3647_s12, %s5159_s12  }
   0x3   : > { %p34_p1 = scmp.ge.s32.totalorder %s32_s15, 2  ;;  %p177_p2 = scmp.lt.s32.totalorder %s3609_s14, 3 }
   0x5   : > { %s5162_s15 = smov (%p34_p1, %s32_s15), 0  ;;  %p178_p3 = pnand %p2860_p0, %p177_p2 }
   0x7   : > { %181 = sbr.rel (%p178_p3) target bundleno = 744 (0x2e8), region = 32 }
   0xe   : > { %p215_p4 = scmp.lt.s32.totalorder %s3601_s12, 1  ;;  %s3611_s20 = smov 4   ;;  %vm1450_vm0 = vcmask 31744   ;;  %vm1475_vm1 = vcmask 64512   ;;  %vm1492_vm2 = vcmask 97280   ;;  %vm1509_vm3 = vcmask 130048  }
   0xf   : > { %s3612_s21 = smov 8   ;;  %s3613_s22 = smov 12   ;;  %vm1526_vm4 = vcmask 162816   ;;  %vm1543_vm5 = vcmask 195584   ;;  %vm1560_vm6 = vcmask 228352   ;;  %vm1577_vm7 = vcmask 261120  }
  0x10   : > { %s5164_s12 = smov (!%p215_p4, %s3601_s12), 1  ;;  %s3614_s23 = smov 16   ;;  %vm2558_vm8 = vcmask 1041408   ;;  %vm1594_vm9 = vcmask 293888   ;;  %vm1611_vm10 = vcmask 326656   ;;  %vm1628_vm11 = vcmask 359424  }
  0x11   : > { %s3331_s16 = smul.u32 320, %s5164_s12  ;;  %s3615_s24 = smov 20   ;;  %vm1645_vm12 = vcmask 392192   ;;  %vm1662_vm13 = vcmask 424960   ;;  %vm1679_vm14 = vcmask 457728   ;;  %vm1696_vm15 = vcmask 490496  }
  0x12   : > { %s3616_s25 = smov 24   ;;  %s3617_s26 = smov 28  }
  0x13   : > { %s3671_s19 = scalar_lea.vmem %s5029_s0, %s3331_s16  ;;  %s3618_s27 = smov 32  }
  0x14   : > { %v3674_v0 = vld [vmem:[%s3671_s19 + $0x60] sm:$0xf]  ;;  %v3677_v1 = vld [vmem:[%s3671_s19 + $0x50] sm:$0xf]  ;;  %v3684_v4 = vld [vmem:[%s3671_s19 + $0x68] sm:$0xf] }
  0x15   : > { %v3042_v2 = vcombine.low %v3674_v0, %v3674_v0  ;;  %v3040_v3 = vcombine.low %v3677_v1, %v3677_v1  ;;  %v3687_v5 = vld [vmem:[%s3671_s19 + $0x58] sm:$0xf]  ;;  %v3043_v6 = vcombine.low %v3684_v4, %v3684_v4  ;;  %v3699_v9 = vld [vmem:[%s3671_s19 + $0x70] sm:$0xf]  ;;  %v3702_v10 = vld [vmem:[%s3671_s19 + $0x88] sm:$0xf] }
  0x16   : > { %v3041_v7 = vcombine.low %v3687_v5, %v3687_v5  ;;  %v3696_v8 = vld [vmem:[%s3671_s19 + $0x78] sm:$0xf]  ;;  %v3705_v11 = vld [vmem:[%s3671_s19 + $0x80] sm:$0xf]  ;;  %v3708_v12 = vld [vmem:[%s3671_s19 + $0x8] sm:$0xf]  ;;  %v3044_v16 = vcombine.low %v3699_v9, %v3699_v9  ;;  %v3047_v29 = vcombine.low %v3702_v10, %v3702_v10 }
  0x17   : > { %502 = vrot.lane.b32.xlu1 %v3042_v2, %s3611_s20  ;;  %498 = vrot.lane.b32.xlu0 %v3040_v3, %s3611_s20  ;;  %v265_v13 = vld [vmem:[%s3671_s19 + $0xc] sm:$0x1]  ;;  %v3712_v14 = vld [vmem:[%s3671_s19] sm:$0xf]  ;;  %v3045_v15 = vcombine.low %v3696_v8, %v3696_v8  ;;  %v3046_v35 = vcombine.low %v3705_v11, %v3705_v11  ;;  %s3619_s28 = smov 36   ;;  %s3620_s29 = smov 40  }
  0x18   : > { %v3049_v17 = vcombine.low %v3708_v12, %v265_v13  ;;  %v264_v18 = vld [vmem:[%s3671_s19 + $0x4] sm:$0x1]  ;;  %v3723_v19 = vld [vmem:[%s3671_s19 + $0x18] sm:$0xf]  ;;  %v267_v21 = vld [vmem:[%s3671_s19 + $0x1c] sm:$0x1] }
  0x19   : > { %v3048_v20 = vcombine.low %v3712_v14, %v264_v18  ;;  %v3728_v22 = vld [vmem:[%s3671_s19 + $0x10] sm:$0xf]  ;;  %v266_v23 = vld [vmem:[%s3671_s19 + $0x14] sm:$0x1]  ;;  %v3051_v25 = vcombine.low %v3723_v19, %v267_v21  ;;  %v3734_v27 = vld [vmem:[%s3671_s19 + $0x28] sm:$0xf] }
  0x1a   : > { %v564_v24 = vshll.u32 %v3049_v17, 16  ;;  %v3050_v26 = vcombine.low %v3728_v22, %v266_v23  ;;  %v269_v28 = vld [vmem:[%s3671_s19 + $0x2c] sm:$0x1]  ;;  %v562_v30 = vshrl.u32 %v3049_v17, 16  ;;  %v3741_v33 = vld [vmem:[%s3671_s19 + $0x20] sm:$0xf] }
  0x1b   : > { %504 = vrot.lane.b32.xlu1 %v3043_v6, %s3611_s20  ;;  %500 = vrot.lane.b32.xlu0 %v3041_v7, %s3611_s20  ;;  %v557_v31 = vshll.u32 %v3048_v20, 16  ;;  %v3053_v32 = vcombine.low %v3734_v27, %v269_v28  ;;  %v268_v34 = vld [vmem:[%s3671_s19 + $0x24] sm:$0x1]  ;;  %v555_v37 = vshrl.u32 %v3048_v20, 16  ;;  %v578_v38 = vshll.u32 %v3051_v25, 16  ;;  %s3621_s30 = smov 44  }
  0x1c   : > { %v566_v36 = vrot.slane %v564_v24, 1  ;;  %v3749_v39 = vld [vmem:[%s3671_s19 + $0x38] sm:$0xf]  ;;  %v571_v41 = vshll.u32 %v3050_v26, 16  ;;  %v271_v42 = vld [vmem:[%s3671_s19 + $0x3c] sm:$0x1]  ;;  %v3052_v45 = vcombine.low %v3741_v33, %v268_v34 }
  0x1d   : > { %v559_v40 = vrot.slane %v557_v31, 1  ;;  %v576_v43 = vshrl.u32 %v3051_v25, 16  ;;  %v569_v44 = vshrl.u32 %v3050_v26, 16  ;;  %v3754_v46 = vld [vmem:[%s3671_s19 + $0x30] sm:$0xf]  ;;  %v580_v50 = vrot.slane %v578_v38, 1 }
  0x1e   : > { %v270_v47 = vld [vmem:[%s3671_s19 + $0x34] sm:$0x1]  ;;  %v567_v49 = vor.u32 %v566_v36, %v562_v30  ;;  %v592_v51 = vshll.u32 %v3053_v32, 16  ;;  %v3055_v52 = vcombine.low %v3749_v39, %v271_v42  ;;  %v573_v54 = vrot.slane %v571_v41, 1  ;;  %v2960_v57 = vld [vmem:[%s3671_s19 + $0xa8] sm:$0xf] }
  0x1f   : > { %508 = vrot.lane.b32.xlu1 %v3045_v15, %s3611_s20  ;;  %506 = vrot.lane.b32.xlu0 %v3044_v16, %s3611_s20  ;;  %v2872_v48 = vld [vmem:[%s3671_s19 + $0x54] sm:$0x1]  ;;  %v560_v53 = vor.u32 %v559_v40, %v555_v37  ;;  %v585_v55 = vshll.u32 %v3052_v45, 16  ;;  %v3054_v56 = vcombine.low %v3754_v46, %v270_v47  ;;  %v3764_v58 = vld [vmem:[%s3671_s19 + $0xac] sm:$0x1]  ;;  %v590_v60 = vshrl.u32 %v3053_v32, 16 }
  0x20   : > { %v3056_v59 = vcombine.low %v3677_v1, %v2872_v48  ;;  %v581_v61 = vor.u32 %v580_v50, %v576_v43  ;;  %v594_v62 = vrot.slane %v592_v51, 1  ;;  %v583_v63 = vshrl.u32 %v3052_v45, 16  ;;  %v2964_v15 = vld [vmem:[%s3671_s19 + $0xc8] sm:$0xf]  ;;  %v3772_v16 = vld [vmem:[%s3671_s19 + $0xcc] sm:$0x1] }
  0x21   : > { %v606_v2 = vshll.u32 %v3055_v52, 16  ;;  %v574_v3 = vor.u32 %v573_v54, %v569_v44  ;;  %v587_v6 = vrot.slane %v585_v55, 1  ;;  %v599_v7 = vshll.u32 %v3054_v56, 16  ;;  %v2961_v1 = vld [vmem:[%s3671_s19 + $0xb0] sm:$0xf]  ;;  %s3622_s4 = smov 48  }
  0x22   : > { %v3160_v13 = vcombine.low %v2960_v57, %v3764_v58  ;;  %v3776_v17 = vld [vmem:[%s3671_s19 + $0xb4] sm:$0x1]  ;;  %v653_v18 = vshll.u32 %v3056_v59, 16  ;;  %v604_v20 = vshrl.u32 %v3055_v52, 16  ;;  %v595_v21 = vor.u32 %v594_v62, %v590_v60  ;;  %v2962_v31 = vld [vmem:[%s3671_s19 + $0xb8] sm:$0xf] }
  0x23   : > { %512 = vrot.lane.b32.xlu1 %v3047_v29, %s3611_s20  ;;  %510 = vrot.lane.b32.xlu0 %v3046_v35, %s3611_s20  ;;  %v608_v23 = vrot.slane %v606_v2, 1  ;;  %v597_v24 = vshrl.u32 %v3054_v56, 16  ;;  %v3164_v25 = vcombine.low %v2964_v15, %v3772_v16  ;;  %v588_v26 = vor.u32 %v587_v6, %v583_v63  ;;  %v3784_v32 = vld [vmem:[%s3671_s19 + $0xbc] sm:$0x1]  ;;  %v2965_v34 = vld [vmem:[%s3671_s19 + $0xd0] sm:$0xf] }
  0x24   : > { %v601_v28 = vrot.slane %v599_v7, 1  ;;  %v1740_v29 = vshll.u32 %v3160_v13, 16  ;;  %v3161_v30 = vcombine.low %v2961_v1, %v3776_v17  ;;  %v3788_v35 = vld [vmem:[%s3671_s19 + $0xd4] sm:$0x1]  ;;  %v651_v36 = vshrl.u32 %v3056_v59, 16  ;;  %s3623_s5 = smov 52  }
  0x25   : > { %v655_v37 = vrot.slane %v653_v18, 1  ;;  %v609_v38 = vor.u32 %v608_v23, %v604_v20  ;;  %v1738_v40 = vshrl.u32 %v3160_v13, 16  ;;  %v1768_v41 = vshll.u32 %v3164_v25, 16  ;;  %v2966_v48 = vld [vmem:[%s3671_s19 + $0xd8] sm:$0xf]  ;;  %s3624_s8 = smov 56  }
  0x26   : > { %v3162_v42 = vcombine.low %v2962_v31, %v3784_v32  ;;  %v602_v43 = vor.u32 %v601_v28, %v597_v24  ;;  %v1742_v44 = vrot.slane %v1740_v29, 1  ;;  %v1747_v45 = vshll.u32 %v3161_v30, 16  ;;  %v2963_v50 = vld [vmem:[%s3671_s19 + $0xc0] sm:$0xf]  ;;  %v3800_v51 = vld [vmem:[%s3671_s19 + $0xc4] sm:$0x1] }
  0x27   : > { %612 = vrot.lane.b32.xlu1 %v567_v49, %s3612_s21  ;;  %610 = vrot.lane.b32.xlu0 %v560_v53, %s3612_s21  ;;  %v3165_v47 = vcombine.low %v2965_v34, %v3788_v35  ;;  %v3796_v49 = vld [vmem:[%s3671_s19 + $0xdc] sm:$0x1]  ;;  %v1766_v52 = vshrl.u32 %v3164_v25, 16  ;;  %v1745_v53 = vshrl.u32 %v3161_v30, 16  ;;  %v656_v54 = vor.u32 %v655_v37, %v651_v36  ;;  %v2968_v59 = vld [vmem:[%s3671_s19 + $0xf8] sm:$0xf] }
  0x28   : > { %v1770_v55 = vrot.slane %v1768_v41, 1  ;;  %v1754_v56 = vshll.u32 %v3162_v42, 16  ;;  %v3166_v57 = vcombine.low %v2966_v48, %v3796_v49  ;;  %v2984_v60 = vld [vmem:[%s3671_s19 + $0xfc] sm:$0x1]  ;;  %v1749_v62 = vrot.slane %v1747_v45, 1 }
  0x29   : > { %v1775_v63 = vshll.u32 %v3165_v47, 16  ;;  %v3163_v2 = vcombine.low %v2963_v50, %v3800_v51  ;;  %v3810_v6 = vld [vmem:[%s3671_s19 + $0xe4] sm:$0x1]  ;;  %v1752_v7 = vshrl.u32 %v3162_v42, 16  ;;  %v1773_v13 = vshrl.u32 %v3165_v47, 16 }
  0x2a   : > { %v3168_v15 = vcombine.low %v2968_v59, %v2984_v60  ;;  %v1771_v1 = vor.u32 %v1770_v55, %v1766_v52  ;;  %v1756_v18 = vrot.slane %v1754_v56, 1  ;;  %v1782_v20 = vshll.u32 %v3166_v57, 16  ;;  %v2988_v23 = vld [vmem:[%s3671_s19 + $0x11c] sm:$0x1]  ;;  %v2969_v29 = vld [vmem:[%s3671_s19 + $0x100] sm:$0xf] }
  0x2b   : > { %616 = vrot.lane.b32.xlu1 %v581_v61, %s3612_s21  ;;  %614 = vrot.lane.b32.xlu0 %v574_v3, %s3612_s21  ;;  %v1743_v61 = vor.u32 %v1742_v44, %v1738_v40  ;;  %v2967_v3 = vld [vmem:[%s3671_s19 + $0xe0] sm:$0xf]  ;;  %v1750_v24 = vor.u32 %v1749_v62, %v1745_v53  ;;  %v1777_v25 = vrot.slane %v1775_v63, 1  ;;  %v2985_v30 = vld [vmem:[%s3671_s19 + $0x104] sm:$0x1]  ;;  %v1780_v31 = vshrl.u32 %v3166_v57, 16 }
  0x2c   : > { %v3167_v28 = vcombine.low %v2967_v3, %v3810_v6  ;;  %v1852_v34 = vshll.u32 %v3168_v15, 16  ;;  %v1784_v36 = vrot.slane %v1782_v20, 1  ;;  %v1759_v37 = vshrl.u32 %v3163_v2, 16  ;;  %v2970_v45 = vld [vmem:[%s3671_s19 + $0x108] sm:$0xf] }
  0x2d   : > { %v3169_v40 = vcombine.low %v2969_v29, %v2985_v30  ;;  %v1757_v41 = vor.u32 %v1756_v18, %v1752_v7  ;;  %v1778_v42 = vor.u32 %v1777_v25, %v1773_v13  ;;  %v2986_v47 = vld [vmem:[%s3671_s19 + $0x10c] sm:$0x1]  ;;  %v2973_v48 = vld [vmem:[%s3671_s19 + $0x120] sm:$0xf]  ;;  %v2989_v50 = vld [vmem:[%s3671_s19 + $0x124] sm:$0x1] }
  0x2e   : > { %v1789_v44 = vshll.u32 %v3167_v28, 16  ;;  %v1850_v52 = vshrl.u32 %v3168_v15, 16  ;;  %v1854_v53 = vrot.slane %v1852_v34, 1  ;;  %v3170_v57 = vcombine.low %v2970_v45, %v2986_v47  ;;  %v2974_v63 = vld [vmem:[%s3671_s19 + $0x128] sm:$0xf] }
  0x2f   : > { %620 = vrot.lane.b32.xlu1 %v595_v21, %s3612_s21  ;;  %618 = vrot.lane.b32.xlu0 %v588_v26, %s3612_s21  ;;  %v2972_v21 = vld [vmem:[%s3671_s19 + $0x118] sm:$0xf]  ;;  %v1761_v26 = vshll.u32 %v3163_v2, 16  ;;  %v1859_v56 = vshll.u32 %v3169_v40, 16  ;;  %v1785_v59 = vor.u32 %v1784_v36, %v1780_v31  ;;  %v3173_v62 = vcombine.low %v2973_v48, %v2989_v50  ;;  %v2990_v2 = vld [vmem:[%s3671_s19 + $0x12c] sm:$0x1] }
  0x30   : > { %v2971_v3 = vld [vmem:[%s3671_s19 + $0x110] sm:$0xf]  ;;  %v2987_v7 = vld [vmem:[%s3671_s19 + $0x114] sm:$0x1]  ;;  %v1855_v13 = vor.u32 %v1854_v53, %v1850_v52  ;;  %v1857_v18 = vshrl.u32 %v3169_v40, 16  ;;  %v3174_v25 = vcombine.low %v2974_v63, %v2990_v2  ;;  %v1864_v30 = vshrl.u32 %v3170_v57, 16 }
  0x31   : > { %v1861_v20 = vrot.slane %v1859_v56, 1  ;;  %v2991_v29 = vld [vmem:[%s3671_s19 + $0x134] sm:$0x1]  ;;  %v2992_v52 = vld [vmem:[%s3671_s19 + $0xa8] sm:$0xe] }
  0x32   : > { %v1894_v40 = vshll.u32 %v3174_v25, 16 }
  0x33   : > { %624 = vrot.lane.b32.xlu1 %v609_v38, %s3612_s21  ;;  %622 = vrot.lane.b32.xlu0 %v602_v43, %s3612_s21  ;;  %v3172_v38 = vcombine.low %v2972_v21, %v2988_v23  ;;  %v1763_v43 = vrot.slane %v1761_v26, 1  ;;  %v1866_v21 = vshll.u32 %v3170_v57, 16  ;;  %v3171_v26 = vcombine.low %v2971_v3, %v2987_v7  ;;  %v2994_v3 = vld [vmem:[%s3671_s19 + $0xb8] sm:$0xe]  ;;  %v2997_v7 = vld [vmem:[%s3671_s19 + $0xd0] sm:$0xe] }
  0x34   : > { %v1862_v34 = vor.u32 %v1861_v20, %v1857_v18  ;;  %v1896_v48 = vrot.slane %v1894_v40, 1  ;;  %v3181_v18 = vcombine.low %v2997_v7, %v3788_v35  ;;  %v2998_v20 = vld [vmem:[%s3671_s19 + $0xd8] sm:$0xe]  ;;  %v3006_v40 = vld [vmem:[%s3671_s19 + $0x40] sm:$0xf] }
  0x35   : > { %v1880_v55 = vshll.u32 %v3172_v38, 16  ;;  %v1764_v60 = vor.u32 %v1763_v43, %v1759_v37  ;;  %v1878_v15 = vshrl.u32 %v3172_v38, 16  ;;  %v1868_v36 = vrot.slane %v1866_v21, 1  ;;  %v2995_v21 = vld [vmem:[%s3671_s19 + $0xc0] sm:$0xe] }
  0x36   : > { %v1885_v37 = vshrl.u32 %v3173_v62, 16  ;;  %v1871_v45 = vshrl.u32 %v3171_v26, 16 }
  0x37   : > { %1793 = vrot.lane.b32.xlu1 %v1743_v61, %s3611_s20  ;;  %706 = vrot.lane.b32.xlu0 %v656_v54, %s3613_s22  ;;  %v1787_v54 = vshrl.u32 %v3167_v28, 16  ;;  %v1791_v61 = vrot.slane %v1789_v44, 1  ;;  %v2975_v28 = vld [vmem:[%s3671_s19 + $0x130] sm:$0xf]  ;;  %v1869_v43 = vor.u32 %v1868_v36, %v1864_v30  ;;  %v1892_v44 = vshrl.u32 %v3174_v25, 16 }
  0x38   : > { %v2999_v25 = vld [vmem:[%s3671_s19 + $0xe0] sm:$0xe]  ;;  %v3001_v30 = vld [vmem:[%s3671_s19 + $0x18] sm:$0xf] }
  0x39   : > { %v1792_v23 = vor.u32 %v1791_v61, %v1787_v54  ;;  %v3176_v54 = vcombine.low %v2992_v52, %v3764_v58  ;;  %v2993_v61 = vld [vmem:[%s3671_s19 + $0xb0] sm:$0xe]  ;;  %v3005_v36 = vld [vmem:[%s3671_s19 + $0x38] sm:$0xf]  ;;  %v3888_v52 = vld [vmem:[%s3671_s19 + $0x80] sm:$0xf] }
  0x3a   : > { %v3177_v2 = vcombine.low %v2993_v61, %v3776_v17  ;;  %v1950_v17 = vrot.slane %v3181_v18, 1  ;;  %v3910_v61 = vld [vmem:[%s3671_s19 + $0x88] sm:$0xf] }
  0x3b   : > { %1801 = vrot.lane.b32.xlu1 %v1771_v1, %s3611_s20  ;;  %1795 = vrot.lane.b32.xlu0 %v1750_v24, %s3611_s20  ;;  %v1882_v1 = vrot.slane %v1880_v55, 1  ;;  %v1887_v24 = vshll.u32 %v3173_v62, 16  ;;  %v1897_v55 = vor.u32 %v1896_v48, %v1892_v44  ;;  %v1945_v62 = vrot.slane %v3176_v54, 1  ;;  %v3008_v44 = vld [vmem:[%s3671_s19 + $0x60] sm:$0xf] }
  0x3c   : > { %v3192_v48 = vcombine.low %v3008_v44, %v3008_v44 }
  0x3d   : > { %v1883_v31 = vor.u32 %v1882_v1, %v1878_v15  ;;  %v1889_v38 = vrot.slane %v1887_v24, 1  ;;  %v1946_v15 = vrot.slane %v3177_v2, 1  ;;  %v3178_v1 = vcombine.low %v2994_v3, %v3784_v32  ;;  %v3915_v2 = vld [vmem:[%s3671_s19 + $0x24] sm:$0x1]  ;;  %v3918_v3 = vld [vmem:[%s3671_s19 + $0x3c] sm:$0x1] }
  0x3e   : > { %v3179_v24 = vcombine.low %v2995_v21, %v3800_v51  ;;  %v3935_v21 = vld [vmem:[%s3671_s19 + $0x44] sm:$0x1] }
  0x3f   : > { %1797 = vrot.lane.b32.xlu1 %v1757_v41, %s3611_s20  ;;  %1803 = vrot.lane.b32.xlu0 %v1778_v42, %s3611_s20  ;;  %v1873_v41 = vshll.u32 %v3171_v26, 16  ;;  %v3175_v42 = vcombine.low %v2975_v28, %v2991_v29  ;;  %v1890_v47 = vor.u32 %v1889_v38, %v1885_v37  ;;  %v3183_v26 = vcombine.low %v2999_v25, %v3810_v6  ;;  %v3000_v28 = vld [vmem:[%s3671_s19 + $0x10] sm:$0xf] }
  0x40   : > { %v1948_v35 = vrot.slane %v3179_v24, 1  ;;  %v3004_v29 = vld [vmem:[%s3671_s19 + $0x30] sm:$0xf]  ;;  %v3185_v6 = vcombine.low %v3001_v30, %v3001_v30  ;;  %v3189_v38 = vcombine.low %v3005_v36, %v3005_v36 }
  0x41   : > { %v1875_v50 = vrot.slane %v1873_v41, 1  ;;  %v1901_v53 = vshll.u32 %v3175_v42, 16  ;;  %v1899_v57 = vshrl.u32 %v3175_v42, 16  ;;  %v1952_v51 = vrot.slane %v3183_v26, 1  ;;  %v3003_v41 = vld [vmem:[%s3671_s19 + $0x28] sm:$0xf] }
  0x42   : > { %v3190_v42 = vcombine.low %v3006_v40, %v3006_v40 }
  0x43   : > { %1805 = vrot.lane.b32.xlu1 %v1785_v59, %s3611_s20  ;;  %1799 = vrot.lane.b32.xlu0 %v1764_v60, %s3611_s20  ;;  %v1876_v56 = vor.u32 %v1875_v50, %v1871_v45  ;;  %v1903_v59 = vrot.slane %v1901_v53, 1  ;;  %v2996_v60 = vld [vmem:[%s3671_s19 + $0xc8] sm:$0xe] }
  0x44   : > { %v3180_v58 = vcombine.low %v2996_v60, %v3772_v16  ;;  %v1947_v16 = vrot.slane %v3178_v1, 1  ;;  %v3007_v45 = vld [vmem:[%s3671_s19 + $0x48] sm:$0xf]  ;;  %v3907_v60 = vld [vmem:[%s3671_s19 + $0x70] sm:$0xf] }
  0x45   : > { %v1904_v63 = vor.u32 %v1903_v59, %v1899_v57  ;;  %v3191_v50 = vcombine.low %v3007_v45, %v3007_v45  ;;  %v3891_v53 = vld [vmem:[%s3671_s19 + $0x68] sm:$0xf]  ;;  %v3904_v59 = vld [vmem:[%s3671_s19 + $0x1c] sm:$0x1]  ;;  %v3194_v7 = vcombine.low %v3907_v60, %v3907_v60  ;;  %v3930_v1 = vld [vmem:[%s3671_s19 + $0x78] sm:$0xf] }
  0x46   : > { %v3193_v57 = vcombine.low %v3891_v53, %v3891_v53  ;;  %v3195_v25 = vcombine.low %v3930_v1, %v3930_v1 }
  0x47   : > { %1905 = vrot.lane.b32.xlu1 %v1855_v13, %s3612_s21  ;;  %1807 = vrot.lane.b32.xlu0 %v1792_v23, %s3611_s20  ;;  %v1949_v13 = vrot.slane %v3180_v58, 1  ;;  %v3182_v23 = vcombine.low %v2998_v20, %v3796_v49  ;;  %v3184_v49 = vcombine.low %v3000_v28, %v3000_v28  ;;  %v3201_v58 = vcombine.low %v3001_v30, %v3904_v59 }
  0x48   : > { %v3205_v20 = vcombine.low %v3005_v36, %v3918_v3 }
  0x49   : > { %v1951_v32 = vrot.slane %v3182_v23, 1  ;;  %v2083_v26 = vshll.u32 %v3201_v58, 16 }
  0x4b   : > { %1913 = vrot.lane.b32.xlu1 %v1883_v31, %s3612_s21  ;;  %1907 = vrot.lane.b32.xlu0 %v1862_v34, %s3612_s21  ;;  %v3188_v31 = vcombine.low %v3004_v29, %v3004_v29  ;;  %v3002_v34 = vld [vmem:[%s3671_s19 + $0x20] sm:$0xf] }
  0x4c   : > { %v3186_v37 = vcombine.low %v3002_v34, %v3002_v34  ;;  %v3202_v18 = vcombine.low %v3002_v34, %v3915_v2 }
  0x4e   : > { %v2090_v34 = vshll.u32 %v3202_v18, 16 }
  0x4f   : > { %1909 = vrot.lane.b32.xlu1 %v1869_v43, %s3612_s21  ;;  %1915 = vrot.lane.b32.xlu0 %v1890_v47, %s3612_s21  ;;  %v3187_v43 = vcombine.low %v3003_v41, %v3003_v41  ;;  %v3883_v47 = vld [vmem:[%s3671_s19 + $0x14] sm:$0x1] }
  0x50   : > { %v3200_v54 = vcombine.low %v3000_v28, %v3883_v47  ;;  %v3206_v28 = vcombine.low %v3006_v40, %v3935_v21  ;;  %v2111_v40 = vshll.u32 %v3205_v20, 16 }
  0x53   : > { %1917 = vrot.lane.b32.xlu1 %v1897_v55, %s3612_s21  ;;  %1911 = vrot.lane.b32.xlu0 %v1876_v56, %s3612_s21  ;;  %v3895_v55 = vld [vmem:[%s3671_s19 + $0x34] sm:$0x1]  ;;  %v3196_v56 = vcombine.low %v3888_v52, %v3888_v52 }
  0x57   : > { %1953 = vrot.lane.b32.xlu1 %v1945_v62, %s3613_s22  ;;  %1919 = vrot.lane.b32.xlu0 %v1904_v63, %s3612_s21  ;;  %v3204_v62 = vcombine.low %v3004_v29, %v3895_v55  ;;  %v2076_v63 = vshll.u32 %v3200_v54, 16  ;;  %v3953_v29 = vld [vmem:[%s3671_s19 + $0x4c] sm:$0x1] }
  0x59   : > { %v2078_v23 = vrot.slane %v2076_v63, 1 }
  0x5b   : > { %1961 = vrot.lane.b32.xlu1 %v1949_v13, %s3613_s22  ;;  %1955 = vrot.lane.b32.xlu0 %v1946_v15, %s3613_s22  ;;  %v3197_v13 = vcombine.low %v3910_v61, %v3910_v61  ;;  %v3927_v15 = vld [vmem:[%s3671_s19 + $0x90] sm:$0xf] }
  0x5c   : > { %v3198_v24 = vcombine.low %v3927_v15, %v3927_v15 }
  0x5f   : > { %1957 = vrot.lane.b32.xlu1 %v1947_v16, %s3613_s22  ;;  %1963 = vrot.lane.b32.xlu0 %v1950_v17, %s3613_s22  ;;  %v3938_v16 = vld [vmem:[%s3671_s19 + $0x2c] sm:$0x1]  ;;  %v2074_v17 = vshrl.u32 %v3200_v54, 16  ;;  %v2092_v54 = vrot.slane %v2090_v34, 1 }
  0x61   : > { %v2079_v30 = vor.u32 %v2078_v23, %v2074_v17 }
  0x63   : > { %1965 = vrot.lane.b32.xlu1 %v1951_v32, %s3613_s22  ;;  %1959 = vrot.lane.b32.xlu0 %v1948_v35, %s3613_s22  ;;  %v3947_v32 = vld [vmem:[%s3671_s19 + $0x98] sm:$0xf]  ;;  %v2104_v35 = vshll.u32 %v3204_v62, 16 }
  0x65   : > { %v2106_v36 = vrot.slane %v2104_v35, 1 }
  0x67   : > { %1993 = vrot.lane.b32.xlu1 %v3184_v49, %s3614_s23  ;;  %1967 = vrot.lane.b32.xlu0 %v1952_v51, %s3613_s22  ;;  %v3203_v49 = vcombine.low %v3003_v41, %v3938_v16  ;;  %v3024_v51 = vld [vmem:[%s3671_s19 + $0x64] sm:$0x1]  ;;  %v3207_v41 = vcombine.low %v3007_v45, %v3953_v29 }
  0x69   : > { %v2095_v35 = vshrl.u32 %v3203_v49, 16 }
  0x6b   : > { %2001 = vrot.lane.b32.xlu1 %v3188_v31, %s3614_s23  ;;  %1995 = vrot.lane.b32.xlu0 %v3185_v6, %s3614_s23  ;;  %v3199_v31 = vcombine.low %v3947_v32, %v3947_v32  ;;  %v2102_v6 = vshrl.u32 %v3204_v62, 16 }
  0x6d   : > { %v2107_v62 = vor.u32 %v2106_v36, %v2102_v6  ;;  %v3030_v6 = vld [vmem:[%s3671_s19 + $0x94] sm:$0x1] }
  0x6f   : > { %1997 = vrot.lane.b32.xlu1 %v3186_v37, %s3614_s23  ;;  %2003 = vrot.lane.b32.xlu0 %v3189_v38, %s3614_s23  ;;  %v2081_v37 = vshrl.u32 %v3201_v58, 16  ;;  %v2085_v38 = vrot.slane %v2083_v26, 1  ;;  %v2113_v58 = vrot.slane %v2111_v40, 1 }
  0x71   : > { %v2086_v63 = vor.u32 %v2085_v38, %v2081_v37  ;;  %v3027_v37 = vld [vmem:[%s3671_s19 + $0x7c] sm:$0x1] }
  0x73   : > { %2005 = vrot.lane.b32.xlu1 %v3190_v42, %s3614_s23  ;;  %1999 = vrot.lane.b32.xlu0 %v3187_v43, %s3614_s23  ;;  %v3208_v42 = vcombine.low %v3008_v44, %v3024_v51  ;;  %v3028_v43 = vld [vmem:[%s3671_s19 + $0x84] sm:$0x1] }
  0x74   : > { %v3212_v44 = vcombine.low %v3888_v52, %v3028_v43 }
  0x75   : > { %v2172_v52 = vshll.u32 %v3208_v42, 16  ;;  %v2170_v38 = vshrl.u32 %v3208_v42, 16 }
  0x76   : > { %v2200_v40 = vshll.u32 %v3212_v44, 16 }
  0x77   : > { %2033 = vrot.lane.b32.xlu1 %v3192_v48, %s3615_s24  ;;  %2007 = vrot.lane.b32.xlu0 %v3191_v50, %s3614_s23  ;;  %v3025_v48 = vld [vmem:[%s3671_s19 + $0x6c] sm:$0x1]  ;;  %v2088_v50 = vshrl.u32 %v3202_v18, 16 }
  0x78   : > { %v3209_v45 = vcombine.low %v3891_v53, %v3025_v48  ;;  %v2174_v48 = vrot.slane %v2172_v52, 1 }
  0x79   : > { %v2093_v23 = vor.u32 %v2092_v54, %v2088_v50 }
  0x7a   : > { %v2179_v54 = vshll.u32 %v3209_v45, 16  ;;  %v2177_v42 = vshrl.u32 %v3209_v45, 16 }
  0x7b   : > { %2041 = vrot.lane.b32.xlu1 %v3196_v56, %s3615_s24  ;;  %2035 = vrot.lane.b32.xlu0 %v3193_v57, %s3615_s24  ;;  %v2109_v56 = vshrl.u32 %v3205_v20, 16  ;;  %v2118_v57 = vshll.u32 %v3206_v28, 16  ;;  %v3029_v20 = vld [vmem:[%s3671_s19 + $0x8c] sm:$0x1] }
  0x7d   : > { %v2114_v26 = vor.u32 %v2113_v58, %v2109_v56  ;;  %v2202_v58 = vrot.slane %v2200_v40, 1 }
  0x7f   : > { %2037 = vrot.lane.b32.xlu1 %v3194_v7, %s3615_s24  ;;  %2043 = vrot.lane.b32.xlu0 %v3197_v13, %s3615_s24  ;;  %v2097_v7 = vshll.u32 %v3203_v49, 16  ;;  %v3026_v13 = vld [vmem:[%s3671_s19 + $0x74] sm:$0x1]  ;;  %v2123_v49 = vshrl.u32 %v3207_v41, 16 }
  0x80   : > { %v3210_v53 = vcombine.low %v3907_v60, %v3026_v13  ;;  %v3214_v60 = vcombine.low %v3927_v15, %v3030_v6 }
  0x81   : > { %v2099_v51 = vrot.slane %v2097_v7, 1  ;;  %v2175_v7 = vor.u32 %v2174_v48, %v2170_v38 }
  0x82   : > { %v2214_v52 = vshll.u32 %v3214_v60, 16 }
  0x83   : > { %2045 = vrot.lane.b32.xlu1 %v3198_v24, %s3615_s24  ;;  %2039 = vrot.lane.b32.xlu0 %v3195_v25, %s3615_s24  ;;  %v2116_v24 = vshrl.u32 %v3206_v28, 16  ;;  %v2120_v25 = vrot.slane %v2118_v57, 1  ;;  %v2100_v43 = vor.u32 %v2099_v51, %v2095_v35  ;;  %v2184_v35 = vshrl.u32 %v3210_v53, 16 }
  0x85   : > { %v2121_v28 = vor.u32 %v2120_v25, %v2116_v24 }
  0x87   : > { %2129 = vrot.lane.b32.xlu1 %v2079_v30, %s3616_s25  ;;  %2047 = vrot.lane.b32.xlu0 %v3199_v31, %s3615_s24  ;;  %v2125_v30 = vshll.u32 %v3207_v41, 16  ;;  %v3213_v31 = vcombine.low %v3910_v61, %v3029_v20  ;;  %v3211_v61 = vcombine.low %v3930_v1, %v3027_v37  ;;  %v2186_v41 = vshll.u32 %v3210_v53, 16 }
  0x88   : > { %v2181_v20 = vrot.slane %v2179_v54, 1 }
  0x89   : > { %v3967_v18 = vpop.permute.xlu1 %502  ;;  %v499_v17 = vpop.permute.xlu0 %498  ;;  %v2127_v50 = vrot.slane %v2125_v30, 1  ;;  %v2193_v30 = vshll.u32 %v3211_v61, 16  ;;  %v2191_v40 = vshrl.u32 %v3211_v61, 16 }
  0x8a   : > { %v2182_v45 = vor.u32 %v2181_v20, %v2177_v42  ;;  %v1459_v48 = vsel %vm1450_vm0, %v3728_v22, %v3967_v18 }
  0x8b   : > { %2137 = vrot.lane.b32.xlu1 %v2107_v62, %s3616_s25  ;;  %2131 = vrot.lane.b32.xlu0 %v2086_v63, %s3616_s25  ;;  %v3031_v62 = vld [vmem:[%s3671_s19 + $0x9c] sm:$0x1]  ;;  %v2198_v63 = vshrl.u32 %v3212_v44, 16  ;;  %v2128_v13 = vor.u32 %v2127_v50, %v2123_v49  ;;  %v2188_v44 = vrot.slane %v2186_v41, 1 }
  0x8c   : > { %v3215_v24 = vcombine.low %v3947_v32, %v3031_v62  ;;  %v1453_v32 = vsel %vm1450_vm0, %v3712_v14, %v499_v17  ;;  %v2216_v14 = vrot.slane %v2214_v52, 1  ;;  %v2195_v17 = vrot.slane %v2193_v30, 1  ;;  %v2877_v30 = vld [vmem:[%s3671_s19 + $0x7c] sm:$0x1] }
  0x8d   : > { %v505_v34 = vpop.permute.xlu1 %504  ;;  %v501_v36 = vpop.permute.xlu0 %500  ;;  %v2203_v25 = vor.u32 %v2202_v58, %v2198_v63  ;;  %v2189_v49 = vor.u32 %v2188_v44, %v2184_v35 }
  0x8e   : > { %v1456_v6 = vsel %vm1450_vm0, %v3708_v12, %v501_v36  ;;  %v3032_v12 = vld [vmem:[%s3671_s19 + $0x10] sm:$0xe]  ;;  %v2221_v36 = vshll.u32 %v3215_v24, 16  ;;  %v1462_v50 = vsel %vm1450_vm0, %v3723_v19, %v505_v34  ;;  %v2196_v22 = vor.u32 %v2195_v17, %v2191_v40  ;;  %v3033_v34 = vld [vmem:[%s3671_s19 + $0x18] sm:$0xe] }
  0x8f   : > { %2133 = vrot.lane.b32.xlu1 %v2093_v23, %s3616_s25  ;;  %2139 = vrot.lane.b32.xlu0 %v2114_v26, %s3616_s25  ;;  %v2207_v23 = vshll.u32 %v3213_v31, 16  ;;  %v2205_v26 = vshrl.u32 %v3213_v31, 16  ;;  %v3216_v63 = vcombine.low %v3032_v12, %v3883_v47  ;;  %v2219_v18 = vshrl.u32 %v3215_v24, 16  ;;  %v3036_v19 = vld [vmem:[%s3671_s19 + $0x30] sm:$0xe] }
  0x90   : > { %v2223_v42 = vrot.slane %v2221_v36, 1  ;;  %v2873_v24 = vld [vmem:[%s3671_s19 + $0x5c] sm:$0x1]  ;;  %v3039_v36 = vld [vmem:[%s3671_s19 + $0x48] sm:$0xe] }
  0x91   : > { %v509_v56 = vpop.permute.xlu1 %508  ;;  %v507_v57 = vpop.permute.xlu0 %506  ;;  %v2209_v51 = vrot.slane %v2207_v23, 1  ;;  %v3057_v52 = vcombine.low %v3687_v5, %v2873_v24 }
  0x92   : > { %v1468_v41 = vsel %vm1450_vm0, %v3734_v27, %v509_v56  ;;  %v2224_v35 = vor.u32 %v2223_v42, %v2219_v18  ;;  %v3220_v27 = vcombine.low %v3036_v19, %v3895_v55  ;;  %v3034_v56 = vld [vmem:[%s3671_s19 + $0x20] sm:$0xe] }
  0x93   : > { %2141 = vrot.lane.b32.xlu1 %v2121_v28, %s3616_s25  ;;  %2135 = vrot.lane.b32.xlu0 %v2100_v43, %s3616_s25  ;;  %v2212_v28 = vshrl.u32 %v3214_v60, 16  ;;  %v2210_v43 = vor.u32 %v2209_v51, %v2205_v26 }
  0x95   : > { %v513_v15 = vpop.permute.xlu1 %512  ;;  %v511_v1 = vpop.permute.xlu0 %510  ;;  %v2217_v58 = vor.u32 %v2216_v14, %v2212_v28  ;;  %v2874_v28 = vld [vmem:[%s3671_s19 + $0x64] sm:$0x1]  ;;  %v2875_v14 = vld [vmem:[%s3671_s19 + $0x6c] sm:$0x1] }
  0x96   : > { %v1474_v44 = vsel %vm1450_vm0, %v3749_v39, %v513_v15  ;;  %v1471_v26 = vsel %vm1450_vm0, %v3754_v46, %v511_v1  ;;  %v2269_v39 = vrot.slane %v3220_v27, 1  ;;  %v3218_v15 = vcombine.low %v3034_v56, %v3915_v2  ;;  %v3038_v1 = vld [vmem:[%s3671_s19 + $0x40] sm:$0xe] }
  0x97   : > { %2225 = vrot.lane.b32.xlu1 %v2175_v7, %s3617_s26  ;;  %2143 = vrot.lane.b32.xlu0 %v2128_v13, %s3616_s25  ;;  %v1465_v7 = vsel %vm1450_vm0, %v3741_v33, %v507_v57  ;;  %v3217_v33 = vcombine.low %v3033_v34, %v3904_v59  ;;  %v3037_v57 = vld [vmem:[%s3671_s19 + $0x38] sm:$0xe]  ;;  %v3222_v40 = vcombine.low %v3038_v1, %v3935_v21 }
  0x98   : > { %v3221_v5 = vcombine.low %v3037_v57, %v3918_v3  ;;  %v2267_v3 = vrot.slane %v3218_v15, 1  ;;  %v3059_v21 = vcombine.low %v3684_v4, %v2875_v14 }
  0x99   : > { %v613_v37 = vpop.permute.xlu1 %612  ;;  %v611_v53 = vpop.permute.xlu0 %610  ;;  %v2266_v46 = vrot.slane %v3217_v33, 1 }
  0x9a   : > { %v3991_v31 = vsel %vm1475_vm1, %v1456_v6, %v613_v37  ;;  %v3994_v38 = vsel %vm1475_vm1, %v1453_v32, %v611_v53  ;;  %v2876_v32 = vld [vmem:[%s3671_s19 + $0x74] sm:$0x1]  ;;  %v3035_v6 = vld [vmem:[%s3671_s19 + $0x28] sm:$0xe]  ;;  %v2270_v17 = vrot.slane %v3221_v5, 1  ;;  %v672_v56 = vshrl.u32 %v3059_v21, 16 }
  0x9b   : > { %2233 = vrot.lane.b32.xlu1 %v2203_v25, %s3617_s26  ;;  %2227 = vrot.lane.b32.xlu0 %v2182_v45, %s3617_s26  ;;  %v2265_v25 = vrot.slane %v3216_v63, 1  ;;  %v3060_v2 = vcombine.low %v3699_v9, %v2876_v32  ;;  %v3219_v12 = vcombine.low %v3035_v6, %v3938_v16  ;;  %v658_v9 = vshrl.u32 %v3057_v52, 16  ;;  %v281_v6 = vld [vmem:[%s3671_s19 + $0x8] sm:$0xe] }
  0x9c   : > { %v3223_v16 = vcombine.low %v3039_v36, %v3953_v29  ;;  %v285_v36 = vld [vmem:[%s3671_s19 + $0x28] sm:$0xe] }
  0x9d   : > { %v617_v54 = vpop.permute.xlu1 %616  ;;  %v615_v60 = vpop.permute.xlu0 %614 }
  0x9e   : > { %v4005_v61 = vsel %vm1475_vm1, %v1462_v50, %v617_v54  ;;  %v4008_v62 = vsel %vm1475_vm1, %v1459_v48, %v615_v60  ;;  %v3058_v48 = vcombine.low %v3674_v0, %v2874_v28  ;;  %v2879_v54 = vld [vmem:[%s3671_s19 + $0x8c] sm:$0x1]  ;;  %v2271_v60 = vrot.slane %v3222_v40, 1  ;;  %v280_v28 = vld [vmem:[%s3671_s19] sm:$0xe] }
  0x9f   : > { %2229 = vrot.lane.b32.xlu1 %v2189_v49, %s3617_s26  ;;  %2235 = vrot.lane.b32.xlu0 %v2210_v43, %s3617_s26  ;;  %v3061_v49 = vcombine.low %v3696_v8, %v2877_v30  ;;  %v660_v43 = vshll.u32 %v3057_v52, 16  ;;  %v681_v0 = vshll.u32 %v3060_v2, 16  ;;  %v3063_v19 = vcombine.low %v3702_v10, %v2879_v54 }
  0xa0   : > { %v667_v42 = vshll.u32 %v3058_v48, 16  ;;  %v2272_v29 = vrot.slane %v3223_v16, 1  ;;  %v665_v33 = vshrl.u32 %v3058_v48, 16  ;;  %v284_v48 = vld [vmem:[%s3671_s19 + $0x20] sm:$0xe] }
  0xa1   : > { %v621_v13 = vpop.permute.xlu1 %620  ;;  %v619_v47 = vpop.permute.xlu0 %618  ;;  %v662_v63 = vrot.slane %v660_v43, 1  ;;  %v688_v18 = vshll.u32 %v3061_v49, 16  ;;  %v3563_v43 = vld [vmem:[%s3671_s19 + $0xc] sm:$0x1] }
  0xa2   : > { %v4020_v20 = vsel %vm1475_vm1, %v1468_v41, %v621_v13  ;;  %v4023_v23 = vsel %vm1475_vm1, %v1465_v7, %v619_v47  ;;  %v686_v7 = vshrl.u32 %v3061_v49, 16  ;;  %v679_v13 = vshrl.u32 %v3060_v2, 16 }
  0xa3   : > { %2237 = vrot.lane.b32.xlu1 %v2217_v58, %s3617_s26  ;;  %2231 = vrot.lane.b32.xlu0 %v2196_v22, %s3617_s26  ;;  %v2878_v58 = vld [vmem:[%s3671_s19 + $0x84] sm:$0x1]  ;;  %v2268_v22 = vrot.slane %v3219_v12, 1  ;;  %v674_v47 = vshll.u32 %v3059_v21, 16  ;;  %v663_v24 = vor.u32 %v662_v63, %v658_v9  ;;  %v3065_v14 = vcombine.low %v281_v6, %v3563_v43  ;;  %v3565_v63 = vld [vmem:[%s3671_s19 + $0x2c] sm:$0x1] }
  0xa4   : > { %v3062_v41 = vcombine.low %v3705_v11, %v2878_v58  ;;  %v3069_v58 = vcombine.low %v285_v36, %v3565_v63 }
  0xa5   : > { %v625_v45 = vpop.permute.xlu1 %624  ;;  %v623_v51 = vpop.permute.xlu0 %622  ;;  %v676_v57 = vrot.slane %v674_v47, 1 }
  0xa6   : > { %v4038_v55 = vsel %vm1475_vm1, %v1474_v44, %v625_v45  ;;  %v4041_v59 = vsel %vm1475_vm1, %v1471_v26, %v623_v51  ;;  %v669_v44 = vrot.slane %v667_v42, 1  ;;  %v702_v45 = vshll.u32 %v3063_v19, 16 }
  0xa7   : > { %2273 = vrot.lane.b32.xlu1 %v2265_v25, %s3618_s27  ;;  %2239 = vrot.lane.b32.xlu0 %v2224_v35, %s3617_s26  ;;  %v690_v25 = vrot.slane %v688_v18, 1  ;;  %v683_v35 = vrot.slane %v681_v0, 1  ;;  %v695_v51 = vshll.u32 %v3062_v41, 16  ;;  %v677_v15 = vor.u32 %v676_v57, %v672_v56  ;;  %v283_v18 = vld [vmem:[%s3671_s19 + $0x18] sm:$0xe] }
  0xa8   : > { %v670_v5 = vor.u32 %v669_v44, %v665_v33  ;;  %v704_v1 = vrot.slane %v702_v45, 1  ;;  %v282_v0 = vld [vmem:[%s3671_s19 + $0x10] sm:$0xe]  ;;  %v3570_v45 = vld [vmem:[%s3671_s19 + $0x34] sm:$0x1] }
  0xa9   : > { %v4051_v37 = vpop.permute.xlu1 %1793  ;;  %v4053_v53 = vpop.permute.xlu0 %706  ;;  %v691_v11 = vor.u32 %v690_v25, %v686_v7  ;;  %v684_v26 = vor.u32 %v683_v35, %v679_v13  ;;  %v697_v32 = vrot.slane %v695_v51, 1  ;;  %v3567_v13 = vld [vmem:[%s3671_s19 + $0x1c] sm:$0x1]  ;;  %v287_v25 = vld [vmem:[%s3671_s19 + $0x38] sm:$0xe] }
  0xaa   : > { %v3067_v47 = vcombine.low %v283_v18, %v3567_v13  ;;  %v286_v35 = vld [vmem:[%s3671_s19 + $0x30] sm:$0xe]  ;;  %v2887_v18 = vld [vmem:[%s3671_s19 + $0xd8] sm:$0xf] }
  0xab   : > { %2281 = vrot.lane.b32.xlu1 %v2269_v39, %s3618_s27  ;;  %2275 = vrot.lane.b32.xlu0 %v2266_v46, %s3618_s27  ;;  %v700_v39 = vshrl.u32 %v3063_v19, 16  ;;  %v693_v46 = vshrl.u32 %v3062_v41, 16  ;;  %v751_v41 = vrot.slane %v3069_v58, 1  ;;  %v3070_v51 = vcombine.low %v286_v35, %v3570_v45  ;;  %v4200_v45 = vld [vmem:[%s3671_s19 + $0x118] sm:$0xf] }
  0xac   : > { %v749_v57 = vrot.slane %v3067_v47, 1  ;;  %v3079_v13 = vcombine.low %v2887_v18, %v2887_v18 }
  0xad   : > { %v4065_v50 = vpop.permute.xlu1 %1801  ;;  %v4067_v8 = vpop.permute.xlu0 %1795  ;;  %v705_v2 = vor.u32 %v704_v1, %v700_v39  ;;  %v2881_v1 = vld [vmem:[%s3671_s19 + $0xa8] sm:$0xf] }
  0xae   : > { %5033 = vst [vmem:[#allocation2_spill] sm:$0xff] %v4065_v50  ;;  %5034 = vst [vmem:[#allocation3_spill] sm:$0xff] %v4067_v8  ;;  %v3073_v43 = vcombine.low %v2881_v1, %v2881_v1 }
  0xaf   : > { %2277 = vrot.lane.b32.xlu1 %v2267_v3, %s3618_s27  ;;  %2283 = vrot.lane.b32.xlu0 %v2270_v17, %s3618_s27  ;;  %v698_v3 = vor.u32 %v697_v32, %v693_v46  ;;  %v3564_v17 = vld [vmem:[%s3671_s19 + $0x4] sm:$0x1]  ;;  %v2880_v32 = vld [vmem:[%s3671_s19 + $0xa0] sm:$0xf] }
  0xb0   : > { %v3064_v12 = vcombine.low %v280_v28, %v3564_v17 }
  0xb1   : > { %v4076_v34 = vpop.permute.xlu1 %1797  ;;  %v4078_v4 = vpop.permute.xlu0 %1803 }
  0xb2   : > { %5035 = vst [vmem:[#allocation4_spill] sm:$0xff] %v4076_v34  ;;  %5036 = vst [vmem:[#allocation5_spill] sm:$0xff] %v4078_v4  ;;  %v746_v9 = vrot.slane %v3064_v12, 1 }
  0xb3   : > { %2285 = vrot.lane.b32.xlu1 %v2271_v60, %s3618_s27  ;;  %2279 = vrot.lane.b32.xlu0 %v2268_v22, %s3618_s27  ;;  %v747_v60 = vrot.slane %v3065_v14, 1  ;;  %v3566_v22 = vld [vmem:[%s3671_s19 + $0x24] sm:$0x1]  ;;  %v3072_v14 = vcombine.low %v2880_v32, %v2880_v32 }
  0xb4   : > { %v3068_v16 = vcombine.low %v284_v48, %v3566_v22 }
  0xb5   : > { %v4083_v27 = vpop.permute.xlu1 %1805  ;;  %v4085_v10 = vpop.permute.xlu0 %1799 }
  0xb6   : > { %5037 = vst [vmem:[#allocation6_spill] sm:$0xff] %v4083_v27  ;;  %5038 = vst [vmem:[#allocation7_spill] sm:$0xff] %v4085_v10  ;;  %v750_v7 = vrot.slane %v3068_v16, 1  ;;  %v2945_v10 = vld [vmem:[%s3671_s19 + $0x64] sm:$0x1] }
  0xb7   : > { %708 = vrot.lane.b32.xlu1 %v663_v24, %s3613_s22  ;;  %2287 = vrot.lane.b32.xlu0 %v2272_v29, %s3618_s27  ;;  %v3568_v24 = vld [vmem:[%s3671_s19 + $0x14] sm:$0x1]  ;;  %v2944_v27 = vld [vmem:[%s3671_s19 + $0x5c] sm:$0x1] }
  0xb8   : > { %v3066_v29 = vcombine.low %v282_v0, %v3568_v24  ;;  %v2886_v0 = vld [vmem:[%s3671_s19 + $0xd0] sm:$0xf]  ;;  %v4178_v24 = vld [vmem:[%s3671_s19 + $0xf8] sm:$0xf] }
  0xb9   : > { %v4089_v52 = vpop.permute.xlu1 %1905  ;;  %v4091_v30 = vpop.permute.xlu0 %1807  ;;  %v3078_v47 = vcombine.low %v2886_v0, %v2886_v0 }
  0xba   : > { %5039 = vst [vmem:[#allocation8_spill] sm:$0xff] %v4089_v52  ;;  %5040 = vst [vmem:[#allocation9_spill] sm:$0xff] %v4091_v30  ;;  %v748_v44 = vrot.slane %v3066_v29, 1  ;;  %v4181_v29 = vld [vmem:[%s3671_s19 + $0xf0] sm:$0xf] }
  0xbb   : > { %716 = vrot.lane.b32.xlu1 %v691_v11, %s3613_s22  ;;  %714 = vrot.lane.b32.xlu0 %v684_v26, %s3613_s22  ;;  %v3569_v11 = vld [vmem:[%s3671_s19 + $0x3c] sm:$0x1] }
  0xbc   : > { %v3071_v26 = vcombine.low %v287_v25, %v3569_v11  ;;  %v3080_v11 = vcombine.low %v4181_v29, %v4181_v29 }
  0xbd   : > { %v4097_v49 = vpop.permute.xlu1 %1913  ;;  %v4099_v40 = vpop.permute.xlu0 %1907 }
  0xbe   : > { %5041 = vst [vmem:[#allocation10_spill] sm:$0xff] %v4097_v49  ;;  %5042 = vst [vmem:[#allocation11_spill] sm:$0xff] %v4099_v40 }
  0xbf   : > { %712 = vrot.lane.b32.xlu1 %v677_v15, %s3613_s22  ;;  %710 = vrot.lane.b32.xlu0 %v670_v5, %s3613_s22  ;;  %v753_v15 = vrot.slane %v3071_v26, 1  ;;  %v752_v5 = vrot.slane %v3070_v51, 1  ;;  %v4197_v26 = vld [vmem:[%s3671_s19 + $0xa4] sm:$0x1]  ;;  %v4203_v51 = vld [vmem:[%s3671_s19 + $0x110] sm:$0xf] }
  0xc1   : > { %v4107_v21 = vpop.permute.xlu1 %1909  ;;  %v4109_v54 = vpop.permute.xlu0 %1915 }
  0xc2   : > { %5043 = vst [vmem:[#allocation12_spill] sm:$0xff] %v4107_v21  ;;  %5044 = vst [vmem:[#allocation13_spill] sm:$0xff] %v4109_v54 }
  0xc3   : > { %720 = vrot.lane.b32.xlu1 %v705_v2, %s3613_s22  ;;  %718 = vrot.lane.b32.xlu0 %v698_v3, %s3613_s22  ;;  %v2885_v2 = vld [vmem:[%s3671_s19 + $0xc8] sm:$0xf]  ;;  %v2884_v3 = vld [vmem:[%s3671_s19 + $0xc0] sm:$0xf]  ;;  %s3625_s22 = smov 60  }
  0xc4   : > { %v3077_v36 = vcombine.low %v2885_v2, %v2885_v2  ;;  %v3076_v48 = vcombine.low %v2884_v3, %v2884_v3 }
  0xc5   : > { %v4117_v42 = vpop.permute.xlu1 %1917  ;;  %v4119_v19 = vpop.permute.xlu0 %1911 }
  0xc6   : > { %5045 = vst [vmem:[#allocation14_spill] sm:$0xff] %v4117_v42  ;;  %5046 = vst [vmem:[#allocation15_spill] sm:$0xff] %v4119_v19 }
  0xc7   : > { %756 = vrot.lane.b32.xlu1 %v747_v60, %s3614_s23  ;;  %754 = vrot.lane.b32.xlu0 %v746_v9, %s3614_s23  ;;  %v2883_v60 = vld [vmem:[%s3671_s19 + $0xb8] sm:$0xf]  ;;  %v4159_v9 = vld [vmem:[%s3671_s19 + $0xb0] sm:$0xf] }
  0xc8   : > { %v3075_v22 = vcombine.low %v2883_v60, %v2883_v60  ;;  %v3074_v16 = vcombine.low %v4159_v9, %v4159_v9 }
  0xc9   : > { %v4127_v33 = vpop.permute.xlu1 %1953  ;;  %v4129_v56 = vpop.permute.xlu0 %1919 }
  0xca   : > { %5047 = vst [vmem:[#allocation16_spill] sm:$0xff] %v4127_v33  ;;  %5048 = vst [vmem:[#allocation17_spill] sm:$0xff] %v4129_v56 }
  0xcb   : > { %764 = vrot.lane.b32.xlu1 %v751_v41, %s3614_s23  ;;  %762 = vrot.lane.b32.xlu0 %v750_v7, %s3614_s23 }
  0xcd   : > { %v4135_v39 = vpop.permute.xlu1 %1961  ;;  %v4137_v46 = vpop.permute.xlu0 %1955 }
  0xce   : > { %5049 = vst [vmem:[#allocation18_spill] sm:$0xff] %v4135_v39  ;;  %5050 = vst [vmem:[#allocation19_spill] sm:$0xff] %v4137_v46 }
  0xcf   : > { %760 = vrot.lane.b32.xlu1 %v749_v57, %s3614_s23  ;;  %758 = vrot.lane.b32.xlu0 %v748_v44, %s3614_s23  ;;  %v4188_v57 = vld [vmem:[%s3671_s19 + $0xac] sm:$0x1]  ;;  %v3081_v44 = vcombine.low %v4178_v24, %v4178_v24 }
  0xd1   : > { %v4143_v6 = vpop.permute.xlu1 %1957  ;;  %v4145_v28 = vpop.permute.xlu0 %1963 }
  0xd2   : > { %5051 = vst [vmem:[#allocation20_spill] sm:$0xff] %v4143_v6  ;;  %5052 = vst [vmem:[#allocation21_spill] sm:$0xff] %v4145_v28  ;;  %v4254_v6 = vld [vmem:[%s3671_s19 + $0xdc] sm:$0x1] }
  0xd3   : > { %768 = vrot.lane.b32.xlu1 %v753_v15, %s3614_s23  ;;  %766 = vrot.lane.b32.xlu0 %v752_v5, %s3614_s23 }
  0xd5   : > { %v4151_v17 = vpop.permute.xlu1 %1965  ;;  %v4153_v12 = vpop.permute.xlu0 %1959 }
  0xd6   : > { %5053 = vst [vmem:[#allocation22_spill] sm:$0xff] %v4151_v17  ;;  %5054 = vst [vmem:[#allocation23_spill] sm:$0xff] %v4153_v12  ;;  %v4236_v17 = vld [vmem:[%s3671_s19 + $0xbc] sm:$0x1] }
  0xd7   : > { %796 = vrot.lane.b32.xlu1 %v3073_v43, %s3615_s24  ;;  %794 = vrot.lane.b32.xlu0 %v3072_v14, %s3615_s24  ;;  %v3089_v43 = vcombine.low %v2881_v1, %v4188_v57  ;;  %v3088_v14 = vcombine.low %v2880_v32, %v4197_v26  ;;  %v4224_v1 = vld [vmem:[%s3671_s19 + $0x108] sm:$0xf]  ;;  %v4227_v32 = vld [vmem:[%s3671_s19 + $0x100] sm:$0xf] }
  0xd8   : > { %v3083_v56 = vcombine.low %v4224_v1, %v4224_v1 }
  0xd9   : > { %v4161_v63 = vpop.permute.xlu1 %1993  ;;  %v4163_v58 = vpop.permute.xlu0 %1967  ;;  %v875_v12 = vshrl.u32 %v3088_v14, 16 }
  0xda   : > { %5055 = vst [vmem:[#allocation24_spill] sm:$0xff] %v4161_v63  ;;  %5056 = vst [vmem:[#allocation25_spill] sm:$0xff] %v4163_v58  ;;  %v877_v58 = vshll.u32 %v3088_v14, 16 }
  0xdb   : > { %804 = vrot.lane.b32.xlu1 %v3077_v36, %s3615_s24  ;;  %802 = vrot.lane.b32.xlu0 %v3076_v48, %s3615_s24  ;;  %v4212_v36 = vld [vmem:[%s3671_s19 + $0xcc] sm:$0x1]  ;;  %v4215_v48 = vld [vmem:[%s3671_s19 + $0xc4] sm:$0x1] }
  0xdd   : > { %v4171_v41 = vpop.permute.xlu1 %2001  ;;  %v4173_v7 = vpop.permute.xlu0 %1995 }
  0xde   : > { %5057 = vst [vmem:[#allocation26_spill] sm:$0xff] %v4171_v41  ;;  %5058 = vst [vmem:[#allocation27_spill] sm:$0xff] %v4173_v7  ;;  %v4262_v41 = vld [vmem:[%s3671_s19 + $0xd4] sm:$0x1] }
  0xdf   : > { %800 = vrot.lane.b32.xlu1 %v3075_v22, %s3615_s24  ;;  %798 = vrot.lane.b32.xlu0 %v3074_v16, %s3615_s24  ;;  %v3085_v22 = vcombine.low %v4200_v45, %v4200_v45  ;;  %v3084_v16 = vcombine.low %v4203_v51, %v4203_v51 }
  0xe1   : > { %v4183_v25 = vpop.permute.xlu1 %1997  ;;  %v4185_v35 = vpop.permute.xlu0 %2003 }
  0xe2   : > { %5059 = vst [vmem:[#allocation28_spill] sm:$0xff] %v4183_v25  ;;  %5060 = vst [vmem:[#allocation29_spill] sm:$0xff] %v4185_v35  ;;  %v4248_v25 = vld [vmem:[%s3671_s19 + $0x128] sm:$0xf]  ;;  %v3091_v35 = vcombine.low %v2883_v60, %v4236_v17  ;;  %v3095_v60 = vcombine.low %v2887_v18, %v4254_v6 }
  0xe3   : > { %808 = vrot.lane.b32.xlu1 %v3079_v13, %s3615_s24  ;;  %806 = vrot.lane.b32.xlu0 %v3078_v47, %s3615_s24  ;;  %v3087_v14 = vcombine.low %v4248_v25, %v4248_v25 }
  0xe4   : > { %v898_v54 = vshll.u32 %v3091_v35, 16 }
  0xe5   : > { %v4205_v15 = vpop.permute.xlu1 %2005  ;;  %v4207_v5 = vpop.permute.xlu0 %1999 }
  0xe6   : > { %5061 = vst [vmem:[#allocation30_spill] sm:$0xff] %v4205_v15  ;;  %5062 = vst [vmem:[#allocation31_spill] sm:$0xff] %v4207_v5  ;;  %v3092_v15 = vcombine.low %v2884_v3, %v4215_v48  ;;  %v3082_v5 = vcombine.low %v4227_v32, %v4227_v32  ;;  %v882_v3 = vshrl.u32 %v3089_v43, 16 }
  0xe7   : > { %836 = vrot.lane.b32.xlu1 %v3081_v44, %s3616_s25  ;;  %834 = vrot.lane.b32.xlu0 %v3080_v11, %s3616_s25  ;;  %v884_v44 = vshll.u32 %v3089_v43, 16  ;;  %v3093_v11 = vcombine.low %v2885_v2, %v4212_v36  ;;  %v4251_v2 = vld [vmem:[%s3671_s19 + $0x120] sm:$0xf] }
  0xe8   : > { %v905_v39 = vshll.u32 %v3092_v15, 16  ;;  %v903_v7 = vshrl.u32 %v3092_v15, 16  ;;  %v2908_v15 = vld [vmem:[%s3671_s19 + $0x114] sm:$0x1] }
  0xe9   : > { %v4229_v13 = vpop.permute.xlu1 %2033  ;;  %v4231_v47 = vpop.permute.xlu0 %2007  ;;  %v886_v19 = vrot.slane %v884_v44, 1  ;;  %v912_v28 = vshll.u32 %v3093_v11, 16  ;;  %v3086_v44 = vcombine.low %v4251_v2, %v4251_v2 }
  0xea   : > { %5063 = vst [vmem:[#allocation32_spill] sm:$0xff] %v4229_v13  ;;  %5064 = vst [vmem:[#allocation33_spill] sm:$0xff] %v4231_v47  ;;  %v4245_v47 = vld [vmem:[%s3671_s19 + $0xb4] sm:$0x1]  ;;  %v879_v13 = vrot.slane %v877_v58, 1  ;;  %v907_v63 = vrot.slane %v905_v39, 1 }
  0xeb   : > { %844 = vrot.lane.b32.xlu1 %v3085_v22, %s3616_s25  ;;  %842 = vrot.lane.b32.xlu0 %v3084_v16, %s3616_s25  ;;  %v3090_v43 = vcombine.low %v4159_v9, %v4245_v47  ;;  %v2904_v9 = vld [vmem:[%s3671_s19 + $0xf4] sm:$0x1]  ;;  %v887_v46 = vor.u32 %v886_v19, %v882_v3  ;;  %v896_v19 = vshrl.u32 %v3091_v35, 16  ;;  %v3100_v3 = vcombine.low %v4203_v51, %v2908_v15  ;;  %v2910_v15 = vld [vmem:[%s3671_s19 + $0x124] sm:$0x1] }
  0xec   : > { %v880_v18 = vor.u32 %v879_v13, %v875_v12  ;;  %v900_v12 = vrot.slane %v898_v54, 1 }
  0xed   : > { %v4256_v22 = vpop.permute.xlu1 %2041  ;;  %v4258_v16 = vpop.permute.xlu0 %2035 }
  0xee   : > { %5065 = vst [vmem:[#allocation34_spill] sm:$0xff] %v4256_v22  ;;  %5066 = vst [vmem:[#allocation35_spill] sm:$0xff] %v4258_v16  ;;  %v3094_v22 = vcombine.low %v2886_v0, %v4262_v41  ;;  %v2905_v16 = vld [vmem:[%s3671_s19 + $0xfc] sm:$0x1]  ;;  %v891_v0 = vshll.u32 %v3090_v43, 16  ;;  %v901_v54 = vor.u32 %v900_v12, %v896_v19 }
  0xef   : > { %840 = vrot.lane.b32.xlu1 %v3083_v56, %s3616_s25  ;;  %838 = vrot.lane.b32.xlu0 %v3082_v5, %s3616_s25  ;;  %v910_v56 = vshrl.u32 %v3093_v11, 16  ;;  %v914_v5 = vrot.slane %v912_v28, 1  ;;  %v3097_v33 = vcombine.low %v4178_v24, %v2905_v16  ;;  %v2909_v28 = vld [vmem:[%s3671_s19 + $0x11c] sm:$0x1]  ;;  %v908_v11 = vor.u32 %v907_v63, %v903_v7  ;;  %v2907_v16 = vld [vmem:[%s3671_s19 + $0x10c] sm:$0x1] }
  0xf0   : > { %v889_v24 = vshrl.u32 %v3090_v43, 16  ;;  %v3101_v13 = vcombine.low %v4200_v45, %v2909_v28  ;;  %v2906_v63 = vld [vmem:[%s3671_s19 + $0x104] sm:$0x1]  ;;  %v924_v7 = vshrl.u32 %v3095_v60, 16  ;;  %v3099_v43 = vcombine.low %v4224_v1, %v2907_v16 }
  0xf1   : > { %v4275_v42 = vpop.permute.xlu1 %2037  ;;  %v4277_v58 = vpop.permute.xlu0 %2043  ;;  %v915_v39 = vor.u32 %v914_v5, %v910_v56  ;;  %v917_v56 = vshrl.u32 %v3094_v22, 16  ;;  %v980_v45 = vshll.u32 %v3097_v33, 16 }
  0xf2   : > { %5067 = vst [vmem:[#allocation36_spill] sm:$0xff] %v4275_v42  ;;  %5068 = vst [vmem:[#allocation37_spill] sm:$0xff] %v4277_v58  ;;  %v3096_v42 = vcombine.low %v4181_v29, %v2904_v9  ;;  %v893_v29 = vrot.slane %v891_v0, 1 }
  0xf3   : > { %848 = vrot.lane.b32.xlu1 %v3087_v14, %s3616_s25  ;;  %846 = vrot.lane.b32.xlu0 %v3086_v44, %s3616_s25  ;;  %v926_v14 = vshll.u32 %v3095_v60, 16  ;;  %v919_v44 = vshll.u32 %v3094_v22, 16  ;;  %v2911_v60 = vld [vmem:[%s3671_s19 + $0x12c] sm:$0x1]  ;;  %v982_v19 = vrot.slane %v980_v45, 1 }
  0xf4   : > { %v894_v35 = vor.u32 %v893_v29, %v889_v24  ;;  %v973_v51 = vshll.u32 %v3096_v42, 16  ;;  %v971_v12 = vshrl.u32 %v3096_v42, 16  ;;  %v3102_v24 = vcombine.low %v4251_v2, %v2910_v15 }
  0xf5   : > { %v4284_v58 = vpop.permute.xlu1 %2045  ;;  %v4286_v21 = vpop.permute.xlu0 %2039  ;;  %v921_v5 = vrot.slane %v919_v44, 1  ;;  %v1008_v44 = vshll.u32 %v3101_v13, 16  ;;  %v994_v42 = vshll.u32 %v3099_v43, 16 }
  0xf6   : > { %5069 = vst [vmem:[#allocation38_spill] sm:$0xff] %v4284_v58  ;;  %5070 = vst [vmem:[#allocation39_spill] sm:$0xff] %v4286_v21  ;;  %v975_v1 = vrot.slane %v973_v51, 1  ;;  %v992_v51 = vshrl.u32 %v3099_v43, 16 }
  0xf7   : > { %932 = vrot.lane.b32.xlu1 %v887_v46, %s3617_s26  ;;  %930 = vrot.lane.b32.xlu0 %v880_v18, %s3617_s26  ;;  %v928_v46 = vrot.slane %v926_v14, 1  ;;  %v3098_v18 = vcombine.low %v4227_v32, %v2906_v63  ;;  %v922_v14 = vor.u32 %v921_v5, %v917_v56  ;;  %v3103_v32 = vcombine.low %v4248_v25, %v2911_v60 }
  0xf8   : > { %v1006_v63 = vshrl.u32 %v3101_v13, 16  ;;  %v976_v5 = vor.u32 %v975_v1, %v971_v12  ;;  %v996_v13 = vrot.slane %v994_v42, 1  ;;  %v1013_v12 = vshrl.u32 %v3102_v24, 16  ;;  %v2916_v42 = vld [vmem:[%s3671_s19 + $0xc0] sm:$0xe] }
  0xf9   : > { %v4295_v9 = vpop.permute.xlu1 %2129  ;;  %v4297_v58 = vpop.permute.xlu0 %2047  ;;  %v929_v22 = vor.u32 %v928_v46, %v924_v7  ;;  %v1010_v7 = vrot.slane %v1008_v44, 1  ;;  %v999_v46 = vshrl.u32 %v3100_v3, 16  ;;  %v1022_v60 = vshll.u32 %v3103_v32, 16 }
  0xfa   : > { %5071 = vst [vmem:[#allocation40_spill] sm:$0xff] %v4295_v9  ;;  %5072 = vst [vmem:[#allocation41_spill] sm:$0xff] %v4297_v58  ;;  %v997_v43 = vor.u32 %v996_v13, %v992_v51  ;;  %v2915_v13 = vld [vmem:[%s3671_s19 + $0xb8] sm:$0xe]  ;;  %v4496_v9 = vld [vmem:[%s3671_s19 + $0x3c] sm:$0x1] }
  0xfb   : > { %940 = vrot.lane.b32.xlu1 %v915_v39, %s3617_s26  ;;  %938 = vrot.lane.b32.xlu0 %v908_v11, %s3617_s26  ;;  %v1001_v39 = vshll.u32 %v3100_v3, 16  ;;  %v978_v11 = vshrl.u32 %v3097_v33, 16  ;;  %v1011_v2 = vor.u32 %v1010_v7, %v1006_v63  ;;  %v985_v3 = vshrl.u32 %v3098_v18, 16  ;;  %v2913_v63 = vld [vmem:[%s3671_s19 + $0xa8] sm:$0xe] }
  0xfd   : > { %v4304_v0 = vpop.permute.xlu1 %2137  ;;  %v4306_v28 = vpop.permute.xlu0 %2131  ;;  %v1003_v56 = vrot.slane %v1001_v39, 1  ;;  %v983_v33 = vor.u32 %v982_v19, %v978_v11  ;;  %v1020_v39 = vshrl.u32 %v3103_v32, 16  ;;  %v1024_v11 = vrot.slane %v1022_v60, 1 }
  0xfe   : > { %5073 = vst [vmem:[#allocation42_spill] sm:$0xff] %v4304_v0  ;;  %5074 = vst [vmem:[#allocation43_spill] sm:$0xff] %v4306_v28 }
  0xff   : > { %936 = vrot.lane.b32.xlu1 %v901_v54, %s3617_s26  ;;  %934 = vrot.lane.b32.xlu0 %v894_v35, %s3617_s26  ;;  %v987_v54 = vshll.u32 %v3098_v18, 16  ;;  %v1004_v45 = vor.u32 %v1003_v56, %v999_v46  ;;  %v2912_v18 = vld [vmem:[%s3671_s19 + $0xa0] sm:$0xe]  ;;  %v1025_v56 = vor.u32 %v1024_v11, %v1020_v39  ;;  %v3107_v11 = vcombine.low %v2915_v13, %v4236_v17 }
 0x101   : > { %v4314_v29 = vpop.permute.xlu1 %2133  ;;  %v4316_v16 = vpop.permute.xlu0 %2139  ;;  %v989_v15 = vrot.slane %v987_v54, 1 }
 0x102   : > { %5075 = vst [vmem:[#allocation44_spill] sm:$0xff] %v4314_v29  ;;  %5076 = vst [vmem:[#allocation45_spill] sm:$0xff] %v4316_v16 }
 0x103   : > { %944 = vrot.lane.b32.xlu1 %v929_v22, %s3617_s26  ;;  %942 = vrot.lane.b32.xlu0 %v922_v14, %s3617_s26  ;;  %v1015_v22 = vshll.u32 %v3102_v24, 16  ;;  %v990_v19 = vor.u32 %v989_v15, %v985_v3  ;;  %v2917_v24 = vld [vmem:[%s3671_s19 + $0xc8] sm:$0xe] }
 0x104   : > { %v3109_v60 = vcombine.low %v2917_v24, %v4212_v36  ;;  %v2918_v36 = vld [vmem:[%s3671_s19 + $0xd0] sm:$0xe]  ;;  %v2920_v24 = vld [vmem:[%s3671_s19 + $0x8] sm:$0xf] }
 0x105   : > { %v4320_v35 = vpop.permute.xlu1 %2141  ;;  %v4322_v25 = vpop.permute.xlu0 %2135  ;;  %v1017_v1 = vrot.slane %v1015_v22, 1 }
 0x106   : > { %5077 = vst [vmem:[#allocation46_spill] sm:$0xff] %v4320_v35  ;;  %5078 = vst [vmem:[#allocation47_spill] sm:$0xff] %v4322_v25  ;;  %v1071_v22 = vrot.slane %v3109_v60, 1  ;;  %v2924_v60 = vld [vmem:[%s3671_s19 + $0x28] sm:$0xf] }
 0x107   : > { %1028 = vrot.lane.b32.xlu1 %v983_v33, %s3618_s27  ;;  %1026 = vrot.lane.b32.xlu0 %v976_v5, %s3618_s27  ;;  %v1018_v32 = vor.u32 %v1017_v1, %v1013_v12  ;;  %v3105_v33 = vcombine.low %v2913_v63, %v4188_v57  ;;  %v3104_v5 = vcombine.low %v2912_v18, %v4197_v26  ;;  %v2914_v26 = vld [vmem:[%s3671_s19 + $0xb0] sm:$0xe]  ;;  %v1069_v1 = vrot.slane %v3107_v11, 1  ;;  %v2922_v11 = vld [vmem:[%s3671_s19 + $0x18] sm:$0xf] }
 0x108   : > { %v3108_v57 = vcombine.low %v2916_v42, %v4215_v48  ;;  %v4452_v25 = vld [vmem:[%s3671_s19 + $0x68] sm:$0xf] }
 0x109   : > { %v4326_v14 = vpop.permute.xlu1 %2225  ;;  %v4328_v44 = vpop.permute.xlu0 %2143  ;;  %v1066_v51 = vrot.slane %v3104_v5, 1  ;;  %v2921_v5 = vld [vmem:[%s3671_s19 + $0x10] sm:$0xf] }
 0x10a   : > { %5079 = vst [vmem:[#allocation48_spill] sm:$0xff] %v4326_v14  ;;  %5080 = vst [vmem:[#allocation49_spill] sm:$0xff] %v4328_v44  ;;  %v1070_v39 = vrot.slane %v3108_v57, 1  ;;  %v4428_v44 = vld [vmem:[%s3671_s19 + $0x78] sm:$0xf] }
 0x10b   : > { %1036 = vrot.lane.b32.xlu1 %v1011_v2, %s3618_s27  ;;  %1034 = vrot.lane.b32.xlu0 %v1004_v45, %s3618_s27  ;;  %v1067_v45 = vrot.slane %v3105_v33, 1 }
 0x10d   : > { %v4334_v7 = vpop.permute.xlu1 %2233  ;;  %v4336_v46 = vpop.permute.xlu0 %2227 }
 0x10e   : > { %5081 = vst [vmem:[#allocation50_spill] sm:$0xff] %v4334_v7  ;;  %5082 = vst [vmem:[#allocation51_spill] sm:$0xff] %v4336_v46  ;;  %v4476_v7 = vld [vmem:[%s3671_s19 + $0x88] sm:$0xf]  ;;  %v4489_v46 = vld [vmem:[%s3671_s19 + $0x44] sm:$0x1] }
 0x10f   : > { %1032 = vrot.lane.b32.xlu1 %v997_v43, %s3618_s27  ;;  %1030 = vrot.lane.b32.xlu0 %v990_v19, %s3618_s27  ;;  %v3106_v43 = vcombine.low %v2914_v26, %v4245_v47  ;;  %v2919_v19 = vld [vmem:[%s3671_s19 + $0xd8] sm:$0xe]  ;;  %v3126_v28 = vcombine.low %v4476_v7, %v4476_v7 }
 0x110   : > { %v3111_v18 = vcombine.low %v2919_v19, %v4254_v6  ;;  %v3113_v6 = vcombine.low %v2921_v5, %v2921_v5 }
 0x111   : > { %v4344_v54 = vpop.permute.xlu1 %2229  ;;  %v4346_v2 = vpop.permute.xlu0 %2235  ;;  %v1068_v63 = vrot.slane %v3106_v43, 1 }
 0x112   : > { %5083 = vst [vmem:[#allocation52_spill] sm:$0xff] %v4344_v54  ;;  %5084 = vst [vmem:[#allocation53_spill] sm:$0xff] %v4346_v2  ;;  %v4449_v54 = vld [vmem:[%s3671_s19 + $0x70] sm:$0xf] }
 0x113   : > { %1040 = vrot.lane.b32.xlu1 %v1025_v56, %s3618_s27  ;;  %1038 = vrot.lane.b32.xlu0 %v1018_v32, %s3618_s27  ;;  %v3110_v56 = vcombine.low %v2918_v36, %v4262_v41  ;;  %v1073_v32 = vrot.slane %v3111_v18, 1  ;;  %v3112_v41 = vcombine.low %v2920_v24, %v2920_v24  ;;  %v4394_v18 = vld [vmem:[%s3671_s19 + $0x38] sm:$0xf]  ;;  %v4473_v2 = vld [vmem:[%s3671_s19 + $0x90] sm:$0xf] }
 0x114   : > { %v3127_v14 = vcombine.low %v4473_v2, %v4473_v2 }
 0x115   : > { %v4354_v3 = vpop.permute.xlu1 %2237  ;;  %v4356_v15 = vpop.permute.xlu0 %2231  ;;  %v1072_v33 = vrot.slane %v3110_v56, 1 }
 0x116   : > { %5085 = vst [vmem:[#allocation54_spill] sm:$0xff] %v4354_v3  ;;  %5086 = vst [vmem:[#allocation55_spill] sm:$0xff] %v4356_v15  ;;  %v4425_v3 = vld [vmem:[%s3671_s19 + $0x80] sm:$0xf] }
 0x117   : > { %1076 = vrot.lane.b32.xlu1 %v1067_v45, %s3619_s28  ;;  %1074 = vrot.lane.b32.xlu0 %v1066_v51, %s3619_s28  ;;  %v2925_v51 = vld [vmem:[%s3671_s19 + $0x30] sm:$0xf]  ;;  %v3125_v15 = vcombine.low %v4425_v3, %v4425_v3 }
 0x118   : > { %v3117_v26 = vcombine.low %v2925_v51, %v2925_v51 }
 0x119   : > { %v4362_v48 = vpop.permute.xlu1 %2273  ;;  %v4364_v12 = vpop.permute.xlu0 %2239 }
 0x11a   : > { %5087 = vst [vmem:[#allocation56_spill] sm:$0xff] %v4362_v48  ;;  %5088 = vst [vmem:[#allocation57_spill] sm:$0xff] %v4364_v12 }
 0x11b   : > { %1084 = vrot.lane.b32.xlu1 %v1071_v22, %s3619_s28  ;;  %1082 = vrot.lane.b32.xlu0 %v1070_v39, %s3619_s28  ;;  %v3116_v22 = vcombine.low %v2924_v60, %v2924_v60  ;;  %v2923_v39 = vld [vmem:[%s3671_s19 + $0x20] sm:$0xf] }
 0x11c   : > { %v3115_v36 = vcombine.low %v2923_v39, %v2923_v39 }
 0x11d   : > { %v4368_v17 = vpop.permute.xlu1 %2281  ;;  %v4370_v47 = vpop.permute.xlu0 %2275 }
 0x11e   : > { %5089 = vst [vmem:[#allocation58_spill] sm:$0xff] %v4368_v17  ;;  %5090 = vst [vmem:[#allocation59_spill] sm:$0xff] %v4370_v47  ;;  %v3123_v17 = vcombine.low %v4449_v54, %v4449_v54 }
 0x11f   : > { %1080 = vrot.lane.b32.xlu1 %v1069_v1, %s3619_s28  ;;  %1078 = vrot.lane.b32.xlu0 %v1068_v63, %s3619_s28  ;;  %v3114_v1 = vcombine.low %v2922_v11, %v2922_v11  ;;  %v4391_v63 = vld [vmem:[%s3671_s19 + $0x40] sm:$0xf] }
 0x120   : > { %v4502_v52 = vcombine.low %v4391_v63, %v4489_v46 }
 0x121   : > { %v4374_v42 = vpop.permute.xlu1 %2277  ;;  %v4376_v45 = vpop.permute.xlu0 %2283 }
 0x122   : > { %5091 = vst [vmem:[#allocation60_spill] sm:$0xff] %v4374_v42  ;;  %5092 = vst [vmem:[#allocation61_spill] sm:$0xff] %v4376_v45  ;;  %v4440_v42 = vld [vmem:[%s3671_s19 + $0x2c] sm:$0x1]  ;;  %v4464_v45 = vld [vmem:[%s3671_s19 + $0x1c] sm:$0x1] }
 0x123   : > { %1088 = vrot.lane.b32.xlu1 %v1073_v32, %s3619_s28  ;;  %1086 = vrot.lane.b32.xlu0 %v1072_v33, %s3619_s28  ;;  %v3119_v33 = vcombine.low %v4391_v63, %v4391_v63  ;;  %v4486_v48 = vcombine.low %v2922_v11, %v4464_v45 }
 0x125   : > { %v4380_v57 = vpop.permute.xlu1 %2285  ;;  %v4382_v13 = vpop.permute.xlu0 %2279 }
 0x126   : > { %5093 = vst [vmem:[#allocation62_spill] sm:$0xff] %v4380_v57  ;;  %5094 = vst [vmem:[#allocation63_spill] sm:$0xff] %v4382_v13  ;;  %v4415_v57 = vld [vmem:[%s3671_s19 + $0x14] sm:$0x1] }
 0x127   : > { %1116 = vrot.lane.b32.xlu1 %v3113_v6, %s3620_s29  ;;  %1114 = vrot.lane.b32.xlu0 %v3112_v41, %s3620_s29  ;;  %v3118_v6 = vcombine.low %v4394_v18, %v4394_v18  ;;  %v4405_v41 = vld [vmem:[%s3671_s19 + $0x60] sm:$0xf] }
 0x129   : > { %v4386_v43 = vpop.permute.xlu1 %708  ;;  %v4388_v19 = vpop.permute.xlu0 %2287 }
 0x12a   : > { %5095 = vst [vmem:[#allocation64_spill] sm:$0xff] %v4388_v19 }
 0x12b   : > { %1124 = vrot.lane.b32.xlu1 %v3117_v26, %s3620_s29  ;;  %1122 = vrot.lane.b32.xlu0 %v3116_v22, %s3620_s29  ;;  %v4408_v26 = vld [vmem:[%s3671_s19 + $0x58] sm:$0xf] }
 0x12c   : > { %v3120_v12 = vcombine.low %v4408_v26, %v4408_v26 }
 0x12d   : > { %v4396_v56 = vpop.permute.xlu1 %716  ;;  %v4398_v32 = vpop.permute.xlu0 %714 }
 0x12f   : > { %1120 = vrot.lane.b32.xlu1 %v3115_v36, %s3620_s29  ;;  %1118 = vrot.lane.b32.xlu0 %v3114_v1, %s3620_s29  ;;  %v4418_v36 = vld [vmem:[%s3671_s19 + $0xc] sm:$0x1]  ;;  %v3121_v1 = vcombine.low %v4405_v41, %v4405_v41 }
 0x130   : > { %v3128_v13 = vcombine.low %v2920_v24, %v4418_v36 }
 0x131   : > { %v4410_v22 = vpop.permute.xlu1 %712  ;;  %v4412_v19 = vpop.permute.xlu0 %710 }
 0x132   : > { %v1197_v16 = vshll.u32 %v3128_v13, 16  ;;  %v1195_v30 = vshrl.u32 %v3128_v13, 16 }
 0x133   : > { %1128 = vrot.lane.b32.xlu1 %v3119_v33, %s3620_s29  ;;  %1126 = vrot.lane.b32.xlu0 %v3118_v6, %s3620_s29  ;;  %v3129_v33 = vcombine.low %v2921_v5, %v4415_v57  ;;  %v4436_v6 = vld [vmem:[%s3671_s19 + $0x34] sm:$0x1]  ;;  %v3124_v5 = vcombine.low %v4428_v44, %v4428_v44  ;;  %s3250_s29 = sshll.u32 %s5164_s12, 5 }
 0x134   : > { %v3133_v24 = vcombine.low %v2925_v51, %v4436_v6  ;;  %v3122_v51 = vcombine.low %v4452_v25, %v4452_v25  ;;  %v1199_v11 = vrot.slane %v1197_v16, 1 }
 0x135   : > { %v4430_v35 = vpop.permute.xlu1 %720  ;;  %v4432_v58 = vpop.permute.xlu0 %718  ;;  %v1202_v40 = vshrl.u32 %v3129_v33, 16 }
 0x136   : > { %v1230_v8 = vshrl.u32 %v3133_v24, 16 }
 0x137   : > { %1156 = vrot.lane.b32.xlu1 %v3121_v1, %s3621_s30  ;;  %1154 = vrot.lane.b32.xlu0 %v3120_v12, %s3621_s30  ;;  %v3132_v1 = vcombine.low %v2924_v60, %v4440_v42  ;;  %v4461_v12 = vld [vmem:[%s3671_s19 + $0x24] sm:$0x1]  ;;  %v1204_v60 = vshll.u32 %v3129_v33, 16  ;;  %v1200_v33 = vor.u32 %v1199_v11, %v1195_v30  ;;  %v1506_v30 = vsel %vm1492_vm2, %v4041_v59, %v4432_v58 }
 0x138   : > { %v4479_v0 = vcombine.low %v2923_v39, %v4461_v12 }
 0x139   : > { %v4455_v29 = vpop.permute.xlu1 %756  ;;  %v4457_v21 = vpop.permute.xlu0 %754  ;;  %v1225_v39 = vshll.u32 %v3132_v1, 16  ;;  %v1206_v49 = vrot.slane %v1204_v60, 1  ;;  %v1223_v16 = vshrl.u32 %v3132_v1, 16  ;;  %v4519_v60 = vcombine.low %v4405_v41, %v2945_v10 }
 0x13a   : > { %v1216_v59 = vshrl.u32 %v4479_v0, 16 }
 0x13b   : > { %1164 = vrot.lane.b32.xlu1 %v3125_v15, %s3621_s30  ;;  %1162 = vrot.lane.b32.xlu0 %v3124_v5, %s3621_s30  ;;  %v1232_v5 = vshll.u32 %v3133_v24, 16  ;;  %v1227_v13 = vrot.slane %v1225_v39, 1  ;;  %v1207_v63 = vor.u32 %v1206_v49, %v1202_v40  ;;  %v1211_v24 = vshll.u32 %v4486_v48, 16  ;;  %v2949_v49 = vld [vmem:[%s3671_s19 + $0x84] sm:$0x1] }
 0x13c   : > { %v2948_v40 = vld [vmem:[%s3671_s19 + $0x7c] sm:$0x1]  ;;  %v1246_v39 = vshll.u32 %v4502_v52, 16  ;;  %v4551_v11 = vcombine.low %v4425_v3, %v2949_v49 }
 0x13d   : > { %v4481_v47 = vpop.permute.xlu1 %764  ;;  %v4483_v15 = vpop.permute.xlu0 %762  ;;  %v1234_v50 = vrot.slane %v1232_v5, 1  ;;  %v1228_v41 = vor.u32 %v1227_v13, %v1223_v16  ;;  %v1213_v58 = vrot.slane %v1211_v24, 1  ;;  %v4554_v16 = vcombine.low %v4428_v44, %v2948_v40  ;;  %v2947_v13 = vld [vmem:[%s3671_s19 + $0x74] sm:$0x1] }
 0x13e   : > { %v1328_v49 = vshll.u32 %v4551_v11, 16 }
 0x13f   : > { %1160 = vrot.lane.b32.xlu1 %v3123_v17, %s3621_s30  ;;  %1158 = vrot.lane.b32.xlu0 %v3122_v51, %s3621_s30  ;;  %v4512_v17 = vcombine.low %v4394_v18, %v4496_v9  ;;  %v1218_v51 = vshll.u32 %v4479_v0, 16  ;;  %v4522_v18 = vcombine.low %v4408_v26, %v2944_v27  ;;  %v1235_v5 = vor.u32 %v1234_v50, %v1230_v8 }
 0x140   : > { %v1209_v8 = vshrl.u32 %v4486_v48, 16  ;;  %v1496_v26 = vsel %vm1492_vm2, %v3991_v31, %v4386_v43 }
 0x141   : > { %v4506_v4 = vpop.permute.xlu1 %760  ;;  %v4508_v34 = vpop.permute.xlu0 %758  ;;  %v1220_v50 = vrot.slane %v1218_v51, 1  ;;  %v1513_v0 = vsel %vm1509_vm3, %v1496_v26, %v4455_v29  ;;  %v2946_v51 = vld [vmem:[%s3671_s19 + $0x6c] sm:$0x1]  ;;  %v1237_v44 = vshrl.u32 %v4512_v17, 16  ;;  %v1293_v24 = vshll.u32 %v4522_v18, 16 }
 0x142   : > { %v1214_v29 = vor.u32 %v1213_v58, %v1209_v8  ;;  %v1498_v8 = vsel %vm1492_vm2, %v4008_v62, %v4412_v19  ;;  %v1326_v58 = vshrl.u32 %v4551_v11, 16 }
 0x143   : > { %1168 = vrot.lane.b32.xlu1 %v3127_v14, %s3621_s30  ;;  %1166 = vrot.lane.b32.xlu0 %v3126_v28, %s3621_s30  ;;  %v1508_v14 = vsel %vm1492_vm2, %v4038_v55, %v4430_v35  ;;  %v1239_v55 = vshll.u32 %v4512_v17, 16  ;;  %v1494_v35 = vsel %vm1492_vm2, %v3994_v38, %v4053_v53  ;;  %v1244_v38 = vshrl.u32 %v4502_v52, 16 }
 0x144   : > { %v1511_v48 = vsel %vm1509_vm3, %v1494_v35, %v4457_v21  ;;  %v1248_v53 = vrot.slane %v1246_v39, 1  ;;  %v1221_v21 = vor.u32 %v1220_v50, %v1216_v59  ;;  %v1300_v52 = vshll.u32 %v4519_v60, 16 }
 0x145   : > { %v769_v28 = vpop.permute.xlu1 %768  ;;  %v767_v1 = vpop.permute.xlu0 %766  ;;  %v1241_v43 = vrot.slane %v1239_v55, 1  ;;  %v1502_v17 = vsel %vm1492_vm2, %v4023_v23, %v4398_v32  ;;  %v2950_v55 = vld [vmem:[%s3671_s19 + $0x8c] sm:$0x1]  ;;  %v1295_v59 = vrot.slane %v1293_v24, 1  ;;  %v1500_v50 = vsel %vm1492_vm2, %v4005_v61, %v4410_v22 }
 0x146   : > { %v4534_v10 = vsel %vm1509_vm3, %v1508_v14, %v769_v28  ;;  %v4537_v27 = vsel %vm1509_vm3, %v1506_v30, %v767_v1  ;;  %v1504_v14 = vsel %vm1492_vm2, %v4020_v20, %v4396_v56  ;;  %v4581_v30 = vcombine.low %v4449_v54, %v2947_v13  ;;  %v2951_v56 = vld [vmem:[%s3671_s19 + $0x94] sm:$0x1] }
 0x147   : > { %1252 = vrot.lane.b32.xlu1 %v1207_v63, %s3622_s4  ;;  %1250 = vrot.lane.b32.xlu0 %v1200_v33, %s3622_s4  ;;  %v1521_v40 = vsel %vm1509_vm3, %v1504_v14, %v4481_v47  ;;  %v1519_v28 = vsel %vm1509_vm3, %v1502_v17, %v4483_v15  ;;  %v3138_v1 = vcombine.low %v4452_v25, %v2946_v51  ;;  %v1321_v20 = vshll.u32 %v4554_v16, 16 }
 0x148   : > { %v1249_v32 = vor.u32 %v1248_v53, %v1244_v38  ;;  %v1298_v25 = vshrl.u32 %v4519_v60, 16  ;;  %v1302_v47 = vrot.slane %v1300_v52, 1  ;;  %v1291_v15 = vshrl.u32 %v4522_v18, 16 }
 0x149   : > { %v797_v63 = vpop.permute.xlu1 %796  ;;  %v795_v33 = vpop.permute.xlu0 %794  ;;  %v1330_v35 = vrot.slane %v1328_v49, 1  ;;  %v1517_v26 = vsel %vm1509_vm3, %v1500_v50, %v4506_v4  ;;  %v1515_v60 = vsel %vm1509_vm3, %v1498_v8, %v4508_v34  ;;  %v1323_v13 = vrot.slane %v1321_v20, 1 }
 0x14a   : > { %v4564_v31 = vsel %vm1526_vm4, %v1513_v0, %v797_v63  ;;  %v4567_v3 = vsel %vm1526_vm4, %v1511_v48, %v795_v33  ;;  %v1319_v48 = vshrl.u32 %v4554_v16, 16  ;;  %v3143_v61 = vcombine.low %v4473_v2, %v2951_v56 }
 0x14b   : > { %1260 = vrot.lane.b32.xlu1 %v1235_v5, %s3622_s4  ;;  %1258 = vrot.lane.b32.xlu0 %v1228_v41, %s3622_s4  ;;  %v1242_v41 = vor.u32 %v1241_v43, %v1237_v44  ;;  %v3142_v22 = vcombine.low %v4476_v7, %v2950_v55  ;;  %v1303_v4 = vor.u32 %v1302_v47, %v1298_v25  ;;  %v1314_v34 = vshll.u32 %v4581_v30, 16  ;;  %v2957_v47 = vld [vmem:[%s3671_s19 + $0x30] sm:$0xe] }
 0x14c   : > { %v1296_v11 = vor.u32 %v1295_v59, %v1291_v15  ;;  %v1307_v63 = vshll.u32 %v3138_v1, 16  ;;  %v1331_v38 = vor.u32 %v1330_v35, %v1326_v58  ;;  %v1324_v53 = vor.u32 %v1323_v13, %v1319_v48  ;;  %v2956_v15 = vld [vmem:[%s3671_s19 + $0x28] sm:$0xe]  ;;  %v3556_v13 = vld [vmem:[%s5030_s1] sm:$0xff]  }
 0x14d   : > { %v805_v5 = vpop.permute.xlu1 %804  ;;  %v803_v39 = vpop.permute.xlu0 %802  ;;  %v1312_v51 = vshrl.u32 %v4581_v30, 16  ;;  %v1342_v44 = vshll.u32 %v3143_v61, 16  ;;  %v1316_v43 = vrot.slane %v1314_v34, 1  ;;  %v1335_v52 = vshll.u32 %v3142_v22, 16  ;;  %3293 = vmatprep.subr.bf16.mxu0 %v3556_v13  ;;  %3315 = vmatprep.subr.bf16.mxu1 %v3556_v13 }
 0x14e   : > { %v4592_v23 = vsel %vm1526_vm4, %v1521_v40, %v805_v5  ;;  %v4595_v54 = vsel %vm1526_vm4, %v1519_v28, %v803_v39  ;;  %v1340_v17 = vshrl.u32 %v3143_v61, 16  ;;  %v1333_v28 = vshrl.u32 %v3142_v22, 16  ;;  %v2953_v5 = vld [vmem:[%s3671_s19 + $0x10] sm:$0xe]  ;;  %v2952_v39 = vld [vmem:[%s3671_s19 + $0x8] sm:$0xe]  ;;  %3294 = vmatpush3.bf16.msra.mxu0 %v3556_v13  ;;  %3322 = vmatpush3.bf16.msra.mxu1 %v3556_v13 }
 0x14f   : > { %1256 = vrot.lane.b32.xlu1 %v1221_v21, %s3622_s4  ;;  %1254 = vrot.lane.b32.xlu0 %v1214_v29, %s3622_s4  ;;  %v1305_v21 = vshrl.u32 %v3138_v1, 16  ;;  %v1309_v29 = vrot.slane %v1307_v63, 1  ;;  %v1344_v30 = vrot.slane %v1342_v44, 1  ;;  %v1317_v49 = vor.u32 %v1316_v43, %v1312_v51  ;;  %v3558_v44 = vld [vmem:[%s5030_s1 + $0x10] sm:$0xff]   ;;  %v3582_v13 = vld [vmem:[%s3671_s19 + $0x128] sm:$0xf] }
 0x150   : > { %v1337_v1 = vrot.slane %v1335_v52, 1  ;;  %v3145_v55 = vcombine.low %v2953_v5, %v4415_v57  ;;  %v3144_v25 = vcombine.low %v2952_v39, %v4418_v36  ;;  %v3149_v35 = vcombine.low %v2957_v47, %v4436_v6  ;;  %v2955_v36 = vld [vmem:[%s3671_s19 + $0x20] sm:$0xe]  ;;  %v3573_v5 = vld [vmem:[%s3671_s19 + $0xd0] sm:$0xf]  ;;  %v3561_v47 = vld [vmem:[%s5030_s1 + $0x28] sm:$0xff]  }
 0x151   : > { %v801_v0 = vpop.permute.xlu1 %800  ;;  %v799_v18 = vpop.permute.xlu0 %798  ;;  %v1310_v40 = vor.u32 %v1309_v29, %v1305_v21  ;;  %v3148_v57 = vcombine.low %v2956_v15, %v4440_v42  ;;  %v3147_v61 = vcombine.low %v2955_v36, %v4461_v12  ;;  %v3557_v12 = vld [vmem:[%s5030_s1 + $0x8] sm:$0xff]   ;;  %v3157_v39 = vcombine.low %v3573_v5, %v3573_v5  ;;  %v3576_v15 = vld [vmem:[%s3671_s19 + $0x118] sm:$0xf] }
 0x152   : > { %v1534_v62 = vsel %vm1526_vm4, %v1517_v26, %v801_v0  ;;  %v1532_v19 = vsel %vm1526_vm4, %v1515_v60, %v799_v18  ;;  %v1387_v8 = vrot.slane %v3145_v55, 1  ;;  %v1386_v58 = vrot.slane %v3144_v25, 1  ;;  %v2954_v26 = vld [vmem:[%s3671_s19 + $0x18] sm:$0xe]  ;;  %3295 = vmatprep.subr.bf16.mxu0 %v3557_v12  ;;  %3316 = vmatprep.subr.bf16.mxu1 %v3557_v12  ;;  %v3580_v36 = vld [vmem:[%s3671_s19 + $0x108] sm:$0xf] }
 0x153   : > { %1264 = vrot.lane.b32.xlu1 %v1249_v32, %s3622_s4  ;;  %1262 = vrot.lane.b32.xlu0 %v1242_v41, %s3622_s4  ;;  %v1345_v32 = vor.u32 %v1344_v30, %v1340_v17  ;;  %v1338_v41 = vor.u32 %v1337_v1, %v1333_v28  ;;  %v1391_v42 = vrot.slane %v3149_v35, 1  ;;  %v1390_v6 = vrot.slane %v3148_v57, 1  ;;  %v3560_v1 = vld [vmem:[%s5030_s1 + $0x20] sm:$0xff]   ;;  %v5097_v35 = vld [vmem:[#allocation3_spill] sm:$0xff] }
 0x154   : > { %v3146_v22 = vcombine.low %v2954_v26, %v4464_v45  ;;  %v1389_v45 = vrot.slane %v3147_v61, 1  ;;  %3296 = vmatpush3.bf16.msra.mxu0 %v3557_v12  ;;  %3323 = vmatpush3.bf16.msra.mxu1 %v3557_v12  ;;  %v5098_v26 = vld [vmem:[#allocation4_spill] sm:$0xff]  ;;  %v5103_v12 = vld [vmem:[#allocation9_spill] sm:$0xff] }
 0x155   : > { %v809_v33 = vpop.permute.xlu1 %808  ;;  %v807_v16 = vpop.permute.xlu0 %806  ;;  %3297 = vmatprep.subr.bf16.mxu0 %v3558_v44  ;;  %3317 = vmatprep.subr.bf16.mxu1 %v3558_v44  ;;  %v3583_v61 = vld [vmem:[%s3671_s19 + $0x110] sm:$0xf] }
 0x156   : > { %v1542_v7 = vsel %vm1526_vm4, %v4534_v10, %v809_v33  ;;  %v1540_v2 = vsel %vm1526_vm4, %v4537_v27, %v807_v16  ;;  %v1388_v33 = vrot.slane %v3146_v22, 1  ;;  %v5101_v22 = vld [vmem:[#allocation7_spill] sm:$0xff] }
 0x157   : > { %1348 = vrot.lane.b32.xlu1 %v1303_v4, %s3623_s5  ;;  %1346 = vrot.lane.b32.xlu0 %v1296_v11, %s3623_s5 }
 0x158   : > { %3298 = vmatpush3.bf16.msra.mxu0 %v3558_v44  ;;  %3324 = vmatpush3.bf16.msra.mxu1 %v3558_v44  ;;  %v3585_v44 = vld [vmem:[%s3671_s19 + $0xe0] sm:$0xf] }
 0x159   : > { %v837_v24 = vpop.permute.xlu1 %836  ;;  %v835_v10 = vpop.permute.xlu0 %834 }
 0x15a   : > { %v1547_v27 = vsel %vm1543_vm5, %v4564_v31, %v837_v24  ;;  %v1545_v14 = vsel %vm1543_vm5, %v4567_v3, %v835_v10  ;;  %v3559_v24 = vld [vmem:[%s5030_s1 + $0x18] sm:$0xff]   ;;  %v3571_v10 = vld [vmem:[%s3671_s19 + $0xb0] sm:$0xf] }
 0x15b   : > { %1356 = vrot.lane.b32.xlu1 %v1331_v38, %s3623_s5  ;;  %1354 = vrot.lane.b32.xlu0 %v1324_v53, %s3623_s5 }
 0x15c   : > { %3299 = vmatprep.subr.bf16.mxu0 %v3559_v24  ;;  %3318 = vmatprep.subr.bf16.mxu1 %v3559_v24 }
 0x15d   : > { %v845_v20 = vpop.permute.xlu1 %844  ;;  %v843_v56 = vpop.permute.xlu0 %842  ;;  %3300 = vmatpush3.bf16.msra.mxu0 %v3559_v24  ;;  %3325 = vmatpush3.bf16.msra.mxu1 %v3559_v24 }
 0x15e   : > { %v1555_v31 = vsel %vm1543_vm5, %v4592_v23, %v845_v20  ;;  %v1553_v3 = vsel %vm1543_vm5, %v4595_v54, %v843_v56  ;;  %v3574_v20 = vld [vmem:[%s3671_s19 + $0xc8] sm:$0xf]  ;;  %3301 = vmatprep.subr.bf16.mxu0 %v3560_v1  ;;  %3319 = vmatprep.subr.bf16.mxu1 %v3560_v1 }
 0x15f   : > { %1352 = vrot.lane.b32.xlu1 %v1317_v49, %s3623_s5  ;;  %1350 = vrot.lane.b32.xlu0 %v1310_v40, %s3623_s5  ;;  %v3156_v56 = vcombine.low %v3574_v20, %v3574_v20 }
 0x161   : > { %v841_v59 = vpop.permute.xlu1 %840  ;;  %v839_v50 = vpop.permute.xlu0 %838  ;;  %3302 = vmatpush3.bf16.msra.mxu0 %v3560_v1  ;;  %3326 = vmatpush3.bf16.msra.mxu1 %v3560_v1  ;;  %v5110_v1 = vld [vmem:[#allocation24_spill] sm:$0xff] }
 0x162   : > { %v1551_v23 = vsel %vm1543_vm5, %v1534_v62, %v841_v59  ;;  %v1549_v54 = vsel %vm1543_vm5, %v1532_v19, %v839_v50  ;;  %v2959_v62 = vld [vmem:[%s3671_s19 + $0x40] sm:$0xe]  ;;  %v2958_v19 = vld [vmem:[%s3671_s19 + $0x38] sm:$0xe]  ;;  %3303 = vmatprep.subr.bf16.mxu0 %v3561_v47  ;;  %3320 = vmatprep.subr.bf16.mxu1 %v3561_v47 }
 0x163   : > { %1360 = vrot.lane.b32.xlu1 %v1345_v32, %s3623_s5  ;;  %1358 = vrot.lane.b32.xlu0 %v1338_v41, %s3623_s5  ;;  %v3151_v16 = vcombine.low %v2959_v62, %v4489_v46  ;;  %v3150_v38 = vcombine.low %v2958_v19, %v4496_v9  ;;  %v3575_v32 = vld [vmem:[%s3671_s19 + $0xf8] sm:$0xf]  ;;  %v5096_v59 = vld [vmem:[#allocation2_spill] sm:$0xff]  ;;  %v2300_v62 = vsel %vm1450_vm0, %v3583_v61, %v5101_v22  ;;  %v5102_v19 = vld [vmem:[#allocation8_spill] sm:$0xff]  ;;  %s238_s5 = scalar_lea.vmem %s5032_s3, %s3250_s29 }
 0x164   : > { %v2291_v41 = vsel %vm1450_vm0, %v3575_v32, %v4051_v37  ;;  %v2303_v50 = vsel %vm1450_vm0, %v3576_v15, %v5096_v59  ;;  %v3577_v37 = vld [vmem:[%s3671_s19 + $0xc0] sm:$0xf]  ;;  %v5113_v59 = vld [vmem:[#allocation32_spill] sm:$0xff] }
 0x165   : > { %v849_v60 = vpop.permute.xlu1 %848  ;;  %v847_v0 = vpop.permute.xlu0 %846  ;;  %v1393_v9 = vrot.slane %v3151_v16, 1  ;;  %v1392_v46 = vrot.slane %v3150_v38, 1  ;;  %3304 = vmatpush3.bf16.msra.mxu0 %v3561_v47  ;;  %3327 = vmatpush3.bf16.msra.mxu1 %v3561_v47  ;;  %v3562_v38 = vld [vmem:[%s5030_s1 + $0x30] ss:$0 sps:$4 sm:$0x33]   ;;  %v5112_v47 = vld [vmem:[#allocation14_spill] sm:$0xff] }
 0x166   : > { %v4655_v18 = vsel %vm1543_vm5, %v1542_v7, %v849_v60  ;;  %v4658_v48 = vsel %vm1543_vm5, %v1540_v2, %v847_v0  ;;  %v2297_v60 = vsel %vm1450_vm0, %v3580_v36, %v5098_v26  ;;  %v3581_v0 = vld [vmem:[%s3671_s19 + $0x120] sm:$0xf]  ;;  %3329 = vmatprep.subr.msk.bf16.mxu0 %vm2558_vm8, %v3562_v38  ;;  %3330 = vmatprep.subr.msk.bf16.mxu1 %vm2558_vm8, %v3562_v38 }
 0x167   : > { %1396 = vrot.lane.b32.xlu1 %v1387_v8, %s3624_s8  ;;  %1394 = vrot.lane.b32.xlu0 %v1386_v58, %s3624_s8  ;;  %v3579_v58 = vld [vmem:[%s3671_s19 + $0x100] sm:$0xf] }
 0x168   : > { %v2294_v57 = vsel %vm1450_vm0, %v3579_v58, %v5097_v35  ;;  %v5117_v58 = vld [vmem:[#allocation40_spill] sm:$0xff]  ;;  %v5119_v26 = vld [vmem:[#allocation26_spill] sm:$0xff] }
 0x169   : > { %v933_v4 = vpop.permute.xlu1 %932  ;;  %v931_v11 = vpop.permute.xlu0 %930 }
 0x16a   : > { %v4670_v34 = vsel %vm1560_vm6, %v1547_v27, %v933_v4  ;;  %v4673_v63 = vsel %vm1560_vm6, %v1545_v14, %v931_v11  ;;  %v3153_v27 = vcombine.low %v3571_v10, %v3571_v10  ;;  %v3572_v14 = vld [vmem:[%s3671_s19 + $0xa8] sm:$0xf]  ;;  %v2314_v4 = vsel %vm1475_vm1, %v2291_v41, %v5102_v19  ;;  %v5107_v10 = vld [vmem:[#allocation16_spill] sm:$0xff] }
 0x16b   : > { %1404 = vrot.lane.b32.xlu1 %v1391_v42, %s3624_s8  ;;  %1402 = vrot.lane.b32.xlu0 %v1390_v6, %s3624_s8  ;;  %v3152_v17 = vcombine.low %v3572_v14, %v3572_v14  ;;  %v5100_v42 = vld [vmem:[#allocation6_spill] sm:$0xff]  ;;  %v5108_v14 = vld [vmem:[#allocation13_spill] sm:$0xff]  ;;  %v5123_v19 = vld [vmem:[#allocation56_spill] sm:$0xff] }
 0x16c   : > { %v2309_v6 = vsel %vm1450_vm0, %v3582_v13, %v5100_v42  ;;  %v5122_v42 = vld [vmem:[#allocation51_spill] sm:$0xff] }
 0x16d   : > { %v941_v53 = vpop.permute.xlu1 %940  ;;  %v939_v7 = vpop.permute.xlu0 %938  ;;  %v2326_v15 = vsel %vm1475_vm1, %v2309_v6, %v5112_v47 }
 0x16e   : > { %v4683_v2 = vsel %vm1560_vm6, %v1555_v31, %v941_v53  ;;  %v4686_v51 = vsel %vm1560_vm6, %v1553_v3, %v939_v7  ;;  %v5104_v53 = vld [vmem:[#allocation10_spill] sm:$0xff] }
 0x16f   : > { %1400 = vrot.lane.b32.xlu1 %v1389_v45, %s3624_s8  ;;  %1398 = vrot.lane.b32.xlu0 %v1388_v33, %s3624_s8  ;;  %v2322_v7 = vsel %vm1475_vm1, %v2303_v50, %v5104_v53 }
 0x171   : > { %v937_v43 = vpop.permute.xlu1 %936  ;;  %v935_v21 = vpop.permute.xlu0 %934 }
 0x172   : > { %v4694_v29 = vsel %vm1560_vm6, %v1551_v23, %v937_v43  ;;  %v4697_v52 = vsel %vm1560_vm6, %v1549_v54, %v935_v21  ;;  %v3155_v23 = vcombine.low %v3577_v37, %v3577_v37  ;;  %v3578_v54 = vld [vmem:[%s3671_s19 + $0xb8] sm:$0xf]  ;;  %v5105_v43 = vld [vmem:[#allocation11_spill] sm:$0xff]  ;;  %v5106_v21 = vld [vmem:[#allocation12_spill] sm:$0xff] }
 0x173   : > { %1408 = vrot.lane.b32.xlu1 %v1393_v9, %s3624_s8  ;;  %1406 = vrot.lane.b32.xlu0 %v1392_v46, %s3624_s8  ;;  %v3154_v8 = vcombine.low %v3578_v54, %v3578_v54  ;;  %v3159_v9 = vcombine.low %v3585_v44, %v3585_v44  ;;  %v2318_v24 = vsel %vm1475_vm1, %v2297_v60, %v5106_v21  ;;  %v5114_v37 = vld [vmem:[#allocation35_spill] sm:$0xff]  ;;  %v5131_v21 = vld [vmem:[#allocation45_spill] sm:$0xff] }
 0x175   : > { %v945_v30 = vpop.permute.xlu1 %944  ;;  %v943_v49 = vpop.permute.xlu0 %942 }
 0x176   : > { %v4708_v40 = vsel %vm1560_vm6, %v4655_v18, %v945_v30  ;;  %v4712_v28 = vsel %vm1560_vm6, %v4658_v48, %v943_v49  ;;  %v5099_v18 = vld [vmem:[#allocation5_spill] sm:$0xff]  ;;  %v5109_v30 = vld [vmem:[#allocation19_spill] sm:$0xff] }
 0x177   : > { %1436 = vrot.lane.b32.xlu1 %v3153_v27, %s3625_s22  ;;  %1434 = vrot.lane.b32.xlu0 %v3152_v17, %s3625_s22  ;;  %v2306_v48 = vsel %vm1450_vm0, %v3581_v0, %v5099_v18  ;;  %v2330_v27 = vsel %vm1492_vm2, %v2314_v4, %v5107_v10  ;;  %v5120_v0 = vld [vmem:[#allocation29_spill] sm:$0xff] }
 0x178   : > { %v2324_v17 = vsel %vm1475_vm1, %v2306_v48, %v5108_v14  ;;  %v2346_v5 = vsel %vm1509_vm3, %v2330_v27, %v5110_v1  ;;  %v5121_v48 = vld [vmem:[#allocation48_spill] sm:$0xff] }
 0x179   : > { %v1029_v31 = vpop.permute.xlu1 %1028  ;;  %v1027_v3 = vpop.permute.xlu0 %1026  ;;  %v2362_v50 = vsel %vm1526_vm4, %v2346_v5, %v5113_v59  ;;  %v5132_v27 = vld [vmem:[#allocation28_spill] sm:$0xff]  ;;  %v5135_v5 = vld [vmem:[#allocation53_spill] sm:$0xff] }
 0x17a   : > { %v4726_v55 = vsel %vm1577_vm7, %v4670_v34, %v1029_v31  ;;  %v4730_v25 = vsel %vm1577_vm7, %v4673_v63, %v1027_v3  ;;  %v3584_v63 = vld [vmem:[%s3671_s19 + $0x130] sm:$0xf]  ;;  %v5111_v31 = vld [vmem:[#allocation27_spill] sm:$0xff]  ;;  %v2378_v35 = vsel %vm1543_vm5, %v2362_v50, %v5117_v58  ;;  %v5141_v58 = vld [vmem:[#allocation22_spill] sm:$0xff] }
 0x17b   : > { %1444 = vrot.lane.b32.xlu1 %v3157_v39, %s3625_s22  ;;  %1442 = vrot.lane.b32.xlu0 %v3156_v56, %s3625_s22  ;;  %v4762_v45 = vsel %vm1450_vm0, %v3584_v63, %v5103_v12  ;;  %v2560_v56 = vsel %vm2558_vm8, %v3562_v38, 0  ;;  %v2394_v13 = vsel %vm1560_vm6, %v2378_v35, %v5121_v48  ;;  %v5125_v38 = vld [vmem:[#allocation15_spill] sm:$0xff]  ;;  %v5142_v35 = vld [vmem:[#allocation25_spill] sm:$0xff]  ;;  %vm2449_vm0 = vcmask 523264  }
 0x17c   : > { %3306 = vmatpush3.bf16.msra.mxu0 %v2560_v56  ;;  %3328 = vmatpush3.bf16.msra.mxu1 %v2560_v56  ;;  %v2410_v4 = vsel %vm1577_vm7, %v2394_v13, %v5123_v19  ;;  %v2320_v53 = vsel %vm1475_vm1, %v2300_v62, %v5125_v38  ;;  %v5136_v56 = vld [vmem:[#allocation58_spill] sm:$0xff]  ;;  %v5147_v13 = vld [vmem:[#allocation52_spill] sm:$0xff] }
 0x17d   : > { %v1037_v11 = vpop.permute.xlu1 %1036  ;;  %v1035_v34 = vpop.permute.xlu0 %1034  ;;  %v5149_v19 = vld [vmem:[#allocation60_spill] sm:$0xff] }
 0x17e   : > { %v4766_v33 = vsel %vm1577_vm7, %v4683_v2, %v1037_v11  ;;  %v4770_v16 = vsel %vm1577_vm7, %v4686_v51, %v1035_v34  ;;  %v3586_v2 = vld [vmem:[%s3671_s19 + $0xd8] sm:$0xf]  ;;  %v2316_v51 = vsel %vm1475_vm1, %v2294_v57, %v5105_v43  ;;  %v5118_v57 = vld [vmem:[#allocation43_spill] sm:$0xff]  ;;  %s3626_s19 = smov 64  }
 0x17f   : > { %1440 = vrot.lane.b32.xlu1 %v3155_v23, %s3625_s22  ;;  %1438 = vrot.lane.b32.xlu0 %v3154_v8, %s3625_s22  ;;  %v3158_v46 = vcombine.low %v3586_v2, %v3586_v2  ;;  %v2332_v49 = vsel %vm1492_vm2, %v2316_v51, %v5109_v30  ;;  %v5124_v11 = vld [vmem:[#allocation59_spill] sm:$0xff]  ;;  %v5130_v51 = vld [vmem:[#allocation42_spill] sm:$0xff] }
 0x180   : > { %v2348_v3 = vsel %vm1509_vm3, %v2332_v49, %v5111_v31  ;;  %v5129_v43 = vld [vmem:[#allocation23_spill] sm:$0xff]  ;;  %v5134_v49 = vld [vmem:[#allocation50_spill] sm:$0xff] }
 0x181   : > { %v1033_v39 = vpop.permute.xlu1 %1032  ;;  %v1031_v20 = vpop.permute.xlu0 %1030  ;;  %v2364_v23 = vsel %vm1526_vm4, %v2348_v3, %v5114_v37  ;;  %v5137_v3 = vld [vmem:[#allocation61_spill] sm:$0xff] }
 0x182   : > { %v4800_v32 = vsel %vm1577_vm7, %v4694_v29, %v1033_v39  ;;  %v4804_v41 = vsel %vm1577_vm7, %v4697_v52, %v1031_v20  ;;  %v5115_v29 = vld [vmem:[#allocation18_spill] sm:$0xff]  ;;  %v5116_v52 = vld [vmem:[#allocation21_spill] sm:$0xff]  ;;  %v2380_v36 = vsel %vm1543_vm5, %v2364_v23, %v5118_v57  ;;  %v5143_v57 = vld [vmem:[#allocation44_spill] sm:$0xff] }
 0x183   : > { %1448 = vrot.lane.b32.xlu1 %v3159_v9, %s3625_s22  ;;  %1446 = vrot.lane.b32.xlu0 %v3158_v46, %s3625_s22  ;;  %v2338_v54 = vsel %vm1492_vm2, %v2322_v7, %v5115_v29  ;;  %v2340_v8 = vsel %vm1492_vm2, %v2324_v17, %v5116_v52  ;;  %v2396_v6 = vsel %vm1560_vm6, %v2380_v36, %v5122_v42  ;;  %v5126_v7 = vld [vmem:[#allocation34_spill] sm:$0xff]  ;;  %v5127_v9 = vld [vmem:[#allocation37_spill] sm:$0xff]  ;;  %v5128_v46 = vld [vmem:[#allocation20_spill] sm:$0xff] }
 0x184   : > { %v2354_v60 = vsel %vm1509_vm3, %v2338_v54, %v5119_v26  ;;  %v2356_v18 = vsel %vm1509_vm3, %v2340_v8, %v5120_v0  ;;  %v2412_v34 = vsel %vm1577_vm7, %v2396_v6, %v5124_v11  ;;  %v5133_v17 = vld [vmem:[#allocation31_spill] sm:$0xff]  ;;  %v5138_v37 = vld [vmem:[#allocation17_spill] sm:$0xff]  ;;  %v5139_v29 = vld [vmem:[#allocation36_spill] sm:$0xff] }
 0x185   : > { %v1041_v61 = vpop.permute.xlu1 %1040  ;;  %v1039_v22 = vpop.permute.xlu0 %1038  ;;  %v2370_v44 = vsel %vm1526_vm4, %v2354_v60, %v5126_v7  ;;  %v2372_v2 = vsel %vm1526_vm4, %v2356_v18, %v5127_v9  ;;  %v2328_v23 = vsel %vm1475_vm1, %v4762_v45, %v5138_v37  ;;  %v5140_v52 = vld [vmem:[#allocation39_spill] sm:$0xff]  ;;  %v5145_v60 = vld [vmem:[#allocation30_spill] sm:$0xff]  ;;  %v5146_v18 = vld [vmem:[#allocation33_spill] sm:$0xff]  ;;  %vm2545_vm1 = vcmask 818176  }
 0x186   : > { %v1593_v63 = vsel %vm1577_vm7, %v4708_v40, %v1041_v61  ;;  %v1591_v12 = vsel %vm1577_vm7, %v4712_v28, %v1039_v22  ;;  %v2334_v40 = vsel %vm1492_vm2, %v2318_v24, %v5128_v46  ;;  %v2336_v28 = vsel %vm1492_vm2, %v2320_v53, %v5129_v43  ;;  %v5144_v45 = vld [vmem:[#allocation47_spill] sm:$0xff]  ;;  %v5151_v7 = vld [vmem:[#allocation38_spill] sm:$0xff]  ;;  %v5152_v9 = vld [vmem:[#allocation41_spill] sm:$0xff] }
 0x187   : > { %2435 = vrot.lane.b32.xlu1 %v2412_v34, %s3626_s19  ;;  %2433 = vrot.lane.b32.xlu0 %v2410_v4, %s3626_s19  ;;  %v2386_v62 = vsel %vm1543_vm5, %v2370_v44, %v5130_v51  ;;  %v2388_v10 = vsel %vm1543_vm5, %v2372_v2, %v5131_v21  ;;  %v2350_v14 = vsel %vm1509_vm3, %v2334_v40, %v5132_v27  ;;  %v5148_v6 = vld [vmem:[#allocation55_spill] sm:$0xff]  ;;  %v5153_v46 = vld [vmem:[#allocation46_spill] sm:$0xff]  ;;  %v5154_v43 = vld [vmem:[#allocation49_spill] sm:$0xff] }
 0x188   : > { %v2352_v30 = vsel %vm1509_vm3, %v2336_v28, %v5133_v17  ;;  %v2402_v1 = vsel %vm1560_vm6, %v2386_v62, %v5134_v49  ;;  %v2404_v24 = vsel %vm1560_vm6, %v2388_v10, %v5135_v5  ;;  %v2366_v54 = vsel %vm1526_vm4, %v2350_v14, %v5139_v29  ;;  %v5150_v11 = vld [vmem:[#allocation63_spill] sm:$0xff]  ;;  %v5157_v27 = vld [vmem:[#allocation62_spill] sm:$0xff]  ;;  %v5158_v17 = vld [vmem:[#allocation64_spill] sm:$0xff] }
 0x189   : > { %v1077_v39 = vpop.permute.xlu1 %1076  ;;  %v1075_v20 = vpop.permute.xlu0 %1074  ;;  %v2418_v31 = vsel %vm1577_vm7, %v2402_v1, %v5136_v56  ;;  %v2420_v47 = vsel %vm1577_vm7, %v2404_v24, %v5137_v3  ;;  %v2368_v8 = vsel %vm1526_vm4, %v2352_v30, %v5140_v52  ;;  %v2382_v36 = vsel %vm1543_vm5, %v2366_v54, %v5143_v57 }
 0x18a   : > { %v1598_v59 = vsel %vm1594_vm9, %v4726_v55, %v1077_v39  ;;  %v1596_v50 = vsel %vm1594_vm9, %v4730_v25, %v1075_v20  ;;  %v2342_v55 = vsel %vm1492_vm2, %v2326_v15, %v5141_v58  ;;  %v2344_v25 = vsel %vm1492_vm2, %v2328_v23, %v5142_v35 }
 0x18b   : > { %2443 = vrot.lane.b32.xlu1 %v2420_v47, %s3626_s19  ;;  %2441 = vrot.lane.b32.xlu0 %v2418_v31, %s3626_s19  ;;  %v2384_v26 = vsel %vm1543_vm5, %v2368_v8, %v5144_v45  ;;  %v2358_v0 = vsel %vm1509_vm3, %v2342_v55, %v5145_v60  ;;  %v2360_v48 = vsel %vm1509_vm3, %v2344_v25, %v5146_v18 }
 0x18c   : > { %v2398_v42 = vsel %vm1560_vm6, %v2382_v36, %v5147_v13  ;;  %v2400_v15 = vsel %vm1560_vm6, %v2384_v26, %v5148_v6  ;;  %v2374_v44 = vsel %vm1526_vm4, %v2358_v0, %v5151_v7  ;;  %v2376_v2 = vsel %vm1526_vm4, %v2360_v48, %v5152_v9 }
 0x18d   : > { %v1085_v61 = vpop.permute.xlu1 %1084  ;;  %v1083_v22 = vpop.permute.xlu0 %1082  ;;  %v2414_v4 = vsel %vm1577_vm7, %v2398_v42, %v5149_v19  ;;  %v2416_v34 = vsel %vm1577_vm7, %v2400_v15, %v5150_v11  ;;  %v2390_v40 = vsel %vm1543_vm5, %v2374_v44, %v5153_v46  ;;  %v2392_v28 = vsel %vm1543_vm5, %v2376_v2, %v5154_v43 }
 0x18e   : > { %v1606_v38 = vsel %vm1594_vm9, %v4766_v33, %v1085_v61  ;;  %v1604_v53 = vsel %vm1594_vm9, %v4770_v16, %v1083_v22  ;;  %v5155_v33 = vld [vmem:[#allocation54_spill] sm:$0xff]  ;;  %v5156_v16 = vld [vmem:[#allocation57_spill] sm:$0xff] }
 0x18f   : > { %2439 = vrot.lane.b32.xlu1 %v2416_v34, %s3626_s19  ;;  %2437 = vrot.lane.b32.xlu0 %v2414_v4, %s3626_s19  ;;  %v2406_v51 = vsel %vm1560_vm6, %v2390_v40, %v5155_v33  ;;  %v2408_v62 = vsel %vm1560_vm6, %v2392_v28, %v5156_v16 }
 0x190   : > { %v2422_v14 = vsel %vm1577_vm7, %v2406_v51, %v5157_v27  ;;  %v2424_v30 = vsel %vm1577_vm7, %v2408_v62, %v5158_v17 }
 0x191   : > { %v1081_v21 = vpop.permute.xlu1 %1080  ;;  %v1079_v10 = vpop.permute.xlu0 %1078 }
 0x192   : > { %v1602_v49 = vsel %vm1594_vm9, %v4800_v32, %v1081_v21  ;;  %v1600_v1 = vsel %vm1594_vm9, %v4804_v41, %v1079_v10 }
 0x193   : > { %2447 = vrot.lane.b32.xlu1 %v2424_v30, %s3626_s19  ;;  %2445 = vrot.lane.b32.xlu0 %v2422_v14, %s3626_s19 }
 0x195   : > { %v1089_v5 = vpop.permute.xlu1 %1088  ;;  %v1087_v24 = vpop.permute.xlu0 %1086 }
 0x196   : > { %v1610_v39 = vsel %vm1594_vm9, %v1593_v63, %v1089_v5  ;;  %v1608_v20 = vsel %vm1594_vm9, %v1591_v12, %v1087_v24 }
 0x199   : > { %v1117_v56 = vpop.permute.xlu1 %1116  ;;  %v1115_v31 = vpop.permute.xlu0 %1114 }
 0x19a   : > { %v1615_v3 = vsel %vm1611_vm10, %v1598_v59, %v1117_v56  ;;  %v1613_v32 = vsel %vm1611_vm10, %v1596_v50, %v1115_v31 }
 0x19d   : > { %v1125_v47 = vpop.permute.xlu1 %1124  ;;  %v1123_v37 = vpop.permute.xlu0 %1122 }
 0x19e   : > { %v1623_v41 = vsel %vm1611_vm10, %v1606_v38, %v1125_v47  ;;  %v1621_v23 = vsel %vm1611_vm10, %v1604_v53, %v1123_v37 }
 0x1a1   : > { %v1121_v29 = vpop.permute.xlu1 %1120  ;;  %v1119_v54 = vpop.permute.xlu0 %1118 }
 0x1a2   : > { %v1619_v52 = vsel %vm1611_vm10, %v1602_v49, %v1121_v29  ;;  %v1617_v63 = vsel %vm1611_vm10, %v1600_v1, %v1119_v54 }
 0x1a5   : > { %v1129_v12 = vpop.permute.xlu1 %1128  ;;  %v1127_v8 = vpop.permute.xlu0 %1126 }
 0x1a6   : > { %v1627_v58 = vsel %vm1611_vm10, %v1610_v39, %v1129_v12  ;;  %v1625_v59 = vsel %vm1611_vm10, %v1608_v20, %v1127_v8 }
 0x1a9   : > { %v1157_v50 = vpop.permute.xlu1 %1156  ;;  %v1155_v55 = vpop.permute.xlu0 %1154 }
 0x1aa   : > { %v1632_v35 = vsel %vm1628_vm11, %v1615_v3, %v1157_v50  ;;  %v1630_v25 = vsel %vm1628_vm11, %v1613_v32, %v1155_v55 }
 0x1ad   : > { %v1165_v57 = vpop.permute.xlu1 %1164  ;;  %v1163_v36 = vpop.permute.xlu0 %1162 }
 0x1ae   : > { %v1640_v45 = vsel %vm1628_vm11, %v1623_v41, %v1165_v57  ;;  %v1638_v26 = vsel %vm1628_vm11, %v1621_v23, %v1163_v36 }
 0x1b1   : > { %v1161_v60 = vpop.permute.xlu1 %1160  ;;  %v1159_v0 = vpop.permute.xlu0 %1158 }
 0x1b2   : > { %v4942_v18 = vsel %vm1628_vm11, %v1619_v52, %v1161_v60  ;;  %v4945_v48 = vsel %vm1628_vm11, %v1617_v63, %v1159_v0 }
 0x1b5   : > { %v1169_v13 = vpop.permute.xlu1 %1168  ;;  %v1167_v42 = vpop.permute.xlu0 %1166 }
 0x1b6   : > { %v4948_v6 = vsel %vm1628_vm11, %v1627_v58, %v1169_v13  ;;  %v4951_v15 = vsel %vm1628_vm11, %v1625_v59, %v1167_v42 }
 0x1b9   : > { %v1253_v61 = vpop.permute.xlu1 %1252  ;;  %v1251_v22 = vpop.permute.xlu0 %1250 }
 0x1ba   : > { %v1649_v56 = vsel %vm1645_vm12, %v1632_v35, %v1253_v61  ;;  %v1647_v31 = vsel %vm1645_vm12, %v1630_v25, %v1251_v22 }
 0x1bd   : > { %v1261_v19 = vpop.permute.xlu1 %1260  ;;  %v1259_v4 = vpop.permute.xlu0 %1258 }
 0x1be   : > { %v1657_v52 = vsel %vm1645_vm12, %v1640_v45, %v1261_v19  ;;  %v1655_v63 = vsel %vm1645_vm12, %v1638_v26, %v1259_v4 }
 0x1c1   : > { %v1257_v11 = vpop.permute.xlu1 %1256  ;;  %v1255_v34 = vpop.permute.xlu0 %1254 }
 0x1c2   : > { %v1653_v26 = vsel %vm1645_vm12, %v4942_v18, %v1257_v11  ;;  %v1651_v60 = vsel %vm1645_vm12, %v4945_v48, %v1255_v34 }
 0x1c5   : > { %v4953_v38 = vpop.permute.xlu1 %1264  ;;  %v4955_v53 = vpop.permute.xlu0 %1262 }
 0x1c6   : > { %v1661_v34 = vsel %vm1645_vm12, %v4948_v6, %v4953_v38 }
 0x1c9   : > { %v1349_v7 = vpop.permute.xlu1 %1348  ;;  %v1347_v44 = vpop.permute.xlu0 %1346 }
 0x1ca   : > { %v1666_v3 = vsel %vm1662_vm13, %v1649_v56, %v1349_v7  ;;  %v1664_v32 = vsel %vm1662_vm13, %v1647_v31, %v1347_v44  ;;  %v1659_v44 = vsel %vm1645_vm12, %v4951_v15, %v4955_v53 }
 0x1cd   : > { %v1357_v9 = vpop.permute.xlu1 %1356  ;;  %v1355_v2 = vpop.permute.xlu0 %1354 }
 0x1ce   : > { %v1674_v58 = vsel %vm1662_vm13, %v1657_v52, %v1357_v9  ;;  %v1672_v59 = vsel %vm1662_vm13, %v1655_v63, %v1355_v2 }
 0x1d1   : > { %v1353_v46 = vpop.permute.xlu1 %1352  ;;  %v1351_v40 = vpop.permute.xlu0 %1350 }
 0x1d2   : > { %v1670_v42 = vsel %vm1662_vm13, %v1653_v26, %v1353_v46  ;;  %v1668_v61 = vsel %vm1662_vm13, %v1651_v60, %v1351_v40 }
 0x1d5   : > { %v4957_v43 = vpop.permute.xlu1 %1360  ;;  %v4959_v28 = vpop.permute.xlu0 %1358 }
 0x1d6   : > { %v1678_v46 = vsel %vm1662_vm13, %v1661_v34, %v4957_v43  ;;  %v1676_v40 = vsel %vm1662_vm13, %v1659_v44, %v4959_v28  ;;  %v3224_v28 = vld [vmem:[%s5031_s2] ss:$0 sm:$0xff] }
 0x1d9   : > { %v1397_v33 = vpop.permute.xlu1 %1396  ;;  %v1395_v51 = vpop.permute.xlu0 %1394 }
 0x1da   : > { %v1683_v47 = vsel %vm1679_vm14, %v1666_v3, %v1397_v33  ;;  %v1681_v37 = vsel %vm1679_vm14, %v1664_v32, %v1395_v51 }
 0x1dd   : > { %v1405_v16 = vpop.permute.xlu1 %1404  ;;  %v1403_v62 = vpop.permute.xlu0 %1402 }
 0x1de   : > { %v1691_v55 = vsel %vm1679_vm14, %v1674_v58, %v1405_v16  ;;  %v1689_v35 = vsel %vm1679_vm14, %v1672_v59, %v1403_v62 }
 0x1e1   : > { %v1401_v21 = vpop.permute.xlu1 %1400  ;;  %v1399_v10 = vpop.permute.xlu0 %1398 }
 0x1e2   : > { %v1687_v19 = vsel %vm1679_vm14, %v1670_v42, %v1401_v21  ;;  %v1685_v4 = vsel %vm1679_vm14, %v1668_v61, %v1399_v10 }
 0x1e5   : > { %v1409_v27 = vpop.permute.xlu1 %1408  ;;  %v1407_v14 = vpop.permute.xlu0 %1406 }
 0x1e6   : > { %v1695_v51 = vsel %vm1679_vm14, %v1678_v46, %v1409_v27  ;;  %v1693_v16 = vsel %vm1679_vm14, %v1676_v40, %v1407_v14 }
 0x1e9   : > { %v1437_v17 = vpop.permute.xlu1 %1436  ;;  %v1435_v30 = vpop.permute.xlu0 %1434 }
 0x1ea   : > { %v1700_v41 = vsel %vm1696_vm15, %v1683_v47, %v1437_v17  ;;  %v1698_v23 = vsel %vm1696_vm15, %v1681_v37, %v1435_v30 }
 0x1ed   : > { %v1445_v49 = vpop.permute.xlu1 %1444  ;;  %v1443_v1 = vpop.permute.xlu0 %1442 }
 0x1ee   : > { %v1708_v25 = vsel %vm1696_vm15, %v1691_v55, %v1445_v49  ;;  %v1706_v57 = vsel %vm1696_vm15, %v1689_v35, %v1443_v1 }
 0x1f1   : > { %v1441_v5 = vpop.permute.xlu1 %1440  ;;  %v1439_v24 = vpop.permute.xlu0 %1438 }
 0x1f2   : > { %v1704_v7 = vsel %vm1696_vm15, %v1687_v19, %v1441_v5  ;;  %v1702_v18 = vsel %vm1696_vm15, %v1685_v4, %v1439_v24 }
 0x1f5   : > { %v1449_v39 = vpop.permute.xlu1 %1448  ;;  %v1447_v20 = vpop.permute.xlu0 %1446 }
 0x1f6   : > { %v1712_v6 = vsel %vm1696_vm15, %v1695_v51, %v1449_v39  ;;  %v1710_v38 = vsel %vm1696_vm15, %v1693_v16, %v1447_v20 }
 0x1f9   : > { %v2436_v29 = vpop.permute.xlu1 %2435  ;;  %v2434_v54 = vpop.permute.xlu0 %2433 }
 0x1fa   : > { %v2453_v12 = vsel %vm2449_vm0, %v1700_v41, %v2436_v29  ;;  %v2451_v8 = vsel %vm2449_vm0, %v1698_v23, %v2434_v54 }
 0x1fb   : > { %v3225_v50 = vcombine.low %v2451_v8, %v2453_v12 }
 0x1fd   : > { %v2444_v36 = vpop.permute.xlu1 %2443  ;;  %3307 = vmatprep.mubr.msk.bf16.mxu0 %vm2545_vm1, %v3225_v50  ;;  %v2442_v45 = vpop.permute.xlu0 %2441 }
 0x1fe   : > { %v2461_v0 = vsel %vm2449_vm0, %v1708_v25, %v2444_v36  ;;  %v2459_v13 = vsel %vm2449_vm0, %v1706_v57, %v2442_v45 }
 0x1ff   : > { %v3227_v22 = vcombine.low %v2459_v13, %v2461_v0 }
 0x201   : > { %v2440_v11 = vpop.permute.xlu1 %2439  ;;  %3311 = vmatprep.mubr.msk.bf16.mxu1 %vm2545_vm1, %v3227_v22  ;;  %v2438_v48 = vpop.permute.xlu0 %2437 }
 0x202   : > { %v2457_v9 = vsel %vm2449_vm0, %v1704_v7, %v2440_v11  ;;  %v2455_v2 = vsel %vm2449_vm0, %v1702_v18, %v2438_v48 }
 0x203   : > { %v3226_v33 = vcombine.low %v2455_v2, %v2457_v9 }
 0x205   : > { %v2448_v15 = vpop.permute.xlu1 %2447  ;;  %3308 = vmatmul.mubr.msk.bf16.vlgmr.msra.gmra.mrb[0].mxu0 %vm2545_vm1, %v3226_v33  ;;  %v2446_v53 = vpop.permute.xlu0 %2445 }
 0x206   : > { %v2465_v62 = vsel %vm2449_vm0, %v1712_v6, %v2448_v15  ;;  %v2463_v43 = vsel %vm2449_vm0, %v1710_v38, %v2446_v53 }
 0x207   : > { %v3228_v21 = vcombine.low %v2463_v43, %v2465_v62 }
 0x209   : > { %3312 = vmatmul.mubr.msk.bf16.vlgmr.msra.gmra.mrb[0].mxu1 %vm2545_vm1, %v3228_v21 }
 0x2d8   : > { %v3309_v10 = vpop.f32.mrb[0].mxu0 }
 0x2d9   : > { %v2605_v27 = vadd.f32 %v3309_v10, %v3224_v28  ;;  %v2596_v14 = vpop.f32.mrb[1].mxu0 }
 0x2da   : > { %v2597_v17 = vadd.f32 %v3224_v28, %v2596_v14  ;;  %v3310_v30 = vpop.f32.mrb[2].mxu0 }
 0x2db   : > { %v2637_v49 = vmul.f32 0.2, %v2605_v27  ;;  %v2608_v1 = vadd.f32 %v3310_v30, %v3224_v28  ;;  %v2599_v5 = vpop.f32.mrb[3].mxu0  ;;  %vm2629_vm2 = vcmp.ge.f32.partialorder %v2605_v27, 0.0 }
 0x2dc   : > { %v2635_v24 = vmul.f32 0.2, %v2597_v17  ;;  %v2600_v39 = vadd.f32 %v3224_v28, %v2599_v5  ;;  %v3313_v20 = vpop.f32.mrb[0].mxu1  ;;  %vm2627_vm3 = vcmp.ge.f32.partialorder %v2597_v17, 0.0 }
 0x2dd   : > { %vm2630_vm4 = vcmp.ge.f32.partialorder %v2608_v1, 0.0  ;;  %v2638_v56 = vmul.f32 0.2, %v2608_v1  ;;  %v2621_v31 = vadd.f32 %v3313_v20, %v3224_v28  ;;  %v2612_v3 = vpop.f32.mrb[1].mxu1  ;;  %v2645_v41 = vsel %vm2629_vm2, %v2605_v27, %v2637_v49 }
 0x2de   : > { %vm2628_vm5 = vcmp.ge.f32.partialorder %v2600_v39, 0.0  ;;  %v2636_v32 = vmul.f32 0.2, %v2600_v39  ;;  %v2613_v47 = vadd.f32 %v3224_v28, %v2612_v3  ;;  %v3314_v37 = vpop.f32.mrb[2].mxu1  ;;  %v2643_v63 = vsel %vm2627_vm3, %v2597_v17, %v2635_v24 }
 0x2df   : > { %v2646_v23 = vsel %vm2630_vm4, %v2608_v1, %v2638_v56  ;;  %v2641_v29 = vmul.f32 0.2, %v2621_v31  ;;  %v2624_v54 = vadd.f32 %v3314_v37, %v3224_v28  ;;  %v2615_v52 = vpop.f32.mrb[3].mxu1  ;;  %vm2633_vm6 = vcmp.ge.f32.partialorder %v2621_v31, 0.0 }
 0x2e0   : > { %v3267_v12 = vpack.c.bf16 %v2646_v23, %v2645_v41  ;;  %v2644_v8 = vsel %vm2628_vm5, %v2600_v39, %v2636_v32  ;;  %v2639_v50 = vmul.f32 0.2, %v2613_v47  ;;  %v2616_v55 = vadd.f32 %v3224_v28, %v2615_v52 }
 0x2e1   : > { %v3262_v58 = vpack.c.bf16 %v2644_v8, %v2643_v63  ;;  %vm2634_vm7 = vcmp.ge.f32.partialorder %v2624_v54, 0.0  ;;  %v2642_v59 = vmul.f32 0.2, %v2624_v54  ;;  %v2649_v35 = vsel %vm2633_vm6, %v2621_v31, %v2641_v29 }
 0x2e2   : > { %3279 = vst [vmem:[%s238_s5 + $0x8] sm:$0xff] %v3267_v12   ;;  %vm2631_vm8 = vcmp.ge.f32.partialorder %v2613_v47, 0.0  ;;  %vm2632_vm9 = vcmp.ge.f32.partialorder %v2616_v55, 0.0  ;;  %v2640_v36 = vmul.f32 0.2, %v2616_v55 }
 0x2e3   : > { %3263 = vst [vmem:[%s238_s5] sm:$0xff] %v3262_v58   ;;  %v2650_v25 = vsel %vm2634_vm7, %v2624_v54, %v2642_v59  ;;  %v2647_v45 = vsel %vm2631_vm8, %v2613_v47, %v2639_v50 }
 0x2e4   : > { %v3277_v57 = vpack.c.bf16 %v2650_v25, %v2649_v35  ;;  %v2648_v26 = vsel %vm2632_vm9, %v2616_v55, %v2640_v36 }
 0x2e5   : > { %v3272_v60 = vpack.c.bf16 %v2648_v26, %v2647_v45 }
 0x2e6   : > { %3281 = vst [vmem:[%s238_s5 + $0x18] sm:$0xff] %v3277_v57  }
 0x2e7   : > { %3280 = vst [vmem:[%s238_s5 + $0x10] sm:$0xff] %v3272_v60  }
 0x2e8 PF: > { %s13_s14 = sadd.s32 1, %s3609_s14   ;;  %s5159_s12 = smov %s3605_s13 }
 0x2e9   : > { %p10_p5 = scmp.ge.s32.totalorder %s13_s14, 4   ;;  %s5160_s13 = smov %s5162_s15 }
 0x2eb   :  { %12 = sbr.rel (!%p10_p5) target bundleno = 2 (0x2), region = 78 }

// kernel: _lambda_.2
= control target key start
LH: loop header
LB: loop body
LE: loop exit
PB: predicated region body
PF: predicated region fallthrough
CT: control target
= control target key end

     0   :  { %s3524_s12 = smov 0   ;;  %s3526_s13 = smov 0   ;;  %s4825_s0 = inlined_call_operand.vmem [shape: bf16[2,1,18,18,4], index: 0, kind: input, shape index: {}]   ;;  %s4826_s1 = inlined_call_operand.vmem [shape: bf16[36,128], index: 1, kind: input, shape index: {}]   ;;  %s4827_s2 = inlined_call_operand.vmem [shape: f32[1,128], index: 2, kind: input, shape index: {}]   ;;  %s4828_s3 = inlined_call_operand.vmem [shape: bf16[2,256,128], index: 3, kind: output, shape index: {}]  }
   0x1   :  { %s3528_s14 = smov 0  }
   0x2 LB: > { %s32_s15 = sadd.s32 1, %s3490_s13  ;;  %p2769_p0 = scmp.ge.s32.totalorder %s3494_s14, 1  ;;  %s3494_s14 = sphi %s3528_s14, %s13_s14   ;;  %s3490_s13 = sphi %s3526_s13, %s4842_s13   ;;  %s3486_s12 = sphi %s3524_s12, %s4841_s12  }
   0x3   : > { %p34_p1 = scmp.ge.s32.totalorder %s32_s15, 2  ;;  %p177_p2 = scmp.lt.s32.totalorder %s3494_s14, 3 }
   0x5   : > { %s4844_s15 = smov (%p34_p1, %s32_s15), 0  ;;  %p178_p3 = pnand %p2769_p0, %p177_p2 }
   0x7   : > { %181 = sbr.rel (%p178_p3) target bundleno = 616 (0x268), region = 32 }
   0xe   : > { %p215_p4 = scmp.lt.s32.totalorder %s3486_s12, 1  ;;  %s3496_s20 = smov 12   ;;  %vm846_vm0 = vcmask 1046528   ;;  %vm573_vm1 = vsmask.f32 7424  ;;  %vm2275_vm2 = vcmask 1041408  }
   0xf   : > { %s3497_s21 = smov 8   ;;  %s3498_s22 = smov 4   ;;  %vm1951_vm3 = vcmask 31744   ;;  %vm1984_vm4 = vcmask 64512   ;;  %vm2017_vm5 = vcmask 97280   ;;  %vm2050_vm6 = vcmask 130048  }
  0x10   : > { %s4846_s12 = smov (!%p215_p4, %s3486_s12), 1  ;;  %s3499_s23 = smov 16   ;;  %vm2083_vm7 = vcmask 162816   ;;  %vm2116_vm8 = vcmask 195584   ;;  %vm2149_vm9 = vcmask 228352   ;;  %vm2182_vm10 = vcmask 261120  }
  0x11   : > { %s3292_s16 = smul.u32 216, %s4846_s12  ;;  %s3500_s24 = smov 20   ;;  %vm2242_vm11 = vcmask 293888  }
  0x12   : > { %s3501_s27 = smov 24   ;;  %s3502_s30 = smov 28  }
  0x13   : > { %s3548_s19 = scalar_lea.vmem %s4825_s0, %s3292_s16  ;;  %s3503_s4 = smov 32  }
  0x14   : > { %v2789_v0 = vld [vmem:[%s3548_s19 + $0x6c] sm:$0xf]  ;;  %v3552_v1 = vld [vmem:[%s3548_s19 + $0x70] sm:$0xf]  ;;  %v262_v6 = vld [vmem:[%s3548_s19 + $0x64] sm:$0xf] }
  0x15   : > { %v3555_v2 = vcombine.low %v2789_v0, %v3552_v1  ;;  %v2773_v3 = vld [vmem:[%s3548_s19 + $0xc] sm:$0xf]  ;;  %v3559_v4 = vld [vmem:[%s3548_s19 + $0x10] sm:$0xf]  ;;  %v301_v7 = vld [vmem:[%s3548_s19 + $0x60] sm:$0xe] }
  0x16   : > { %v3562_v5 = vcombine.low %v2773_v3, %v3559_v4  ;;  %v3569_v8 = vld [vmem:[%s3548_s19 + $0x68] ss:$0 sps:$4 sm:$0x11]   ;;  %v2941_v9 = vcombine.low %v301_v7, %v262_v6  ;;  %v261_v10 = vld [vmem:[%s3548_s19 + $0x60] sm:$0xf]  ;;  %s3099_s9 = sshll.u32 %s4846_s12, 7 }
  0x17   : > { %1023 = vrot.lane.b32.xlu1 %v3555_v2, %s3496_s20  ;;  %v1186_v11 = vshll.u32 %v3555_v2, 16  ;;  %v246_v12 = vld [vmem:[%s3548_s19 + $0x4] sm:$0xf]  ;;  %v872_v14 = vrot.slane %v3569_v8, 1  ;;  %v293_v15 = vld [vmem:[%s3548_s19] sm:$0xe]  ;;  %v3580_v18 = vcombine.low %v261_v10, %v262_v6  ;;  %s4774_s16 = scalar_lea.vmem %s4828_s3, %s3099_s9 }
  0x18   : > { %1007 = vrot.lane.b32.xlu0 %v3562_v5, %s3496_s20  ;;  %v871_v13 = vrot.slane %v2941_v9, 1  ;;  %v245_v16 = vld [vmem:[%s3548_s19] sm:$0xf]  ;;  %v1090_v17 = vshll.u32 %v3562_v5, 16  ;;  %v2933_v20 = vcombine.low %v293_v15, %v246_v12  ;;  %v263_v21 = vld [vmem:[%s3548_s19 + $0x6c] sm:$0xf] }
  0x19   : > { %v3332_v19 = vld [vmem:[%s3548_s19 + $0x8] ss:$0 sps:$4 sm:$0x11]   ;;  %v3585_v23 = vcombine.low %v245_v16, %v246_v12  ;;  %v264_v24 = vld [vmem:[%s3548_s19 + $0x70] sm:$0xf]  ;;  %v671_v30 = vshrl.u32 %v3580_v18, 16 }
  0x1a   : > { %v873_v22 = vsel %vm846_vm0, %v871_v13, %v872_v14  ;;  %v302_v25 = vld [vmem:[%s3548_s19 + $0x6c] sm:$0xe]  ;;  %v847_v26 = vrot.slane %v2933_v20, 1  ;;  %v848_v27 = vrot.slane %v3332_v19, 1  ;;  %v3592_v31 = vcombine.low %v263_v21, %v264_v24  ;;  %v248_v33 = vld [vmem:[%s3548_s19 + $0x10] sm:$0xf] }
  0x1b   : > { %911 = vrot.lane.b32.xlu1 %v873_v22, %s3497_s21  ;;  %v3336_v28 = vld [vmem:[%s3548_s19 + $0x74] ss:$0 sps:$4 sm:$0x11]   ;;  %v2942_v29 = vcombine.low %v302_v25, %v264_v24  ;;  %v247_v32 = vld [vmem:[%s3548_s19 + $0xc] sm:$0xf]  ;;  %v575_v41 = vshrl.u32 %v3585_v23, 16 }
  0x1c   : > { %v849_v34 = vsel %vm846_vm0, %v847_v26, %v848_v27  ;;  %v875_v36 = vrot.slane %v3336_v28, 1  ;;  %v294_v37 = vld [vmem:[%s3548_s19 + $0xc] sm:$0xe]  ;;  %v3598_v38 = vcombine.low %v247_v32, %v248_v33  ;;  %v3339_v39 = vld [vmem:[%s3548_s19 + $0x14] ss:$0 sps:$4 sm:$0x11]  }
  0x1d   : > { %v874_v35 = vrot.slane %v2942_v29, 1  ;;  %895 = vrot.lane.b32.xlu0 %v849_v34, %s3497_s21  ;;  %v2934_v40 = vcombine.low %v294_v37, %v248_v33  ;;  %v577_v42 = vshll.u32 %v3585_v23, 16  ;;  %v582_v43 = vshll.u32 %v3332_v19, 16  ;;  %v2791_v52 = vld [vmem:[%s3548_s19 + $0x78] sm:$0xf] }
  0x1e   : > { %v587_v45 = vshrl.u32 %v3598_v38, 16  ;;  %v589_v46 = vshll.u32 %v3598_v38, 16  ;;  %v683_v47 = vshrl.u32 %v3592_v31, 16  ;;  %v851_v49 = vrot.slane %v3339_v39, 1  ;;  %v3612_v57 = vld [vmem:[%s3548_s19 + $0x7c] sm:$0xf] }
  0x1f   : > { %v876_v44 = vsel %vm846_vm0, %v874_v35, %v875_v36  ;;  %v850_v48 = vrot.slane %v2934_v40, 1  ;;  %v594_v50 = vshll.u32 %v3339_v39, 16  ;;  %v579_v51 = vrot.slane %v577_v42, 1  ;;  %v2775_v62 = vld [vmem:[%s3548_s19 + $0x18] sm:$0xf] }
  0x20   : > { %913 = vrot.lane.b32.xlu1 %v876_v44, %s3497_s21  ;;  %v591_v53 = vrot.slane %v589_v46, 1  ;;  %v584_v54 = vrot.slane %v582_v43, 1  ;;  %v685_v55 = vshll.u32 %v3592_v31, 16  ;;  %v690_v56 = vshll.u32 %v3336_v28, 16  ;;  %v3618_v63 = vld [vmem:[%s3548_s19 + $0x1c] sm:$0xf] }
  0x21   : > { %v852_v58 = vsel %vm846_vm0, %v850_v48, %v851_v49  ;;  %v596_v59 = vrot.slane %v594_v50, 1  ;;  %v580_v60 = vor.u32 %v579_v51, %v575_v41  ;;  %v673_v61 = vshll.u32 %v3580_v18, 16  ;;  %v3625_v13 = vld [vmem:[%s3548_s19 + $0x74] ss:$0 sps:$4 sm:$0x11]  }
  0x22   : > { %897 = vrot.lane.b32.xlu0 %v852_v58, %s3497_s21  ;;  %v592_v0 = vor.u32 %v591_v53, %v587_v45  ;;  %v687_v3 = vrot.slane %v685_v55, 1  ;;  %v692_v6 = vrot.slane %v690_v56, 1  ;;  %v678_v7 = vshll.u32 %v3569_v8, 16  ;;  %v3630_v20 = vld [vmem:[%s3548_s19 + $0x14] ss:$0 sps:$4 sm:$0x11]  }
  0x23   : > { %v585_v9 = vsel %vm573_vm1, %v580_v60, %v584_v54  ;;  %v675_v10 = vrot.slane %v673_v61, 1  ;;  %v2958_v12 = vcombine.low %v2791_v52, %v3612_v57  ;;  %v2950_v19 = vcombine.low %v2775_v62, %v3618_v63  ;;  %v3637_v24 = vld [vmem:[%s3548_s19 + $0x80] ss:$0 sps:$4 sm:$0x11]   ;;  %v2829_v40 = vld [vmem:[%s3548_s19 + $0x6c] sm:$0xe] }
  0x24   : > { %v597_v14 = vsel %vm573_vm1, %v592_v0, %v596_v59  ;;  %v688_v15 = vor.u32 %v687_v3, %v683_v47  ;;  %v680_v16 = vrot.slane %v678_v7, 1  ;;  %v1184_v21 = vshrl.u32 %v3555_v2, 16  ;;  %v2821_v43 = vld [vmem:[%s3548_s19 + $0xc] sm:$0xe]  ;;  %v2830_v49 = vld [vmem:[%s3548_s19 + $0x78] sm:$0xe] }
  0x25   : > { %768 = vrot.lane.b32.xlu1 %v597_v14, %s3498_s22  ;;  %v676_v8 = vor.u32 %v675_v10, %v671_v30  ;;  %v1188_v22 = vrot.slane %v1186_v11, 1  ;;  %v1198_v26 = vshll.u32 %v2958_v12, 16  ;;  %v1191_v27 = vshll.u32 %v3625_v13, 16  ;;  %v3648_v11 = vld [vmem:[%s3548_s19 + $0x20] ss:$0 sps:$4 sm:$0x11]  }
  0x26   : > { %766 = vrot.lane.b32.xlu0 %v585_v9, %s3498_s22  ;;  %v693_v25 = vsel %vm573_vm1, %v688_v15, %v692_v6  ;;  %v1088_v28 = vshrl.u32 %v3562_v5, 16  ;;  %v1102_v30 = vshll.u32 %v2950_v19, 16  ;;  %v1092_v32 = vrot.slane %v1090_v17, 1  ;;  %v2822_v53 = vld [vmem:[%s3548_s19 + $0x18] sm:$0xe] }
  0x27   : > { %v681_v29 = vsel %vm573_vm1, %v676_v8, %v680_v16  ;;  %v1095_v2 = vshll.u32 %v3630_v20, 16  ;;  %v1189_v33 = vor.u32 %v1188_v22, %v1184_v21  ;;  %v1193_v34 = vrot.slane %v1191_v27, 1  ;;  %v2853_v54 = vld [vmem:[%s3548_s19 + $0x78] sm:$0xf]  ;;  %v3675_v60 = vld [vmem:[%s3548_s19 + $0x1c] sm:$0xf] }
  0x28   : > { %v1093_v35 = vor.u32 %v1092_v32, %v1088_v28  ;;  %v1196_v36 = vshrl.u32 %v2958_v12, 16  ;;  %v1200_v37 = vrot.slane %v1198_v26, 1  ;;  %v1203_v39 = vshll.u32 %v3637_v24, 16  ;;  %v2837_v55 = vld [vmem:[%s3548_s19 + $0x18] sm:$0xf] }
  0x29   : > { %784 = vrot.lane.b32.xlu1 %v693_v25, %s3498_s22  ;;  %v1097_v5 = vrot.slane %v1095_v2, 1  ;;  %v1100_v17 = vshrl.u32 %v2950_v19, 16  ;;  %v1104_v41 = vrot.slane %v1102_v30, 1  ;;  %v1107_v42 = vshll.u32 %v3648_v11, 16  ;;  %v2855_v7 = vld [vmem:[%s3548_s19 + $0x84] sm:$0xf] }
  0x2a   : > { %782 = vrot.lane.b32.xlu0 %v681_v29, %s3498_s22  ;;  %v2989_v44 = vcombine.low %v2829_v40, %v3552_v1  ;;  %v1194_v45 = vsel %vm573_vm1, %v1189_v33, %v1193_v34  ;;  %v1201_v46 = vor.u32 %v1200_v37, %v1196_v36  ;;  %v1205_v47 = vrot.slane %v1203_v39, 1  ;;  %v3667_v1 = vld [vmem:[%s3548_s19 + $0x7c] sm:$0xf]  ;;  %v3685_v9 = vld [vmem:[%s3548_s19 + $0x88] sm:$0xf] }
  0x2b   : > { %v2981_v48 = vcombine.low %v2821_v43, %v3559_v4  ;;  %v1098_v50 = vsel %vm573_vm1, %v1093_v35, %v1097_v5  ;;  %v1105_v51 = vor.u32 %v1104_v41, %v1100_v17  ;;  %v1109_v52 = vrot.slane %v1107_v42, 1  ;;  %v3692_v14 = vld [vmem:[%s3548_s19 + $0x28] sm:$0xf]  ;;  %v3698_v21 = vld [vmem:[%s3548_s19 + $0x80] ss:$0 sps:$4 sm:$0x11]  }
  0x2c   : > { %v2990_v56 = vcombine.low %v2830_v49, %v3612_v57  ;;  %v1206_v4 = vsel %vm573_vm1, %v1201_v46, %v1205_v47  ;;  %v1383_v58 = vrot.slane %v2989_v44, 1  ;;  %v1384_v59 = vrot.slane %v3625_v13, 1  ;;  %v2839_v13 = vld [vmem:[%s3548_s19 + $0x24] sm:$0xf]  ;;  %v265_v37 = vld [vmem:[%s3548_s19 + $0x78] sm:$0xf] }
  0x2d   : > { %1025 = vrot.lane.b32.xlu1 %v2958_v12, %s3496_s20  ;;  %v2982_v61 = vcombine.low %v2822_v53, %v3618_v63  ;;  %v1110_v62 = vsel %vm573_vm1, %v1105_v51, %v1109_v52  ;;  %v1359_v0 = vrot.slane %v2981_v48, 1  ;;  %v1360_v3 = vrot.slane %v3630_v20, 1  ;;  %v3705_v26 = vld [vmem:[%s3548_s19 + $0x20] ss:$0 sps:$4 sm:$0x11]  }
  0x2e   : > { %1009 = vrot.lane.b32.xlu0 %v2950_v19, %s3496_s20  ;;  %v3005_v57 = vcombine.low %v2853_v54, %v3667_v1  ;;  %v2997_v6 = vcombine.low %v2837_v55, %v3675_v60  ;;  %v1385_v10 = vsel %vm846_vm0, %v1383_v58, %v1384_v59  ;;  %v1386_v63 = vrot.slane %v2990_v56, 1  ;;  %v3711_v34 = vld [vmem:[%s3548_s19 + $0x8c] ss:$0 sps:$4 sm:$0x11]   ;;  %v3720_v39 = vld [vmem:[%s3548_s19 + $0x7c] sm:$0xf] }
  0x2f   : > { %v1387_v12 = vrot.slane %v3637_v24, 1  ;;  %v1361_v15 = vsel %vm846_vm0, %v1359_v0, %v1360_v3  ;;  %v1362_v16 = vrot.slane %v2982_v61, 1  ;;  %v1363_v19 = vrot.slane %v3648_v11, 1  ;;  %v3716_v36 = vld [vmem:[%s3548_s19 + $0x2c] ss:$0 sps:$4 sm:$0x11]  }
  0x30   : > { %v1698_v20 = vshll.u32 %v3005_v57, 16  ;;  %v3006_v8 = vcombine.low %v2855_v7, %v3685_v9  ;;  %v1602_v22 = vshll.u32 %v2997_v6, 16  ;;  %v2998_v24 = vcombine.low %v2839_v13, %v3692_v14  ;;  %v249_v40 = vld [vmem:[%s3548_s19 + $0x18] sm:$0xf]  ;;  %v3724_v17 = vld [vmem:[%s3548_s19 + $0x1c] sm:$0xf] }
  0x31   : > { %1295 = vrot.lane.b32.xlu1 %v1194_v45, %s3499_s23  ;;  %v1388_v25 = vsel %vm846_vm0, %v1386_v63, %v1387_v12  ;;  %v1364_v27 = vsel %vm846_vm0, %v1362_v16, %v1363_v19  ;;  %v1696_v29 = vshrl.u32 %v3005_v57, 16  ;;  %v1703_v32 = vshll.u32 %v3698_v21, 16  ;;  %v3421_v41 = vld [vmem:[%s4826_s1] sm:$0xff]   ;;  %v2893_v42 = vld [vmem:[%s3548_s19 + $0x78] sm:$0xe]  ;;  %v3426_v56 = vld [vmem:[%s4826_s1 + $0x8] sm:$0xff]  }
  0x32   : > { %1279 = vrot.lane.b32.xlu0 %v1098_v50, %s3499_s23  ;;  %v1710_v28 = vshll.u32 %v3006_v8, 16  ;;  %v1700_v30 = vrot.slane %v1698_v20, 1  ;;  %v1614_v2 = vshll.u32 %v2998_v24, 16  ;;  %v1600_v11 = vshrl.u32 %v2997_v6, 16  ;;  %v2885_v47 = vld [vmem:[%s3548_s19 + $0x18] sm:$0xe]  ;;  %3246 = vmatprep.subr.bf16.mxu0 %v3421_v41 }
  0x33   : > { %v1604_v33 = vrot.slane %v1602_v22, 1  ;;  %v1607_v35 = vshll.u32 %v3705_v26, 16  ;;  %v1705_v43 = vrot.slane %v1703_v32, 1  ;;  %v1708_v44 = vshrl.u32 %v3006_v8, 16  ;;  %3284 = vmatprep.subr.bf16.mxu1 %v3421_v41  ;;  %3247 = vmatpush3.bf16.msra.mxu0 %v3421_v41  ;;  %v267_v7 = vld [vmem:[%s3548_s19 + $0x84] sm:$0xf] }
  0x34   : > { %v1701_v5 = vor.u32 %v1700_v30, %v1696_v29  ;;  %v1712_v45 = vrot.slane %v1710_v28, 1  ;;  %v1715_v46 = vshll.u32 %v3711_v34, 16  ;;  %v1612_v48 = vshrl.u32 %v2998_v24, 16  ;;  %3287 = vmatpush3.bf16.msra.mxu1 %v3421_v41  ;;  %v3748_v61 = vld [vmem:[%s3548_s19 + $0x80] ss:$0 sps:$4 sm:$0x11]   ;;  %3248 = vmatprep.subr.bf16.mxu0 %v3426_v56 }
  0x35   : > { %1297 = vrot.lane.b32.xlu1 %v1206_v4, %s3499_s23  ;;  %v1616_v49 = vrot.slane %v1614_v2, 1  ;;  %v1619_v50 = vshll.u32 %v3716_v36, 16  ;;  %v3736_v51 = vcombine.low %v265_v37, %v3720_v39  ;;  %v1605_v52 = vor.u32 %v1604_v33, %v1600_v11  ;;  %3285 = vmatprep.subr.bf16.mxu1 %v3426_v56  ;;  %v251_v13 = vld [vmem:[%s3548_s19 + $0x24] sm:$0xf] }
  0x36   : > { %1281 = vrot.lane.b32.xlu0 %v1110_v62, %s3499_s23  ;;  %v1609_v53 = vrot.slane %v1607_v35, 1  ;;  %v3739_v54 = vcombine.low %v249_v40, %v3724_v17  ;;  %v3037_v55 = vcombine.low %v2893_v42, %v3667_v1  ;;  %v3029_v4 = vcombine.low %v2885_v47, %v3675_v60  ;;  %v2894_v16 = vld [vmem:[%s3548_s19 + $0x84] sm:$0xe]  ;;  %v3790_v40 = vld [vmem:[%s3548_s19 + $0x8c] ss:$0 sps:$4 sm:$0x11]  }
  0x37   : > { %v1713_v58 = vor.u32 %v1712_v45, %v1708_v44  ;;  %v1717_v59 = vrot.slane %v1715_v46, 1  ;;  %v1706_v1 = vsel %vm573_vm1, %v1701_v5, %v1705_v43  ;;  %v1617_v62 = vor.u32 %v1616_v49, %v1612_v48  ;;  %3249 = vmatpush3.bf16.msra.mxu0 %v3426_v56 }
  0x38   : > { %v1621_v0 = vrot.slane %v1619_v50, 1  ;;  %v697_v3 = vshll.u32 %v3736_v51, 16  ;;  %v1610_v60 = vsel %vm573_vm1, %v1605_v52, %v1609_v53  ;;  %v1895_v63 = vrot.slane %v3037_v55, 1  ;;  %3288 = vmatpush3.bf16.msra.mxu1 %v3426_v56  ;;  %v303_v53 = vld [vmem:[%s3548_s19 + $0x78] sm:$0xe] }
  0x39   : > { %1423 = vrot.lane.b32.xlu1 %v1385_v10, %s3500_s24  ;;  %v3760_v10 = vld [vmem:[%s3548_s19 + $0x88] sm:$0xf]  ;;  %v1896_v12 = vrot.slane %v3698_v21, 1  ;;  %v1718_v19 = vsel %vm573_vm1, %v1713_v58, %v1717_v59  ;;  %v1871_v20 = vrot.slane %v3029_v4, 1  ;;  %v702_v22 = vshll.u32 %v3748_v61, 16 }
  0x3a   : > { %1407 = vrot.lane.b32.xlu0 %v1361_v15, %s3500_s24  ;;  %v3765_v15 = vld [vmem:[%s3548_s19 + $0x28] sm:$0xf]  ;;  %v1622_v21 = vsel %vm573_vm1, %v1617_v62, %v1621_v0  ;;  %v3777_v28 = vcombine.low %v267_v7, %v3760_v10  ;;  %v599_v29 = vshrl.u32 %v3739_v54, 16  ;;  %v3038_v2 = vcombine.low %v2894_v16, %v3685_v9  ;;  %v3795_v9 = vld [vmem:[%s3548_s19 + $0x2c] ss:$0 sps:$4 sm:$0x11]  }
  0x3b   : > { %v3782_v32 = vcombine.low %v251_v13, %v3765_v15  ;;  %v704_v33 = vrot.slane %v702_v22, 1  ;;  %v1897_v35 = vsel %vm846_vm0, %v1895_v63, %v1896_v12  ;;  %v1899_v45 = vrot.slane %v3711_v34, 1  ;;  %v296_v63 = vld [vmem:[%s3548_s19 + $0x24] sm:$0xe] }
  0x3c   : > { %v709_v5 = vshll.u32 %v3777_v28, 16  ;;  %v1898_v44 = vrot.slane %v3038_v2, 1  ;;  %v1875_v47 = vrot.slane %v3716_v36, 1  ;;  %v707_v49 = vshrl.u32 %v3777_v28, 16  ;;  %v295_v36 = vld [vmem:[%s3548_s19 + $0x18] sm:$0xe] }
  0x3d   : > { %1425 = vrot.lane.b32.xlu1 %v1388_v25, %s3500_s24  ;;  %v695_v25 = vshrl.u32 %v3736_v51, 16  ;;  %v714_v52 = vshll.u32 %v3790_v40, 16  ;;  %v611_v56 = vshrl.u32 %v3782_v32, 16  ;;  %v618_v4 = vshll.u32 %v3795_v9, 16 }
  0x3e   : > { %1409 = vrot.lane.b32.xlu0 %v1364_v27, %s3500_s24  ;;  %v699_v27 = vrot.slane %v697_v3, 1  ;;  %v711_v50 = vrot.slane %v709_v5, 1  ;;  %v1900_v58 = vsel %vm846_vm0, %v1898_v44, %v1899_v45  ;;  %v2943_v62 = vcombine.low %v303_v53, %v3720_v39  ;;  %v304_v3 = vld [vmem:[%s3548_s19 + $0x84] sm:$0xe] }
  0x3f   : > { %v2935_v0 = vcombine.low %v295_v36, %v3724_v17  ;;  %v620_v7 = vrot.slane %v618_v4, 1  ;;  %v878_v12 = vrot.slane %v3748_v61, 1  ;;  %v2944_v16 = vcombine.low %v304_v3, %v3760_v10 }
  0x40   : > { %v700_v37 = vor.u32 %v699_v27, %v695_v25  ;;  %v712_v59 = vor.u32 %v711_v50, %v707_v49  ;;  %v877_v17 = vrot.slane %v2943_v62, 1  ;;  %v2936_v61 = vcombine.low %v296_v63, %v3765_v15  ;;  %v3842_v15 = vld [vmem:[%s3548_s19 + $0x94] sm:$0xf]  ;;  %v2823_v62 = vld [vmem:[%s3548_s19 + $0x24] sm:$0xe] }
  0x41   : > { %1535 = vrot.lane.b32.xlu1 %v3005_v57, %s3501_s27  ;;  %v3754_v57 = vld [vmem:[%s3548_s19 + $0x20] ss:$0 sps:$4 sm:$0x11]   ;;  %v880_v10 = vrot.slane %v2944_v16, 1 }
  0x42   : > { %1519 = vrot.lane.b32.xlu0 %v2997_v6, %s3501_s27  ;;  %v601_v6 = vshll.u32 %v3739_v54, 16  ;;  %v705_v48 = vsel %vm573_vm1, %v700_v37, %v704_v33  ;;  %v854_v13 = vrot.slane %v3754_v57, 1  ;;  %v879_v27 = vsel %vm846_vm0, %v877_v17, %v878_v12  ;;  %v2779_v33 = vld [vmem:[%s3548_s19 + $0x30] sm:$0xf] }
  0x43   : > { %v856_v2 = vrot.slane %v2936_v61, 1  ;;  %v2832_v12 = vld [vmem:[%s3548_s19 + $0x90] sm:$0xe] }
  0x44   : > { %v603_v30 = vrot.slane %v601_v6, 1  ;;  %v2992_v61 = vcombine.low %v2832_v12, %v3842_v15 }
  0x45   : > { %1537 = vrot.lane.b32.xlu1 %v3006_v8, %s3501_s27  ;;  %v1872_v8 = vrot.slane %v3705_v26, 1  ;;  %v606_v26 = vshll.u32 %v3754_v57, 16  ;;  %v2777_v57 = vld [vmem:[%s3548_s19 + $0x24] sm:$0xf] }
  0x46   : > { %1521 = vrot.lane.b32.xlu0 %v2998_v24, %s3501_s27  ;;  %v2886_v24 = vld [vmem:[%s3548_s19 + $0x24] sm:$0xe]  ;;  %v604_v42 = vor.u32 %v603_v30, %v599_v29  ;;  %v2795_v30 = vld [vmem:[%s3548_s19 + $0x90] sm:$0xf] }
  0x47   : > { %v3030_v11 = vcombine.low %v2886_v24, %v3692_v14  ;;  %v1873_v41 = vsel %vm846_vm0, %v1871_v20, %v1872_v8  ;;  %v608_v43 = vrot.slane %v606_v26, 1  ;;  %v613_v14 = vshll.u32 %v3782_v32, 16  ;;  %v2793_v20 = vld [vmem:[%s3548_s19 + $0x84] sm:$0xf]  ;;  %v3826_v8 = vld [vmem:[%s3548_s19 + $0x88] sm:$0xf] }
  0x48   : > { %v3832_v24 = vld [vmem:[%s3548_s19 + $0x28] sm:$0xf]  ;;  %v2959_v25 = vcombine.low %v2793_v20, %v3826_v8 }
  0x49   : > { %1807 = vrot.lane.b32.xlu1 %v1706_v1, %s3502_s30  ;;  %v1874_v46 = vrot.slane %v3030_v11, 1  ;;  %v609_v55 = vsel %vm573_vm1, %v604_v42, %v608_v43  ;;  %v615_v34 = vrot.slane %v613_v14, 1  ;;  %v716_v1 = vrot.slane %v714_v52, 1  ;;  %v3381_v43 = vld [vmem:[%s3548_s19 + $0x8c] ss:$0 sps:$4 sm:$0x11]  }
  0x4a   : > { %1791 = vrot.lane.b32.xlu0 %v1610_v60, %s3502_s30  ;;  %v2951_v29 = vcombine.low %v2777_v57, %v3832_v24  ;;  %v857_v11 = vrot.slane %v3795_v9, 1  ;;  %v1210_v37 = vshll.u32 %v2959_v25, 16  ;;  %v3858_v14 = vld [vmem:[%s3548_s19 + $0x2c] ss:$0 sps:$4 sm:$0x11]   ;;  %v1208_v45 = vshrl.u32 %v2959_v25, 16 }
  0x4b   : > { %v1876_v60 = vsel %vm846_vm0, %v1874_v46, %v1875_v47  ;;  %v616_v6 = vor.u32 %v615_v34, %v611_v56  ;;  %v717_v39 = vsel %vm573_vm1, %v712_v59, %v716_v1  ;;  %v1215_v49 = vshll.u32 %v3381_v43, 16  ;;  %v3863_v52 = vld [vmem:[%s3548_s19 + $0x98] ss:$0 sps:$4 sm:$0x11]   ;;  %v2831_v56 = vld [vmem:[%s3548_s19 + $0x84] sm:$0xe] }
  0x4c   : > { %v858_v9 = vsel %vm846_vm0, %v856_v2, %v857_v11  ;;  %v1212_v46 = vrot.slane %v1210_v37, 1  ;;  %v1112_v47 = vshrl.u32 %v2951_v29, 16  ;;  %v1119_v53 = vshll.u32 %v3858_v14, 16  ;;  %v2857_v57 = vld [vmem:[%s3548_s19 + $0x90] sm:$0xf] }
  0x4d   : > { %1809 = vrot.lane.b32.xlu1 %v1718_v19, %s3502_s30  ;;  %v853_v19 = vrot.slane %v2935_v0, 1  ;;  %v621_v22 = vsel %vm573_vm1, %v616_v6, %v620_v7  ;;  %v1217_v36 = vrot.slane %v1215_v49, 1  ;;  %v1227_v1 = vshll.u32 %v3863_v52, 16  ;;  %v2859_v11 = vld [vmem:[%s3548_s19 + $0x9c] sm:$0xf] }
  0x4e   : > { %1793 = vrot.lane.b32.xlu0 %v1622_v21, %s3502_s30  ;;  %v881_v21 = vrot.slane %v3790_v40, 1  ;;  %v2960_v40 = vcombine.low %v2795_v30, %v3842_v15  ;;  %v1213_v34 = vor.u32 %v1212_v46, %v1208_v45  ;;  %v1121_v0 = vrot.slane %v1119_v53, 1  ;;  %v3896_v15 = vld [vmem:[%s3548_s19 + $0x34] sm:$0xf]  ;;  %v3913_v45 = vld [vmem:[%s3548_s19 + $0x40] sm:$0xf] }
  0x4f   : > { %v855_v26 = vsel %vm846_vm0, %v853_v19, %v854_v13  ;;  %v2991_v7 = vcombine.low %v2831_v56, %v3826_v8  ;;  %v2983_v63 = vcombine.low %v2823_v62, %v3832_v24  ;;  %v3887_v24 = vld [vmem:[%s3548_s19 + $0x94] sm:$0xf]  ;;  %v3916_v46 = vld [vmem:[%s3548_s19 + $0x98] ss:$0 sps:$4 sm:$0x11]  }
  0x50   : > { %v882_v5 = vsel %vm846_vm0, %v880_v10, %v881_v21  ;;  %v1222_v44 = vshll.u32 %v2960_v40, 16  ;;  %v1220_v4 = vshrl.u32 %v2960_v40, 16  ;;  %v1218_v13 = vsel %vm573_vm1, %v1213_v34, %v1217_v36  ;;  %v3922_v49 = vld [vmem:[%s3548_s19 + $0x38] ss:$0 sps:$4 sm:$0x11]  }
  0x51   : > { %1935 = vrot.lane.b32.xlu1 %v1897_v35, %s3503_s4  ;;  %v3848_v35 = vld [vmem:[%s3548_s19 + $0x34] sm:$0xf]  ;;  %v1389_v8 = vrot.slane %v2991_v7, 1  ;;  %v1390_v21 = vrot.slane %v3381_v43, 1  ;;  %v3007_v2 = vcombine.low %v2857_v57, %v3887_v24  ;;  %v1631_v62 = vshll.u32 %v3922_v49, 16 }
  0x52   : > { %1919 = vrot.lane.b32.xlu0 %v1873_v41, %s3503_s4  ;;  %v1114_v41 = vshll.u32 %v2951_v29, 16  ;;  %v2952_v42 = vcombine.low %v2779_v33, %v3848_v35  ;;  %v1224_v59 = vrot.slane %v1222_v44, 1  ;;  %v3901_v33 = vld [vmem:[%s3548_s19 + $0xa0] sm:$0xf] }
  0x53   : > { %v1391_v37 = vsel %vm846_vm0, %v1389_v8, %v1390_v21  ;;  %v1722_v44 = vshll.u32 %v3007_v2, 16  ;;  %v1720_v56 = vshrl.u32 %v3007_v2, 16  ;;  %v1633_v8 = vrot.slane %v1631_v62, 1 }
  0x54   : > { %v1116_v50 = vrot.slane %v1114_v41, 1  ;;  %v1124_v3 = vshrl.u32 %v2952_v42, 16  ;;  %v1225_v16 = vor.u32 %v1224_v59, %v1220_v4  ;;  %v1727_v4 = vshll.u32 %v3916_v46, 16  ;;  %v3933_v59 = vld [vmem:[%s3548_s19 + $0x44] ss:$0 sps:$4 sm:$0x11]  }
  0x55   : > { %786 = vrot.lane.b32.xlu1 %v705_v48, %s3498_s22  ;;  %v1126_v48 = vshll.u32 %v2952_v42, 16  ;;  %v1724_v34 = vrot.slane %v1722_v44, 1  ;;  %v2896_v44 = vld [vmem:[%s3548_s19 + $0x9c] sm:$0xe] }
  0x56   : > { %770 = vrot.lane.b32.xlu0 %v609_v55, %s3498_s22  ;;  %v3867_v55 = vld [vmem:[%s3548_s19 + $0x38] ss:$0 sps:$4 sm:$0x11]  }
  0x57   : > { %v1131_v6 = vshll.u32 %v3867_v55, 16  ;;  %v1369_v43 = vrot.slane %v3867_v55, 1  ;;  %v2895_v55 = vld [vmem:[%s3548_s19 + $0x90] sm:$0xe] }
  0x58   : > { %v3039_v7 = vcombine.low %v2895_v55, %v3887_v24  ;;  %v1878_v55 = vrot.slane %v3922_v49, 1 }
  0x59   : > { %1937 = vrot.lane.b32.xlu1 %v1900_v58, %s3503_s4  ;;  %v1117_v58 = vor.u32 %v1116_v50, %v1112_v47  ;;  %v1133_v20 = vrot.slane %v1131_v6, 1  ;;  %v3431_v6 = vld [vmem:[%s4826_s1 + $0x10] ss:$0 sps:$4 sm:$0x33]  }
  0x5a   : > { %1921 = vrot.lane.b32.xlu0 %v1876_v60, %s3503_s4  ;;  %v1128_v60 = vrot.slane %v1126_v48, 1  ;;  %3290 = vmatprep.subr.msk.bf16.mxu0 %vm2275_vm2, %v3431_v6 }
  0x5b   : > { %v1122_v17 = vsel %vm573_vm1, %v1117_v58, %v1121_v0  ;;  %v3930_v58 = vld [vmem:[%s3548_s19 + $0xa4] ss:$0 sps:$4 sm:$0x11]   ;;  %v269_v0 = vld [vmem:[%s3548_s19 + $0x90] sm:$0xf]  ;;  %3291 = vmatprep.subr.msk.bf16.mxu1 %vm2275_vm2, %v3431_v6 }
  0x5c   : > { %v1129_v19 = vor.u32 %v1128_v60, %v1124_v3  ;;  %v3939_v60 = vld [vmem:[%s3548_s19 + $0x94] sm:$0xf] }
  0x5d   : > { %788 = vrot.lane.b32.xlu1 %v717_v39, %s3498_s22  ;;  %v1229_v39 = vrot.slane %v1227_v1, 1  ;;  %v3954_v57 = vcombine.low %v269_v0, %v3939_v60 }
  0x5e   : > { %772 = vrot.lane.b32.xlu0 %v621_v22, %s3498_s22  ;;  %v2824_v22 = vld [vmem:[%s3548_s19 + $0x30] sm:$0xe]  ;;  %v1134_v30 = vsel %vm573_vm1, %v1129_v19, %v1133_v20  ;;  %v1739_v19 = vshll.u32 %v3930_v58, 16 }
  0x5f   : > { %v1230_v10 = vsel %vm573_vm1, %v1225_v16, %v1229_v39  ;;  %v3947_v16 = vld [vmem:[%s3548_s19 + $0x34] sm:$0xf]  ;;  %v1729_v39 = vrot.slane %v1727_v4, 1  ;;  %v2887_v20 = vld [vmem:[%s3548_s19 + $0x30] sm:$0xe]  ;;  %4833 = vst [vmem:[#allocation2_spill] sm:$0xff] %v3954_v57 }
  0x61   : > { %915 = vrot.lane.b32.xlu1 %v879_v27, %s3497_s21  ;;  %v1366_v27 = vrot.slane %v3858_v14, 1  ;;  %v2843_v14 = vld [vmem:[%s3548_s19 + $0x3c] sm:$0xf] }
  0x62   : > { %899 = vrot.lane.b32.xlu0 %v855_v26, %s3497_s21  ;;  %v2841_v26 = vld [vmem:[%s3548_s19 + $0x30] sm:$0xf]  ;;  %v3000_v53 = vcombine.low %v2843_v14, %v3913_v45  ;;  %v3978_v14 = vld [vmem:[%s3548_s19 + $0xa0] sm:$0xf] }
  0x64   : > { %v1638_v3 = vshll.u32 %v3000_v53, 16 }
  0x65   : > { %917 = vrot.lane.b32.xlu1 %v882_v5, %s3497_s21  ;;  %v2999_v5 = vcombine.low %v2841_v26, %v3896_v15  ;;  %v3963_v26 = vld [vmem:[%s3548_s19 + $0x98] ss:$0 sps:$4 sm:$0x11]  }
  0x66   : > { %901 = vrot.lane.b32.xlu0 %v858_v9, %s3497_s21  ;;  %v3008_v9 = vcombine.low %v2859_v11, %v3901_v33  ;;  %v1640_v24 = vrot.slane %v1638_v3, 1  ;;  %v1901_v11 = vrot.slane %v3039_v7, 1  ;;  %v726_v4 = vshll.u32 %v3963_v26, 16 }
  0x67   : > { %v1626_v48 = vshll.u32 %v2999_v5, 16  ;;  %v1624_v36 = vshrl.u32 %v2999_v5, 16  ;;  %v3040_v7 = vcombine.low %v2896_v44, %v3901_v33 }
  0x68   : > { %v1732_v12 = vshrl.u32 %v3008_v9, 16 }
  0x69   : > { %1027 = vrot.lane.b32.xlu1 %v2959_v25, %s3496_s20  ;;  %v1365_v25 = vrot.slane %v2983_v63, 1  ;;  %v1628_v1 = vrot.slane %v1626_v48, 1  ;;  %v1725_v63 = vor.u32 %v1724_v34, %v1720_v56  ;;  %v3983_v48 = vld [vmem:[%s3548_s19 + $0x40] sm:$0xf]  ;;  %v719_v56 = vshrl.u32 %v3954_v57, 16 }
  0x6a   : > { %1011 = vrot.lane.b32.xlu0 %v2951_v29, %s3496_s20  ;;  %v2984_v29 = vcombine.low %v2824_v22, %v3848_v35  ;;  %v1392_v35 = vrot.slane %v2992_v61, 1  ;;  %v1636_v61 = vshrl.u32 %v3000_v53, 16 }
  0x6b   : > { %v1367_v41 = vsel %vm846_vm0, %v1365_v25, %v1366_v27  ;;  %v1629_v22 = vor.u32 %v1628_v1, %v1624_v36  ;;  %v2277_v25 = vsel %vm2275_vm2, %v3431_v6, 0  ;;  %v3031_v27 = vcombine.low %v2887_v20, %v3896_v15 }
  0x6c   : > { %3251 = vmatpush3.bf16.msra.mxu0 %v2277_v25  ;;  %3289 = vmatpush3.bf16.msra.mxu1 %v2277_v25  ;;  %v721_v15 = vshll.u32 %v3954_v57, 16  ;;  %v1905_v25 = vrot.slane %v3930_v58, 1 }
  0x6d   : > { %1029 = vrot.lane.b32.xlu1 %v2960_v40, %s3496_s20  ;;  %v1393_v40 = vrot.slane %v3863_v52, 1  ;;  %v1734_v52 = vshll.u32 %v3008_v9, 16 }
  0x6e   : > { %1013 = vrot.lane.b32.xlu0 %v2952_v42, %s3496_s20  ;;  %v1368_v42 = vrot.slane %v2984_v29, 1  ;;  %v723_v34 = vrot.slane %v721_v15, 1  ;;  %v305_v15 = vld [vmem:[%s3548_s19 + $0x90] sm:$0xe] }
  0x6f   : > { %v1394_v47 = vsel %vm846_vm0, %v1392_v35, %v1393_v40  ;;  %v3970_v35 = vld [vmem:[%s3548_s19 + $0x38] ss:$0 sps:$4 sm:$0x11]   ;;  %v1634_v40 = vsel %vm573_vm1, %v1629_v22, %v1633_v8 }
  0x70   : > { %v1370_v50 = vsel %vm846_vm0, %v1368_v42, %v1369_v43  ;;  %v630_v36 = vshll.u32 %v3970_v35, 16 }
  0x71   : > { %1299 = vrot.lane.b32.xlu1 %v1218_v13, %s3499_s23  ;;  %v253_v13 = vld [vmem:[%s3548_s19 + $0x30] sm:$0xf] }
  0x72   : > { %1283 = vrot.lane.b32.xlu0 %v1122_v17, %s3499_s23  ;;  %v1736_v17 = vrot.slane %v1734_v52, 1  ;;  %v3958_v21 = vcombine.low %v253_v13, %v3947_v16  ;;  %v724_v13 = vor.u32 %v723_v34, %v719_v56 }
  0x74   : > { %4834 = vst [vmem:[#allocation3_spill] sm:$0xff] %v3958_v21  ;;  %v1737_v29 = vor.u32 %v1736_v17, %v1732_v12  ;;  %v625_v43 = vshll.u32 %v3958_v21, 16  ;;  %v623_v0 = vshrl.u32 %v3958_v21, 16  ;;  %v632_v17 = vrot.slane %v630_v36, 1 }
  0x75   : > { %1301 = vrot.lane.b32.xlu1 %v1230_v10, %s3499_s23  ;;  %v1643_v10 = vshll.u32 %v3933_v59, 16 }
  0x76   : > { %1285 = vrot.lane.b32.xlu0 %v1134_v30, %s3499_s23  ;;  %v1741_v30 = vrot.slane %v1739_v19, 1  ;;  %v627_v3 = vrot.slane %v625_v43, 1  ;;  %v4011_v19 = vld [vmem:[%s3548_s19 + $0xa4] ss:$0 sps:$4 sm:$0x11]  }
  0x77   : > { %v1645_v42 = vrot.slane %v1643_v10, 1  ;;  %v1904_v10 = vrot.slane %v3040_v7, 1  ;;  %v297_v43 = vld [vmem:[%s3548_s19 + $0x30] sm:$0xe] }
  0x78   : > { %v1742_v52 = vsel %vm573_vm1, %v1737_v29, %v1741_v30  ;;  %v628_v8 = vor.u32 %v627_v3, %v623_v0  ;;  %v1881_v29 = vrot.slane %v3933_v59, 1  ;;  %v2937_v34 = vcombine.low %v297_v43, %v3947_v16  ;;  %v2797_v3 = vld [vmem:[%s3548_s19 + $0x9c] sm:$0xf] }
  0x79   : > { %1427 = vrot.lane.b32.xlu1 %v1391_v37, %s3500_s24  ;;  %v1902_v37 = vrot.slane %v3916_v46, 1  ;;  %v2888_v46 = vld [vmem:[%s3548_s19 + $0x3c] sm:$0xe]  ;;  %v1906_v44 = vsel %vm846_vm0, %v1904_v10, %v1905_v25  ;;  %v884_v0 = vrot.slane %v3963_v26, 1  ;;  %v2799_v25 = vld [vmem:[%s3548_s19 + $0xa8] sm:$0xf] }
  0x7a   : > { %1411 = vrot.lane.b32.xlu0 %v1367_v41, %s3500_s24  ;;  %v1641_v41 = vor.u32 %v1640_v24, %v1636_v61 }
  0x7b   : > { %v1903_v12 = vsel %vm846_vm0, %v1901_v11, %v1902_v37  ;;  %v738_v37 = vshll.u32 %v4011_v19, 16 }
  0x7c   : > { %v1646_v62 = vsel %vm573_vm1, %v1641_v41, %v1645_v42 }
  0x7d   : > { %1429 = vrot.lane.b32.xlu1 %v1394_v47, %s3500_s24  ;;  %v255_v47 = vld [vmem:[%s3548_s19 + $0x3c] sm:$0xf] }
  0x7e   : > { %1413 = vrot.lane.b32.xlu0 %v1370_v50, %s3500_s24  ;;  %v4001_v49 = vcombine.low %v255_v47, %v3983_v48 }
  0x80   : > { %4836 = vst [vmem:[#allocation5_spill] sm:$0xff] %v4001_v49  ;;  %v637_v61 = vshll.u32 %v4001_v49, 16  ;;  %v635_v41 = vshrl.u32 %v4001_v49, 16 }
  0x81   : > { %1539 = vrot.lane.b32.xlu1 %v3007_v2, %s3501_s27  ;;  %v1730_v2 = vsel %vm573_vm1, %v1725_v63, %v1729_v39  ;;  %v3032_v63 = vcombine.low %v2888_v46, %v3913_v45  ;;  %v728_v39 = vrot.slane %v726_v4, 1  ;;  %v4018_v45 = vld [vmem:[%s3548_s19 + $0x44] ss:$0 sps:$4 sm:$0x11]   ;;  %v740_v46 = vrot.slane %v738_v37, 1 }
  0x82   : > { %1523 = vrot.lane.b32.xlu0 %v2999_v5, %s3501_s27  ;;  %v639_v42 = vrot.slane %v637_v61, 1  ;;  %v642_v58 = vshll.u32 %v4018_v45, 16  ;;  %v306_v4 = vld [vmem:[%s3548_s19 + $0x9c] sm:$0xe] }
  0x83   : > { %v729_v30 = vsel %vm573_vm1, %v724_v13, %v728_v39  ;;  %v859_v39 = vrot.slane %v2937_v34, 1 }
  0x84   : > { %v644_v56 = vrot.slane %v642_v58, 1 }
  0x85   : > { %1541 = vrot.lane.b32.xlu1 %v3008_v9, %s3501_s27  ;;  %v271_v9 = vld [vmem:[%s3548_s19 + $0x9c] sm:$0xf] }
  0x86   : > { %1525 = vrot.lane.b32.xlu0 %v3000_v53, %s3501_s27  ;;  %v1877_v53 = vrot.slane %v3031_v27, 1  ;;  %v3996_v1 = vcombine.low %v271_v9, %v3978_v14  ;;  %v1880_v27 = vrot.slane %v3032_v63, 1  ;;  %v2945_v9 = vcombine.low %v305_v15, %v3939_v60  ;;  %v298_v60 = vld [vmem:[%s3548_s19 + $0x3c] sm:$0xe]  ;;  %v2783_v15 = vld [vmem:[%s3548_s19 + $0x48] sm:$0xf] }
  0x87   : > { %v2946_v63 = vcombine.low %v306_v4, %v3978_v14  ;;  %v2938_v26 = vcombine.low %v298_v60, %v3983_v48 }
  0x88   : > { %4835 = vst [vmem:[#allocation4_spill] sm:$0xff] %v3996_v1  ;;  %v733_v20 = vshll.u32 %v3996_v1, 16  ;;  %v1879_v33 = vsel %vm846_vm0, %v1877_v53, %v1878_v55  ;;  %v1882_v53 = vsel %vm846_vm0, %v1880_v27, %v1881_v29  ;;  %v640_v55 = vor.u32 %v639_v42, %v635_v41  ;;  %v4077_v27 = vld [vmem:[%s3548_s19 + $0xac] sm:$0xf] }
  0x89   : > { %v3973_v5 = vpop.permute.xlu1 %1023  ;;  %1811 = vrot.lane.b32.xlu1 %v1730_v2, %s3502_s30  ;;  %v731_v2 = vshrl.u32 %v3996_v1, 16  ;;  %v886_v10 = vrot.slane %v2946_v63, 1  ;;  %v2962_v41 = vcombine.low %v2799_v25, %v4077_v27  ;;  %v4092_v42 = vld [vmem:[%s3548_s19 + $0xa4] ss:$0 sps:$4 sm:$0x11]  }
  0x8a   : > { %v3987_v50 = vpop.permute.xlu0 %1007  ;;  %1795 = vrot.lane.b32.xlu0 %v1634_v40, %s3502_s30  ;;  %v735_v11 = vrot.slane %v733_v20, 1  ;;  %v633_v40 = vsel %vm573_vm1, %v628_v8, %v632_v17  ;;  %v645_v13 = vsel %vm573_vm1, %v640_v55, %v644_v56  ;;  %v860_v17 = vrot.slane %v3970_v35, 1  ;;  %v2781_v20 = vld [vmem:[%s3548_s19 + $0x3c] sm:$0xf] }
  0x8b   : > { %v887_v35 = vrot.slane %v4011_v19, 1  ;;  %v1246_v55 = vshll.u32 %v2962_v41, 16  ;;  %v1239_v34 = vshll.u32 %v4092_v42, 16  ;;  %v4115_v63 = vld [vmem:[%s3548_s19 + $0x50] ss:$0 sps:$4 sm:$0x11]  }
  0x8c   : > { %v736_v47 = vor.u32 %v735_v11, %v731_v2  ;;  %v862_v2 = vrot.slane %v2938_v26, 1  ;;  %v863_v11 = vrot.slane %v4018_v45, 1  ;;  %v2833_v26 = vld [vmem:[%s3548_s19 + $0x9c] sm:$0xe] }
  0x8d   : > { %v4003_v6 = vpop.permute.xlu1 %911  ;;  %1813 = vrot.lane.b32.xlu1 %v1742_v52, %s3502_s30  ;;  %v888_v58 = vsel %vm846_vm0, %v886_v10, %v887_v35  ;;  %v1248_v10 = vrot.slane %v1246_v55, 1  ;;  %v2825_v25 = vld [vmem:[%s3548_s19 + $0x3c] sm:$0xe] }
  0x8e   : > { %1797 = vrot.lane.b32.xlu0 %v1646_v62, %s3502_s30  ;;  %v883_v62 = vrot.slane %v2945_v9, 1  ;;  %v741_v7 = vsel %vm573_vm1, %v736_v47, %v740_v46  ;;  %v4097_v9 = vld [vmem:[%s3548_s19 + $0x44] ss:$0 sps:$4 sm:$0x11]  }
  0x8f   : > { %v4014_v22 = vpop.permute.xlu0 %895 }
  0x90   : > { %v885_v61 = vsel %vm846_vm0, %v883_v62, %v884_v0  ;;  %v4109_v62 = vld [vmem:[%s3548_s19 + $0xb0] ss:$0 sps:$4 sm:$0x11]  }
  0x91   : > { %1939 = vrot.lane.b32.xlu1 %v1903_v12, %s3503_s4  ;;  %v4056_v12 = vld [vmem:[%s3548_s19 + $0xa0] sm:$0xf]  ;;  %v1251_v35 = vshll.u32 %v4109_v62, 16 }
  0x92   : > { %v4022_v24 = vpop.permute.xlu1 %913  ;;  %1923 = vrot.lane.b32.xlu0 %v1879_v33, %s3503_s4  ;;  %v4065_v33 = vld [vmem:[%s3548_s19 + $0x40] sm:$0xf]  ;;  %v2961_v14 = vcombine.low %v2797_v3, %v4056_v12 }
  0x93   : > { %v2953_v48 = vcombine.low %v2781_v20, %v4065_v33  ;;  %v1241_v20 = vrot.slane %v1239_v34, 1  ;;  %v1253_v34 = vrot.slane %v1251_v35, 1 }
  0x94   : > { %v4034_v59 = vpop.permute.xlu0 %897  ;;  %v1234_v19 = vshll.u32 %v2961_v14, 16 }
  0x95   : > { %790 = vrot.lane.b32.xlu1 %v729_v30, %s3498_s22  ;;  %v861_v30 = vsel %vm846_vm0, %v859_v39, %v860_v17  ;;  %v1138_v43 = vshll.u32 %v2953_v48, 16  ;;  %v1136_v4 = vshrl.u32 %v2953_v48, 16  ;;  %v1244_v17 = vshrl.u32 %v2962_v41, 16 }
  0x96   : > { %774 = vrot.lane.b32.xlu0 %v633_v40, %s3498_s22  ;;  %v4087_v40 = vld [vmem:[%s3548_s19 + $0x4c] sm:$0xf]  ;;  %v1236_v56 = vrot.slane %v1234_v19, 1 }
  0x97   : > { %v4041_v52 = vpop.permute.xlu1 %768  ;;  %v2954_v47 = vcombine.low %v2783_v15, %v4087_v40  ;;  %v1140_v60 = vrot.slane %v1138_v43, 1  ;;  %v1155_v15 = vshll.u32 %v4115_v63, 16  ;;  %v4131_v43 = vld [vmem:[%s3548_s19 + $0xac] sm:$0xf] }
  0x98   : > { %v4046_v36 = vpop.permute.xlu0 %766 }
  0x99   : > { %1941 = vrot.lane.b32.xlu1 %v1906_v44, %s3503_s4  ;;  %v864_v44 = vsel %vm846_vm0, %v862_v2, %v863_v11  ;;  %v1150_v3 = vshll.u32 %v2954_v47, 16  ;;  %v1148_v11 = vshrl.u32 %v2954_v47, 16 }
  0x9a   : > { %1925 = vrot.lane.b32.xlu0 %v1882_v53, %s3503_s4  ;;  %v1232_v53 = vshrl.u32 %v2961_v14, 16 }
  0x9b   : > { %v4058_v16 = vpop.permute.xlu1 %784 }
  0x9c   : > { %v4067_v8 = vpop.permute.xlu0 %782  ;;  %v1237_v39 = vor.u32 %v1236_v56, %v1232_v53  ;;  %v2834_v53 = vld [vmem:[%s3548_s19 + $0xa8] sm:$0xe]  ;;  %v1249_v56 = vor.u32 %v1248_v10, %v1244_v17  ;;  %v4157_v10 = vld [vmem:[%s3548_s19 + $0xb8] sm:$0xf] }
  0x9d   : > { %792 = vrot.lane.b32.xlu1 %v741_v7, %s3498_s22  ;;  %v1143_v7 = vshll.u32 %v4097_v9, 16  ;;  %v2994_v17 = vcombine.low %v2834_v53, %v4077_v27  ;;  %v4165_v27 = vld [vmem:[%s3548_s19 + $0x58] sm:$0xf] }
  0x9e   : > { %776 = vrot.lane.b32.xlu0 %v645_v13, %s3498_s22  ;;  %v1242_v55 = vsel %vm573_vm1, %v1237_v39, %v1241_v20  ;;  %v4150_v39 = vld [vmem:[%s3548_s19 + $0x4c] sm:$0xf]  ;;  %v1396_v20 = vrot.slane %v4092_v42, 1 }
  0x9f   : > { %v4079_v29 = vpop.permute.xlu1 %1025  ;;  %v1145_v2 = vrot.slane %v1143_v7, 1  ;;  %v1157_v7 = vrot.slane %v1155_v15, 1 }
  0xa0   : > { %v4083_v37 = vpop.permute.xlu0 %1009 }
  0xa1   : > { %919 = vrot.lane.b32.xlu1 %v885_v61, %s3497_s21  ;;  %v1141_v61 = vor.u32 %v1140_v60, %v1136_v4  ;;  %v2826_v4 = vld [vmem:[%s3548_s19 + $0x48] sm:$0xe] }
  0xa2   : > { %903 = vrot.lane.b32.xlu0 %v861_v30, %s3497_s21  ;;  %v2986_v35 = vcombine.low %v2826_v4, %v4087_v40  ;;  %v4175_v40 = vld [vmem:[%s3548_s19 + $0xb0] ss:$0 sps:$4 sm:$0x11]   ;;  %v1399_v4 = vrot.slane %v4109_v62, 1 }
  0xa3   : > { %v4099_v45 = vpop.permute.xlu1 %1295 }
  0xa4   : > { %v4103_v46 = vpop.permute.xlu0 %1279 }
  0xa5   : > { %921 = vrot.lane.b32.xlu1 %v888_v58, %s3497_s21  ;;  %v2861_v58 = vld [vmem:[%s3548_s19 + $0xa8] sm:$0xf] }
  0xa6   : > { %905 = vrot.lane.b32.xlu0 %v864_v44, %s3497_s21  ;;  %v2985_v44 = vcombine.low %v2825_v25, %v4065_v33  ;;  %v1254_v25 = vsel %vm573_vm1, %v1249_v56, %v1253_v34 }
  0xa7   : > { %v4111_v0 = vpop.permute.xlu1 %1297 }
  0xa8   : > { %v4117_v13 = vpop.permute.xlu0 %1281 }
  0xa9   : > { %1031 = vrot.lane.b32.xlu1 %v2961_v14, %s3496_s20  ;;  %v1152_v14 = vrot.slane %v1150_v3, 1  ;;  %v1146_v3 = vsel %vm573_vm1, %v1141_v61, %v1145_v2  ;;  %v2863_v61 = vld [vmem:[%s3548_s19 + $0xb4] sm:$0xf]  ;;  %v1371_v2 = vrot.slane %v2985_v44, 1 }
  0xaa   : > { %1015 = vrot.lane.b32.xlu0 %v2953_v48, %s3496_s20  ;;  %v2993_v48 = vcombine.low %v2833_v26, %v4056_v12  ;;  %v4180_v44 = vcombine.low %v2863_v61, %v4157_v10 }
  0xab   : > { %v4124_v30 = vpop.permute.xlu1 %1423  ;;  %v1153_v12 = vor.u32 %v1152_v14, %v1148_v11  ;;  %v1372_v11 = vrot.slane %v4097_v9, 1  ;;  %v2847_v14 = vld [vmem:[%s3548_s19 + $0x54] sm:$0xf] }
  0xac   : > { %v4127_v19 = vpop.permute.xlu0 %1407  ;;  %v1395_v26 = vrot.slane %v2993_v48, 1  ;;  %v4185_v56 = vcombine.low %v2847_v14, %v4165_v27  ;;  %v1758_v62 = vshll.u32 %v4180_v44, 16 }
  0xad   : > { %1033 = vrot.lane.b32.xlu1 %v2962_v41, %s3496_s20  ;;  %v4144_v41 = vcombine.low %v2861_v58, %v4131_v43  ;;  %v1158_v58 = vsel %vm573_vm1, %v1153_v12, %v1157_v7  ;;  %v1373_v34 = vsel %vm846_vm0, %v1371_v2, %v1372_v11  ;;  %v1375_v12 = vrot.slane %v4115_v63, 1  ;;  %v4200_v63 = vld [vmem:[%s3548_s19 + $0x50] ss:$0 sps:$4 sm:$0x11]  }
  0xae   : > { %1017 = vrot.lane.b32.xlu0 %v2954_v47, %s3496_s20  ;;  %v2845_v47 = vld [vmem:[%s3548_s19 + $0x48] sm:$0xf]  ;;  %v1397_v9 = vsel %vm846_vm0, %v1395_v26, %v1396_v20  ;;  %v1751_v20 = vshll.u32 %v4175_v40, 16  ;;  %v4208_v2 = vld [vmem:[%s3548_s19 + $0xbc] ss:$0 sps:$4 sm:$0x11]   ;;  %v1953_v11 = vsel %vm1951_vm3, %v3585_v23, %v4046_v36 }
  0xaf   : > { %v4140_v60 = vpop.permute.xlu1 %1425  ;;  %v1746_v42 = vshll.u32 %v4144_v41, 16  ;;  %v4172_v48 = vcombine.low %v2845_v47, %v4150_v39 }
  0xb0   : > { %v4146_v33 = vpop.permute.xlu0 %1409  ;;  %v1753_v1 = vrot.slane %v1751_v20, 1 }
  0xb1   : > { %1303 = vrot.lane.b32.xlu1 %v1242_v55, %s3499_s23  ;;  %v1398_v55 = vrot.slane %v2994_v17, 1  ;;  %v1650_v47 = vshll.u32 %v4172_v48, 16  ;;  %v1744_v17 = vshrl.u32 %v4144_v41, 16  ;;  %v1748_v26 = vrot.slane %v1746_v42, 1 }
  0xb2   : > { %1287 = vrot.lane.b32.xlu0 %v1146_v3, %s3499_s23  ;;  %v1374_v3 = vrot.slane %v2986_v35, 1  ;;  %v1969_v35 = vsel %vm1951_vm3, %v3580_v18, %v4067_v8  ;;  %v2897_v18 = vld [vmem:[%s3548_s19 + $0xa8] sm:$0xe]  ;;  %v4218_v8 = vld [vmem:[%s3548_s19 + $0x5c] ss:$0 sps:$4 sm:$0x11]  }
  0xb3   : > { %v4167_v15 = vpop.permute.xlu1 %1535  ;;  %v1400_v14 = vsel %vm846_vm0, %v1398_v55, %v1399_v4  ;;  %v1749_v49 = vor.u32 %v1748_v26, %v1744_v17  ;;  %v1648_v21 = vshrl.u32 %v4172_v48, 16  ;;  %v1652_v57 = vrot.slane %v1650_v47, 1 }
  0xb4   : > { %v4177_v53 = vpop.permute.xlu0 %1519  ;;  %v2002_v23 = vsel %vm1984_vm4, %v1969_v35, %v4003_v6  ;;  %v1756_v55 = vshrl.u32 %v4180_v44, 16  ;;  %v1760_v4 = vrot.slane %v1758_v62, 1  ;;  %v1660_v47 = vshrl.u32 %v4185_v56, 16 }
  0xb5   : > { %1305 = vrot.lane.b32.xlu1 %v1254_v25, %s3499_s23  ;;  %v1662_v25 = vshll.u32 %v4185_v56, 16  ;;  %v3041_v6 = vcombine.low %v2897_v18, %v4131_v43  ;;  %v1667_v20 = vshll.u32 %v4218_v8, 16  ;;  %v1754_v35 = vsel %vm573_vm1, %v1749_v49, %v1753_v1 }
  0xb6   : > { %1289 = vrot.lane.b32.xlu0 %v1158_v58, %s3499_s23  ;;  %v1376_v58 = vsel %vm846_vm0, %v1374_v3, %v1375_v12  ;;  %v1986_v3 = vsel %vm1984_vm4, %v1953_v11, %v4014_v22  ;;  %v1763_v12 = vshll.u32 %v4208_v2, 16  ;;  %v2035_v22 = vsel %vm2017_vm5, %v2002_v23, %v3973_v5  ;;  %v273_v11 = vld [vmem:[%s3548_s19 + $0xa8] sm:$0xf]  ;;  %v4252_v23 = vld [vmem:[%s3548_s19 + $0x4c] sm:$0xf] }
  0xb7   : > { %v4191_v7 = vpop.permute.xlu1 %1537  ;;  %v1664_v17 = vrot.slane %v1662_v25, 1  ;;  %v1653_v25 = vor.u32 %v1652_v57, %v1648_v21  ;;  %v2068_v43 = vsel %vm2050_vm6, %v2035_v22, %v4099_v45  ;;  %v257_v5 = vld [vmem:[%s3548_s19 + $0x48] sm:$0xf]  ;;  %v275_v22 = vld [vmem:[%s3548_s19 + $0xb4] sm:$0xf] }
  0xb8   : > { %v4196_v61 = vpop.permute.xlu0 %1521  ;;  %v2101_v57 = vsel %vm2083_vm7, %v2068_v43, %v4124_v30  ;;  %v1765_v21 = vrot.slane %v1763_v12, 1  ;;  %v1971_v30 = vsel %vm1951_vm3, %v3592_v31, %v4058_v16  ;;  %v1907_v31 = vrot.slane %v3041_v6, 1  ;;  %v4284_v16 = vld [vmem:[%s3548_s19 + $0xb0] ss:$0 sps:$4 sm:$0x11]  }
  0xb9   : > { %1431 = vrot.lane.b32.xlu1 %v1397_v9, %s3500_s24  ;;  %v2889_v9 = vld [vmem:[%s3548_s19 + $0x48] sm:$0xe]  ;;  %v1665_v49 = vor.u32 %v1664_v17, %v1660_v47  ;;  %v2134_v45 = vsel %vm2116_vm8, %v2101_v57, %v4167_v15  ;;  %v4276_v15 = vcombine.low %v257_v5, %v4252_v23  ;;  %v2004_v47 = vsel %vm1984_vm4, %v1971_v30, %v4022_v24 }
  0xba   : > { %1415 = vrot.lane.b32.xlu0 %v1373_v34, %s3500_s24  ;;  %v1655_v34 = vshll.u32 %v4200_v63, 16  ;;  %v3033_v26 = vcombine.low %v2889_v9, %v4150_v39  ;;  %v2019_v39 = vsel %vm2017_vm5, %v1986_v3, %v3987_v50  ;;  %v1761_v9 = vor.u32 %v1760_v4, %v1756_v55 }
  0xbb   : > { %v1808_v42 = vpop.permute.xlu1 %1807  ;;  %v2052_v1 = vsel %vm2050_vm6, %v2019_v39, %v4103_v46  ;;  %v1884_v17 = vrot.slane %v4200_v63, 1  ;;  %v750_v43 = vshll.u32 %v4284_v16, 16  ;;  %v259_v39 = vld [vmem:[%s3548_s19 + $0x54] sm:$0xf] }
  0xbc   : > { %v1792_v36 = vpop.permute.xlu0 %1791  ;;  %v1657_v18 = vrot.slane %v1655_v34, 1  ;;  %v2085_v50 = vsel %vm2083_vm7, %v2052_v1, %v4127_v19  ;;  %v1669_v34 = vrot.slane %v1667_v20, 1  ;;  %v2167_v19 = vsel %vm2149_vm9, %v2134_v45, %v1808_v42 }
  0xbd   : > { %1433 = vrot.lane.b32.xlu1 %v1400_v14, %s3500_s24  ;;  %v4242_v14 = vld [vmem:[%s3548_s19 + $0xac] sm:$0xf]  ;;  %v649_v20 = vshll.u32 %v4276_v15, 16 }
  0xbe   : > { %1417 = vrot.lane.b32.xlu0 %v1376_v58, %s3500_s24  ;;  %v4267_v46 = vcombine.low %v273_v11, %v4242_v14  ;;  %v1658_v42 = vsel %vm573_vm1, %v1653_v25, %v1657_v18  ;;  %v4313_v25 = vld [vmem:[%s3548_s19 + $0xb8] sm:$0xf] }
  0xbf   : > { %v4237_v62 = vpop.permute.xlu1 %1809  ;;  %v4325_v18 = vld [vmem:[%s3548_s19 + $0x58] sm:$0xf] }
  0xc0   : > { %v4248_v58 = vpop.permute.xlu0 %1793  ;;  %v745_v6 = vshll.u32 %v4267_v46, 16 }
  0xc1   : > { %1543 = vrot.lane.b32.xlu1 %v4144_v41, %s3501_s27  ;;  %v2118_v41 = vsel %vm2116_vm8, %v2085_v50, %v4177_v53  ;;  %v4342_v50 = vcombine.low %v275_v22, %v4313_v25 }
  0xc2   : > { %1527 = vrot.lane.b32.xlu0 %v4172_v48, %s3501_s27  ;;  %v1955_v48 = vsel %vm1951_vm3, %v3598_v38, %v4041_v52  ;;  %v2151_v4 = vsel %vm2149_vm9, %v2118_v41, %v1792_v36  ;;  %v1908_v38 = vrot.slane %v4175_v40, 1  ;;  %v1883_v52 = vrot.slane %v3033_v26, 1  ;;  %v4293_v36 = vld [vmem:[%s3548_s19 + $0x50] ss:$0 sps:$4 sm:$0x11]  }
  0xc3   : > { %v1936_v55 = vpop.permute.xlu1 %1935  ;;  %v2037_v40 = vsel %vm2017_vm5, %v2004_v47, %v4079_v29  ;;  %v1988_v26 = vsel %vm1984_vm4, %v1955_v48, %v4034_v59  ;;  %v743_v59 = vshrl.u32 %v4267_v46, 16  ;;  %v752_v48 = vrot.slane %v750_v43, 1  ;;  %v299_v43 = vld [vmem:[%s3548_s19 + $0x48] sm:$0xe] }
  0xc4   : > { %v1920_v3 = vpop.permute.xlu0 %1919  ;;  %v2200_v12 = vsel %vm2182_vm10, %v2167_v19, %v1936_v55  ;;  %v2021_v63 = vsel %vm2017_vm5, %v1988_v26, %v4083_v37  ;;  %v2070_v29 = vsel %vm2050_vm6, %v2037_v40, %v4111_v0  ;;  %v647_v37 = vshrl.u32 %v4276_v15, 16 }
  0xc5   : > { %1545 = vrot.lane.b32.xlu1 %v4180_v44, %s3501_s27  ;;  %v2184_v53 = vsel %vm2182_vm10, %v2151_v4, %v1920_v3  ;;  %3268 = vmatprep.mubr.msk.bf16.mxu1 %vm2242_vm11, %v2200_v12  ;;  %v1766_v44 = vsel %vm573_vm1, %v1761_v9, %v1765_v21  ;;  %v2054_v9 = vsel %vm2050_vm6, %v2021_v63, %v4117_v13  ;;  %v654_v0 = vshll.u32 %v4293_v36, 16  ;;  %v2898_v21 = vld [vmem:[%s3548_s19 + $0xb4] sm:$0xe]  ;;  %v4363_v4 = vld [vmem:[%s3548_s19 + $0xbc] ss:$0 sps:$4 sm:$0x11]  }
  0xc6   : > { %1529 = vrot.lane.b32.xlu0 %v4185_v56, %s3501_s27  ;;  %3252 = vmatprep.mubr.msk.bf16.mxu0 %vm2242_vm11, %v2184_v53  ;;  %v1670_v56 = vsel %vm573_vm1, %v1665_v49, %v1669_v34  ;;  %v2103_v5 = vsel %vm2083_vm7, %v2070_v29, %v4140_v60  ;;  %v2087_v1 = vsel %vm2083_vm7, %v2054_v9, %v4146_v33  ;;  %v2890_v49 = vld [vmem:[%s3548_s19 + $0x54] sm:$0xe]  ;;  %v747_v13 = vrot.slane %v745_v6, 1 }
  0xc7   : > { %v4307_v24 = vpop.permute.xlu1 %786  ;;  %v2136_v57 = vsel %vm2116_vm8, %v2103_v5, %v4191_v7  ;;  %v2120_v60 = vsel %vm2116_vm8, %v2087_v1, %v4196_v61  ;;  %v651_v33 = vrot.slane %v649_v20, 1  ;;  %v4349_v34 = vcombine.low %v259_v39, %v4325_v18 }
  0xc8   : > { %v4319_v11 = vpop.permute.xlu0 %770  ;;  %v2153_v7 = vsel %vm2149_vm9, %v2120_v60, %v4248_v58  ;;  %v3042_v19 = vcombine.low %v2898_v21, %v4157_v10  ;;  %v3034_v61 = vcombine.low %v2890_v49, %v4165_v27  ;;  %v748_v58 = vor.u32 %v747_v13, %v743_v59  ;;  %v308_v13 = vld [vmem:[%s3548_s19 + $0xb4] sm:$0xe] }
  0xc9   : > { %1815 = vrot.lane.b32.xlu1 %v1754_v35, %s3502_s30  ;;  %v2169_v35 = vsel %vm2149_vm9, %v2136_v57, %v4237_v62  ;;  %v1909_v62 = vsel %vm846_vm0, %v1907_v31, %v1908_v38  ;;  %v757_v10 = vshll.u32 %v4342_v50, 16  ;;  %v1885_v27 = vsel %vm846_vm0, %v1883_v52, %v1884_v17 }
  0xca   : > { %1799 = vrot.lane.b32.xlu0 %v1658_v42, %s3502_s30  ;;  %v652_v12 = vor.u32 %v651_v33, %v647_v37  ;;  %v656_v53 = vrot.slane %v654_v0, 1  ;;  %v4370_v42 = vld [vmem:[%s3548_s19 + $0x5c] ss:$0 sps:$4 sm:$0x11]   ;;  %v661_v47 = vshll.u32 %v4349_v34, 16  ;;  %v1910_v31 = vrot.slane %v3042_v19, 1 }
  0xcb   : > { %v1938_v45 = vpop.permute.xlu1 %1937  ;;  %v1911_v38 = vrot.slane %v4208_v2, 1  ;;  %v1886_v6 = vrot.slane %v3034_v61, 1  ;;  %v1887_v40 = vrot.slane %v4218_v8, 1  ;;  %v753_v52 = vsel %vm573_vm1, %v748_v58, %v752_v48  ;;  %v307_v8 = vld [vmem:[%s3548_s19 + $0xa8] sm:$0xe] }
  0xcc   : > { %v2202_v30 = vsel %vm2182_vm10, %v2169_v35, %v1938_v45  ;;  %v1922_v41 = vpop.permute.xlu0 %1921  ;;  %v755_v17 = vshrl.u32 %v4342_v50, 16  ;;  %v759_v26 = vrot.slane %v757_v10, 1  ;;  %v657_v22 = vsel %vm573_vm1, %v652_v12, %v656_v53  ;;  %v300_v35 = vld [vmem:[%s3548_s19 + $0x54] sm:$0xe] }
  0xcd   : > { %v2186_v55 = vsel %vm2182_vm10, %v2153_v7, %v1922_v41  ;;  %1817 = vrot.lane.b32.xlu1 %v1766_v44, %s3502_s30  ;;  %3269 = vmatmul.mubr.msk.bf16.vlgmr.msra.gmra.mrb[0].mxu1 %vm2242_vm11, %v2202_v30  ;;  %v659_v63 = vshrl.u32 %v4349_v34, 16  ;;  %v663_v29 = vrot.slane %v661_v47, 1  ;;  %v666_v2 = vshll.u32 %v4370_v42, 16  ;;  %v2785_v48 = vld [vmem:[%s3548_s19 + $0x54] sm:$0xf] }
  0xce   : > { %1801 = vrot.lane.b32.xlu0 %v1670_v56, %s3502_s30  ;;  %3253 = vmatmul.mubr.msk.bf16.vlgmr.msra.gmra.mrb[0].mxu0 %vm2242_vm11, %v2186_v55  ;;  %v762_v56 = vshll.u32 %v4363_v4, 16  ;;  %v1912_v39 = vsel %vm846_vm0, %v1910_v31, %v1911_v38  ;;  %v760_v9 = vor.u32 %v759_v26, %v755_v17  ;;  %v2947_v37 = vcombine.low %v307_v8, %v4242_v14  ;;  %v2801_v55 = vld [vmem:[%s3548_s19 + $0xb4] sm:$0xf]  ;;  %v2803_v38 = vld [vmem:[%s3548_s19 + $0xc0] sm:$0xf] }
  0xcf   : > { %v4366_v3 = vpop.permute.xlu1 %788  ;;  %v1888_v1 = vsel %vm846_vm0, %v1886_v6, %v1887_v40  ;;  %v664_v57 = vor.u32 %v663_v29, %v659_v63  ;;  %v668_v21 = vrot.slane %v666_v2, 1  ;;  %v2939_v49 = vcombine.low %v299_v43, %v4252_v23  ;;  %v4435_v6 = vld [vmem:[%s3548_s19 + $0xc4] sm:$0xf] }
  0xd0   : > { %v4373_v44 = vpop.permute.xlu0 %772  ;;  %v764_v5 = vrot.slane %v762_v56, 1  ;;  %v889_v45 = vrot.slane %v2947_v37, 1  ;;  %v890_v33 = vrot.slane %v4284_v16, 1  ;;  %v2948_v7 = vcombine.low %v308_v13, %v4313_v25  ;;  %v4421_v16 = vld [vmem:[%s3548_s19 + $0x58] sm:$0xf] }
  0xd1   : > { %1943 = vrot.lane.b32.xlu1 %v1909_v62, %s3503_s4  ;;  %v669_v23 = vsel %vm573_vm1, %v664_v57, %v668_v21  ;;  %v865_v41 = vrot.slane %v2939_v49, 1  ;;  %v866_v19 = vrot.slane %v4293_v36, 1  ;;  %v2940_v61 = vcombine.low %v300_v35, %v4325_v18  ;;  %v4415_v62 = vld [vmem:[%s3548_s19 + $0xb8] sm:$0xf]  ;;  %v4441_v17 = vld [vmem:[%s3548_s19 + $0x64] sm:$0xf] }
  0xd2   : > { %1927 = vrot.lane.b32.xlu0 %v1885_v27, %s3503_s4  ;;  %v765_v14 = vsel %vm573_vm1, %v760_v9, %v764_v5  ;;  %v891_v36 = vsel %vm846_vm0, %v889_v45, %v890_v33  ;;  %v892_v25 = vrot.slane %v2948_v7, 1  ;;  %v893_v18 = vrot.slane %v4363_v4, 1  ;;  %v4445_v4 = vld [vmem:[%s3548_s19 + $0xbc] ss:$0 sps:$4 sm:$0x11]  }
  0xd3   : > { %v4382_v20 = vpop.permute.xlu1 %915  ;;  %v2963_v10 = vcombine.low %v2801_v55, %v4415_v62  ;;  %v867_v12 = vsel %vm846_vm0, %v865_v41, %v866_v19  ;;  %v868_v53 = vrot.slane %v2940_v61, 1  ;;  %v869_v47 = vrot.slane %v4370_v42, 1  ;;  %v4469_v35 = vld [vmem:[%s3548_s19 + $0x68] ss:$0 sps:$4 sm:$0x11]  }
  0xd4   : > { %v4388_v59 = vpop.permute.xlu0 %899  ;;  %v2955_v31 = vcombine.low %v2785_v48, %v4421_v16  ;;  %v894_v26 = vsel %vm846_vm0, %v892_v25, %v893_v18  ;;  %v2964_v42 = vcombine.low %v2803_v38, %v4435_v6  ;;  %v1263_v9 = vshll.u32 %v4445_v4, 16 }
  0xd5   : > { %794 = vrot.lane.b32.xlu1 %v753_v52, %s3498_s22  ;;  %v2787_v52 = vld [vmem:[%s3548_s19 + $0x60] sm:$0xf]  ;;  %v1258_v56 = vshll.u32 %v2963_v10, 16  ;;  %v870_v29 = vsel %vm846_vm0, %v868_v53, %v869_v47  ;;  %v1179_v18 = vshll.u32 %v4469_v35, 16  ;;  %v2827_v53 = vld [vmem:[%s3548_s19 + $0x54] sm:$0xe] }
  0xd6   : > { %778 = vrot.lane.b32.xlu0 %v657_v22, %s3498_s22  ;;  %v4451_v22 = vld [vmem:[%s3548_s19 + $0x5c] ss:$0 sps:$4 sm:$0x11]   ;;  %v2956_v2 = vcombine.low %v2787_v52, %v4441_v17  ;;  %v1162_v8 = vshll.u32 %v2955_v31, 16  ;;  %v1270_v57 = vshll.u32 %v2964_v42, 16  ;;  %v1160_v49 = vshrl.u32 %v2955_v31, 16 }
  0xd7   : > { %v4395_v0 = vpop.permute.xlu1 %917  ;;  %v1260_v5 = vrot.slane %v1258_v56, 1  ;;  %v1167_v37 = vshll.u32 %v4451_v22, 16  ;;  %v1265_v33 = vrot.slane %v1263_v9, 1  ;;  %v1268_v7 = vshrl.u32 %v2964_v42, 16  ;;  %v2836_v9 = vld [vmem:[%s3548_s19 + $0xc0] sm:$0xe] }
  0xd8   : > { %v4400_v60 = vpop.permute.xlu0 %901  ;;  %v1164_v13 = vrot.slane %v1162_v8, 1  ;;  %v1272_v19 = vrot.slane %v1270_v57, 1  ;;  %v1181_v8 = vrot.slane %v1179_v18, 1 }
  0xd9   : > { %1945 = vrot.lane.b32.xlu1 %v1912_v39, %s3503_s4  ;;  %v1256_v39 = vshrl.u32 %v2963_v10, 16  ;;  %v1169_v41 = vrot.slane %v1167_v37, 1  ;;  %v4497_v37 = vld [vmem:[%s3548_s19 + $0xc4] sm:$0xf] }
  0xda   : > { %1929 = vrot.lane.b32.xlu0 %v1888_v1, %s3503_s4  ;;  %v4464_v1 = vld [vmem:[%s3548_s19 + $0xc8] ss:$0 sps:$4 sm:$0x11]   ;;  %v1165_v48 = vor.u32 %v1164_v13, %v1160_v49  ;;  %v2996_v13 = vcombine.low %v2836_v9, %v4435_v6 }
  0xdb   : > { %v4408_v30 = vpop.permute.xlu1 %1027  ;;  %v1275_v61 = vshll.u32 %v4464_v1, 16  ;;  %v1405_v18 = vrot.slane %v4464_v1, 1 }
  0xdc   : > { %v4417_v58 = vpop.permute.xlu0 %1011  ;;  %v1170_v56 = vsel %vm573_vm1, %v1165_v48, %v1169_v41  ;;  %v2867_v48 = vld [vmem:[%s3548_s19 + $0xcc] sm:$0xf] }
  0xdd   : > { %796 = vrot.lane.b32.xlu1 %v765_v14, %s3498_s22  ;;  %v1174_v14 = vshll.u32 %v2956_v2, 16  ;;  %v1277_v38 = vrot.slane %v1275_v61, 1 }
  0xde   : > { %780 = vrot.lane.b32.xlu0 %v669_v23, %s3498_s22  ;;  %v1261_v23 = vor.u32 %v1260_v5, %v1256_v39  ;;  %v2987_v39 = vcombine.low %v2827_v53, %v4421_v16  ;;  %v2865_v5 = vld [vmem:[%s3548_s19 + $0xc0] sm:$0xf]  ;;  %v1378_v16 = vrot.slane %v4451_v22, 1  ;;  %v4520_v22 = vld [vmem:[%s3548_s19 + $0xd0] sm:$0xf] }
  0xdf   : > { %v4428_v27 = vpop.permute.xlu1 %1029  ;;  %v1176_v25 = vrot.slane %v1174_v14, 1  ;;  %v2849_v14 = vld [vmem:[%s3548_s19 + $0x60] sm:$0xf] }
  0xe0   : > { %v4437_v40 = vpop.permute.xlu0 %1013  ;;  %v1266_v47 = vsel %vm573_vm1, %v1261_v23, %v1265_v33  ;;  %v4507_v33 = vld [vmem:[%s3548_s19 + $0x64] sm:$0xf]  ;;  %v1377_v41 = vrot.slane %v2987_v39, 1  ;;  %v4542_v39 = vld [vmem:[%s3548_s19 + $0x68] ss:$0 sps:$4 sm:$0x11]  }
  0xe1   : > { %923 = vrot.lane.b32.xlu1 %v891_v36, %s3497_s21  ;;  %v1172_v36 = vshrl.u32 %v2956_v2, 16  ;;  %v3003_v6 = vcombine.low %v2849_v14, %v4507_v33  ;;  %v1679_v14 = vshll.u32 %v4542_v39, 16 }
  0xe2   : > { %907 = vrot.lane.b32.xlu0 %v867_v12, %s3497_s21  ;;  %v2835_v12 = vld [vmem:[%s3548_s19 + $0xb4] sm:$0xe]  ;;  %v1379_v53 = vsel %vm846_vm0, %v1377_v41, %v1378_v16  ;;  %v1973_v41 = vsel %vm1951_vm3, %v3736_v51, %v4307_v24 }
  0xe3   : > { %v4453_v63 = vpop.permute.xlu1 %1299  ;;  %v2995_v52 = vcombine.low %v2835_v12, %v4415_v62  ;;  %v1402_v62 = vrot.slane %v4445_v4, 1  ;;  %v1674_v9 = vshll.u32 %v3003_v6, 16 }
  0xe4   : > { %v4457_v43 = vpop.permute.xlu0 %1283 }
  0xe5   : > { %925 = vrot.lane.b32.xlu1 %v894_v26, %s3497_s21  ;;  %v1401_v49 = vrot.slane %v2995_v52, 1 }
  0xe6   : > { %909 = vrot.lane.b32.xlu0 %v870_v29, %s3497_s21  ;;  %v1177_v29 = vor.u32 %v1176_v25, %v1172_v36  ;;  %v4523_v36 = vld [vmem:[%s3548_s19 + $0xc8] ss:$0 sps:$4 sm:$0x11]   ;;  %v1404_v25 = vrot.slane %v2996_v13, 1 }
  0xe7   : > { %v4466_v21 = vpop.permute.xlu1 %1301  ;;  %v1775_v1 = vshll.u32 %v4523_v36, 16 }
  0xe8   : > { %v4471_v45 = vpop.permute.xlu0 %1285  ;;  %v1182_v23 = vsel %vm573_vm1, %v1177_v29, %v1181_v8  ;;  %v4536_v29 = vcombine.low %v2867_v48, %v4520_v22  ;;  %v4539_v8 = vld [vmem:[%s3548_s19 + $0x70] sm:$0xf]  ;;  %v1672_v48 = vshrl.u32 %v3003_v6, 16 }
  0xe9   : > { %1035 = vrot.lane.b32.xlu1 %v2963_v10, %s3496_s20 }
  0xea   : > { %1019 = vrot.lane.b32.xlu0 %v2955_v31, %s3496_s20  ;;  %v1273_v31 = vor.u32 %v1272_v19, %v1268_v7  ;;  %v3011_v19 = vcombine.low %v2865_v5, %v4497_v37 }
  0xeb   : > { %v4476_v55 = vpop.permute.xlu1 %1427 }
  0xec   : > { %v4480_v10 = vpop.permute.xlu0 %1411  ;;  %v1278_v57 = vsel %vm573_vm1, %v1273_v31, %v1277_v38  ;;  %v1381_v31 = vrot.slane %v4469_v35, 1  ;;  %v2851_v38 = vld [vmem:[%s3548_s19 + $0x6c] sm:$0xf]  ;;  %v1770_v52 = vshll.u32 %v3011_v19, 16  ;;  %v1406_v35 = vsel %vm846_vm0, %v1404_v25, %v1405_v18 }
  0xed   : > { %1037 = vrot.lane.b32.xlu1 %v2964_v42, %s3496_s20  ;;  %v1957_v25 = vsel %vm1951_vm3, %v3739_v54, %v4319_v11  ;;  %v2006_v18 = vsel %vm1984_vm4, %v1973_v41, %v4382_v20 }
  0xee   : > { %1021 = vrot.lane.b32.xlu0 %v2956_v2, %s3496_s20  ;;  %v2828_v2 = vld [vmem:[%s3548_s19 + $0x60] sm:$0xe]  ;;  %v1772_v16 = vrot.slane %v1770_v52, 1  ;;  %v1990_v51 = vsel %vm1984_vm4, %v1957_v25, %v4388_v59  ;;  %v2039_v24 = vsel %vm2017_vm5, %v2006_v18, %v4408_v30 }
  0xef   : > { %v4487_v26 = vpop.permute.xlu1 %1429  ;;  %v2988_v4 = vcombine.low %v2828_v2, %v4441_v17  ;;  %v1403_v17 = vsel %vm846_vm0, %v1401_v49, %v1402_v62  ;;  %v4549_v2 = vld [vmem:[%s3548_s19 + $0xd4] ss:$0 sps:$4 sm:$0x11]   ;;  %v1768_v49 = vshrl.u32 %v3011_v19, 16  ;;  %v2023_v20 = vsel %vm2017_vm5, %v1990_v51, %v4417_v58  ;;  %v2899_v58 = vld [vmem:[%s3548_s19 + $0xc0] sm:$0xe] }
  0xf0   : > { %v4492_v42 = vpop.permute.xlu0 %1413  ;;  %v2072_v52 = vsel %vm2050_vm6, %v2039_v24, %v4453_v63  ;;  %v2056_v59 = vsel %vm2050_vm6, %v2023_v20, %v4457_v43  ;;  %v2892_v24 = vld [vmem:[%s3548_s19 + $0x6c] sm:$0xe] }
  0xf1   : > { %1307 = vrot.lane.b32.xlu1 %v1266_v47, %s3499_s23  ;;  %v1380_v47 = vrot.slane %v2988_v4, 1  ;;  %v1777_v4 = vrot.slane %v1775_v1, 1  ;;  %v1773_v54 = vor.u32 %v1772_v16, %v1768_v49  ;;  %v2105_v30 = vsel %vm2083_vm7, %v2072_v52, %v4476_v55 }
  0xf2   : > { %1291 = vrot.lane.b32.xlu0 %v1170_v56, %s3499_s23  ;;  %v2089_v63 = vsel %vm2083_vm7, %v2056_v59, %v4480_v10 }
  0xf3   : > { %v4509_v7 = vpop.permute.xlu1 %1539  ;;  %v1382_v62 = vsel %vm846_vm0, %v1380_v47, %v1381_v31  ;;  %v1787_v47 = vshll.u32 %v4549_v2, 16  ;;  %v4570_v31 = vld [vmem:[%s3548_s19 + $0x74] ss:$0 sps:$4 sm:$0x11]   ;;  %v1778_v41 = vsel %vm573_vm1, %v1773_v54, %v1777_v4  ;;  %v1959_v4 = vsel %vm1951_vm3, %v3782_v32, %v4373_v44 }
  0xf4   : > { %v4514_v61 = vpop.permute.xlu0 %1523  ;;  %v2138_v16 = vsel %vm2116_vm8, %v2105_v30, %v4509_v7  ;;  %v1691_v43 = vshll.u32 %v4570_v31, 16 }
  0xf5   : > { %1309 = vrot.lane.b32.xlu1 %v1278_v57, %s3499_s23  ;;  %v4553_v57 = vcombine.low %v2851_v38, %v4539_v8  ;;  %v2122_v55 = vsel %vm2116_vm8, %v2089_v63, %v4514_v61  ;;  %v1975_v61 = vsel %vm1951_vm3, %v3777_v28, %v4366_v3  ;;  %v1992_v3 = vsel %vm1984_vm4, %v1959_v4, %v4400_v60 }
  0xf6   : > { %1293 = vrot.lane.b32.xlu0 %v1182_v23, %s3499_s23  ;;  %v1782_v23 = vshll.u32 %v4536_v29, 16  ;;  %v1693_v44 = vrot.slane %v1691_v43, 1  ;;  %v1914_v60 = vrot.slane %v4523_v36, 1 }
  0xf7   : > { %v4528_v12 = vpop.permute.xlu1 %1541  ;;  %v1686_v11 = vshll.u32 %v4553_v57, 16  ;;  %v1684_v49 = vshrl.u32 %v4553_v57, 16 }
  0xf8   : > { %v4533_v56 = vpop.permute.xlu0 %1525 }
  0xf9   : > { %1435 = vrot.lane.b32.xlu1 %v1403_v17, %s3500_s24  ;;  %v1676_v17 = vrot.slane %v1674_v9, 1  ;;  %v1681_v9 = vrot.slane %v1679_v14, 1  ;;  %v1789_v14 = vrot.slane %v1787_v47, 1  ;;  %v2900_v47 = vld [vmem:[%s3548_s19 + $0xcc] sm:$0xe] }
  0xfa   : > { %1419 = vrot.lane.b32.xlu0 %v1379_v53, %s3500_s24  ;;  %v1780_v53 = vshrl.u32 %v4536_v29, 16  ;;  %v3044_v52 = vcombine.low %v2900_v47, %v4520_v22 }
  0xfb   : > { %v1812_v5 = vpop.permute.xlu1 %1811 }
  0xfc   : > { %v1796_v13 = vpop.permute.xlu0 %1795 }
  0xfd   : > { %1437 = vrot.lane.b32.xlu1 %v1406_v35, %s3500_s24  ;;  %v1784_v35 = vrot.slane %v1782_v23, 1  ;;  %v2155_v10 = vsel %vm2149_vm9, %v2122_v55, %v1796_v13 }
  0xfe   : > { %1421 = vrot.lane.b32.xlu0 %v1382_v62, %s3500_s24  ;;  %v1677_v62 = vor.u32 %v1676_v17, %v1672_v48  ;;  %v1688_v48 = vrot.slane %v1686_v11, 1  ;;  %v2891_v17 = vld [vmem:[%s3548_s19 + $0x60] sm:$0xe] }
  0xff   : > { %v4576_v38 = vpop.permute.xlu1 %1813  ;;  %v1785_v18 = vor.u32 %v1784_v35, %v1780_v53  ;;  %v3035_v28 = vcombine.low %v2891_v17, %v4507_v33  ;;  %v3036_v35 = vcombine.low %v2892_v24, %v4539_v8  ;;  %v1917_v8 = vrot.slane %v4549_v2, 1 }
 0x100   : > { %v4583_v1 = vpop.permute.xlu0 %1797  ;;  %v1682_v13 = vsel %vm573_vm1, %v1677_v62, %v1681_v9  ;;  %v1689_v32 = vor.u32 %v1688_v48, %v1684_v49  ;;  %v1893_v49 = vrot.slane %v4570_v31, 1 }
 0x101   : > { %1547 = vrot.lane.b32.xlu1 %v3011_v19, %s3501_s27  ;;  %v2171_v19 = vsel %vm2149_vm9, %v2138_v16, %v1812_v5  ;;  %v1790_v33 = vsel %vm573_vm1, %v1785_v18, %v1789_v14  ;;  %v1889_v36 = vrot.slane %v3035_v28, 1  ;;  %v1892_v62 = vrot.slane %v3036_v35, 1 }
 0x102   : > { %1531 = vrot.lane.b32.xlu0 %v3003_v6, %s3501_s27  ;;  %v3043_v6 = vcombine.low %v2899_v58, %v4497_v37  ;;  %v2008_v37 = vsel %vm1984_vm4, %v1975_v61, %v4395_v0  ;;  %v2025_v0 = vsel %vm2017_vm5, %v1992_v3, %v4437_v40  ;;  %v1890_v40 = vrot.slane %v4542_v39, 1 }
 0x103   : > { %v1940_v23 = vpop.permute.xlu1 %1939  ;;  %v1694_v39 = vsel %vm573_vm1, %v1689_v32, %v1693_v44  ;;  %v1894_v14 = vsel %vm846_vm0, %v1892_v62, %v1893_v49  ;;  %v4838_v44 = vld [vmem:[#allocation3_spill] sm:$0xff] }
 0x104   : > { %v2204_v25 = vsel %vm2182_vm10, %v2171_v19, %v1940_v23  ;;  %v1924_v7 = vpop.permute.xlu0 %1923  ;;  %v1913_v11 = vrot.slane %v3043_v6, 1 }
 0x105   : > { %v2188_v5 = vsel %vm2182_vm10, %v2155_v10, %v1924_v7  ;;  %1549 = vrot.lane.b32.xlu1 %v4536_v29, %s3501_s27  ;;  %3272 = vmatprep.mubr.msk.bf16.mxu1 %vm2242_vm11, %v2204_v25  ;;  %v2041_v29 = vsel %vm2017_vm5, %v2008_v37, %v4428_v27  ;;  %v2058_v27 = vsel %vm2050_vm6, %v2025_v0, %v4471_v45 }
 0x106   : > { %1533 = vrot.lane.b32.xlu0 %v4553_v57, %s3501_s27  ;;  %3256 = vmatprep.mubr.msk.bf16.mxu0 %vm2242_vm11, %v2188_v5  ;;  %v2074_v57 = vsel %vm2050_vm6, %v2041_v29, %v4466_v21  ;;  %v2091_v21 = vsel %vm2083_vm7, %v2058_v27, %v4492_v42  ;;  %v1915_v22 = vsel %vm846_vm0, %v1913_v11, %v1914_v60  ;;  %v4837_v29 = vld [vmem:[#allocation2_spill] sm:$0xff] }
 0x107   : > { %v4627_v53 = vpop.permute.xlu1 %790  ;;  %v2107_v54 = vsel %vm2083_vm7, %v2074_v57, %v4487_v26  ;;  %v2124_v45 = vsel %vm2116_vm8, %v2091_v21, %v4533_v56  ;;  %v1916_v56 = vrot.slane %v3044_v52, 1 }
 0x108   : > { %v4634_v51 = vpop.permute.xlu0 %774  ;;  %v2140_v20 = vsel %vm2116_vm8, %v2107_v54, %v4528_v12  ;;  %v2157_v42 = vsel %vm2149_vm9, %v2124_v45, %v4583_v1  ;;  %v1891_v1 = vsel %vm846_vm0, %v1889_v36, %v1890_v40  ;;  %v1977_v32 = vsel %vm1951_vm3, %v4837_v29, %v4627_v53 }
 0x109   : > { %1819 = vrot.lane.b32.xlu1 %v1778_v41, %s3502_s30  ;;  %v2173_v26 = vsel %vm2149_vm9, %v2140_v20, %v4576_v38  ;;  %v1918_v63 = vsel %vm846_vm0, %v1916_v56, %v1917_v8  ;;  %v1961_v47 = vsel %vm1951_vm3, %v4838_v44, %v4634_v51 }
 0x10a   : > { %1803 = vrot.lane.b32.xlu0 %v1682_v13, %s3502_s30 }
 0x10b   : > { %v1942_v9 = vpop.permute.xlu1 %1941 }
 0x10c   : > { %v2206_v12 = vsel %vm2182_vm10, %v2173_v26, %v1942_v9  ;;  %v1926_v59 = vpop.permute.xlu0 %1925  ;;  %v4839_v9 = vld [vmem:[#allocation4_spill] sm:$0xff] }
 0x10d   : > { %v2190_v30 = vsel %vm2182_vm10, %v2157_v42, %v1926_v59  ;;  %1821 = vrot.lane.b32.xlu1 %v1790_v33, %s3502_s30  ;;  %3273 = vmatmul.mubr.msk.bf16.gmra.mrb[4].mxu1 %vm2242_vm11, %v2206_v12  ;;  %v4840_v42 = vld [vmem:[#allocation5_spill] sm:$0xff] }
 0x10e   : > { %1805 = vrot.lane.b32.xlu0 %v1694_v39, %s3502_s30  ;;  %3257 = vmatmul.mubr.msk.bf16.gmra.mrb[4].mxu0 %vm2242_vm11, %v2190_v30 }
 0x10f   : > { %v793_v38 = vpop.permute.xlu1 %792 }
 0x110   : > { %v777_v58 = vpop.permute.xlu0 %776  ;;  %v1979_v39 = vsel %vm1951_vm3, %v4839_v9, %v793_v38 }
 0x111   : > { %1947 = vrot.lane.b32.xlu1 %v1915_v22, %s3503_s4  ;;  %v1963_v12 = vsel %vm1951_vm3, %v4840_v42, %v777_v58 }
 0x112   : > { %1931 = vrot.lane.b32.xlu0 %v1891_v1, %s3503_s4 }
 0x113   : > { %v920_v16 = vpop.permute.xlu1 %919 }
 0x114   : > { %v904_v43 = vpop.permute.xlu0 %903  ;;  %v2010_v0 = vsel %vm1984_vm4, %v1977_v32, %v920_v16 }
 0x115   : > { %1949 = vrot.lane.b32.xlu1 %v1918_v63, %s3503_s4  ;;  %v1994_v57 = vsel %vm1984_vm4, %v1961_v47, %v904_v43 }
 0x116   : > { %1933 = vrot.lane.b32.xlu0 %v1894_v14, %s3503_s4 }
 0x117   : > { %v922_v2 = vpop.permute.xlu1 %921 }
 0x118   : > { %v906_v55 = vpop.permute.xlu0 %905  ;;  %v2012_v59 = vsel %vm1984_vm4, %v1979_v39, %v922_v2 }
 0x119   : > { %v1996_v30 = vsel %vm1984_vm4, %v1963_v12, %v906_v55 }
 0x11b   : > { %v1032_v19 = vpop.permute.xlu1 %1031 }
 0x11c   : > { %v1016_v23 = vpop.permute.xlu0 %1015  ;;  %v2043_v33 = vsel %vm2017_vm5, %v2010_v0, %v1032_v19 }
 0x11d   : > { %v2027_v24 = vsel %vm2017_vm5, %v1994_v57, %v1016_v23 }
 0x11f   : > { %v1034_v31 = vpop.permute.xlu1 %1033 }
 0x120   : > { %v1018_v41 = vpop.permute.xlu0 %1017  ;;  %v2045_v22 = vsel %vm2017_vm5, %v2012_v59, %v1034_v31 }
 0x121   : > { %v2029_v8 = vsel %vm2017_vm5, %v1996_v30, %v1018_v41 }
 0x123   : > { %v1304_v48 = vpop.permute.xlu1 %1303 }
 0x124   : > { %v1288_v17 = vpop.permute.xlu0 %1287  ;;  %v2076_v27 = vsel %vm2050_vm6, %v2043_v33, %v1304_v48 }
 0x125   : > { %v2060_v11 = vsel %vm2050_vm6, %v2027_v24, %v1288_v17 }
 0x127   : > { %v1306_v10 = vpop.permute.xlu1 %1305 }
 0x128   : > { %v1290_v25 = vpop.permute.xlu0 %1289  ;;  %v2078_v38 = vsel %vm2050_vm6, %v2045_v22, %v1306_v10 }
 0x129   : > { %v2062_v62 = vsel %vm2050_vm6, %v2029_v8, %v1290_v25 }
 0x12b   : > { %v1432_v7 = vpop.permute.xlu1 %1431 }
 0x12c   : > { %v1416_v18 = vpop.permute.xlu0 %1415  ;;  %v2109_v53 = vsel %vm2083_vm7, %v2076_v27, %v1432_v7 }
 0x12d   : > { %v2093_v40 = vsel %vm2083_vm7, %v2060_v11, %v1416_v18 }
 0x12f   : > { %v1434_v6 = vpop.permute.xlu1 %1433 }
 0x130   : > { %v1418_v61 = vpop.permute.xlu0 %1417  ;;  %v2111_v49 = vsel %vm2083_vm7, %v2078_v38, %v1434_v6 }
 0x131   : > { %v2095_v58 = vsel %vm2083_vm7, %v2062_v62, %v1418_v61 }
 0x133   : > { %v1544_v5 = vpop.permute.xlu1 %1543 }
 0x134   : > { %v1528_v13 = vpop.permute.xlu0 %1527  ;;  %v2142_v51 = vsel %vm2116_vm8, %v2109_v53, %v1544_v5 }
 0x135   : > { %v2126_v21 = vsel %vm2116_vm8, %v2093_v40, %v1528_v13 }
 0x137   : > { %v1546_v4 = vpop.permute.xlu1 %1545 }
 0x138   : > { %v1530_v37 = vpop.permute.xlu0 %1529  ;;  %v2144_v63 = vsel %vm2116_vm8, %v2111_v49, %v1546_v4 }
 0x139   : > { %v2128_v16 = vsel %vm2116_vm8, %v2095_v58, %v1530_v37 }
 0x13b   : > { %v1816_v28 = vpop.permute.xlu1 %1815 }
 0x13c   : > { %v1800_v3 = vpop.permute.xlu0 %1799  ;;  %v2175_v20 = vsel %vm2149_vm9, %v2142_v51, %v1816_v28 }
 0x13d   : > { %v2159_v52 = vsel %vm2149_vm9, %v2126_v21, %v1800_v3 }
 0x13f   : > { %v1818_v60 = vpop.permute.xlu1 %1817 }
 0x140   : > { %v1802_v54 = vpop.permute.xlu0 %1801  ;;  %v2177_v14 = vsel %vm2149_vm9, %v2144_v63, %v1818_v60 }
 0x141   : > { %v2161_v2 = vsel %vm2149_vm9, %v2128_v16, %v1802_v54 }
 0x143   : > { %v1944_v36 = vpop.permute.xlu1 %1943 }
 0x144   : > { %v2208_v45 = vsel %vm2182_vm10, %v2175_v20, %v1944_v36  ;;  %v1928_v26 = vpop.permute.xlu0 %1927 }
 0x145   : > { %v2192_v35 = vsel %vm2182_vm10, %v2159_v52, %v1928_v26  ;;  %3276 = vmatprep.mubr.msk.bf16.mxu1 %vm2242_vm11, %v2208_v45 }
 0x146   : > { %3260 = vmatprep.mubr.msk.bf16.mxu0 %vm2242_vm11, %v2192_v35 }
 0x147   : > { %v795_v56 = vpop.permute.xlu1 %794 }
 0x148   : > { %v779_v1 = vpop.permute.xlu0 %778  ;;  %v1981_v24 = vsel %vm1951_vm3, %v4267_v46, %v795_v56 }
 0x149   : > { %v1965_v27 = vsel %vm1951_vm3, %v4276_v15, %v779_v1 }
 0x14b   : > { %v1946_v43 = vpop.permute.xlu1 %1945 }
 0x14c   : > { %v2210_v55 = vsel %vm2182_vm10, %v2177_v14, %v1946_v43  ;;  %v1930_v19 = vpop.permute.xlu0 %1929 }
 0x14d   : > { %v2194_v23 = vsel %vm2182_vm10, %v2161_v2, %v1930_v19  ;;  %3277 = vmatmul.mubr.msk.bf16.gmra.mrb[8].mxu1 %vm2242_vm11, %v2210_v55  ;;  %v4760_v19 = vld [vmem:[%s4827_s2] ss:$0 sm:$0xff] }
 0x14e   : > { %3261 = vmatmul.mubr.msk.bf16.gmra.mrb[8].mxu0 %vm2242_vm11, %v2194_v23 }
 0x14f   : > { %v797_v31 = vpop.permute.xlu1 %796 }
 0x150   : > { %v781_v41 = vpop.permute.xlu0 %780  ;;  %v1983_v36 = vsel %vm1951_vm3, %v4342_v50, %v797_v31 }
 0x151   : > { %v1967_v15 = vsel %vm1951_vm3, %v4349_v34, %v781_v41 }
 0x153   : > { %v924_v48 = vpop.permute.xlu1 %923 }
 0x154   : > { %v908_v17 = vpop.permute.xlu0 %907  ;;  %v2014_v54 = vsel %vm1984_vm4, %v1981_v24, %v924_v48 }
 0x155   : > { %v1998_v11 = vsel %vm1984_vm4, %v1965_v27, %v908_v17 }
 0x157   : > { %v926_v10 = vpop.permute.xlu1 %925 }
 0x158   : > { %v910_v25 = vpop.permute.xlu0 %909  ;;  %v2016_v45 = vsel %vm1984_vm4, %v1983_v36, %v926_v10 }
 0x159   : > { %v2000_v39 = vsel %vm1984_vm4, %v1967_v15, %v910_v25 }
 0x15b   : > { %v1036_v7 = vpop.permute.xlu1 %1035 }
 0x15c   : > { %v1020_v18 = vpop.permute.xlu0 %1019  ;;  %v2047_v53 = vsel %vm2017_vm5, %v2014_v54, %v1036_v7 }
 0x15d   : > { %v2031_v51 = vsel %vm2017_vm5, %v1998_v11, %v1020_v18 }
 0x15f   : > { %v1038_v6 = vpop.permute.xlu1 %1037 }
 0x160   : > { %v1022_v61 = vpop.permute.xlu0 %1021  ;;  %v2049_v35 = vsel %vm2017_vm5, %v2016_v45, %v1038_v6 }
 0x161   : > { %v2033_v59 = vsel %vm2017_vm5, %v2000_v39, %v1022_v61 }
 0x163   : > { %v1308_v5 = vpop.permute.xlu1 %1307 }
 0x164   : > { %v1292_v13 = vpop.permute.xlu0 %1291  ;;  %v2080_v21 = vsel %vm2050_vm6, %v2047_v53, %v1308_v5 }
 0x165   : > { %v2064_v46 = vsel %vm2050_vm6, %v2031_v51, %v1292_v13 }
 0x167   : > { %v1310_v4 = vpop.permute.xlu1 %1309 }
 0x168   : > { %v1294_v37 = vpop.permute.xlu0 %1293  ;;  %v2082_v30 = vsel %vm2050_vm6, %v2049_v35, %v1310_v4 }
 0x169   : > { %v2066_v8 = vsel %vm2050_vm6, %v2033_v59, %v1294_v37 }
 0x16b   : > { %v1436_v28 = vpop.permute.xlu1 %1435 }
 0x16c   : > { %v1420_v3 = vpop.permute.xlu0 %1419  ;;  %v2113_v52 = vsel %vm2083_vm7, %v2080_v21, %v1436_v28 }
 0x16d   : > { %v2097_v26 = vsel %vm2083_vm7, %v2064_v46, %v1420_v3 }
 0x16f   : > { %v1438_v29 = vpop.permute.xlu1 %1437 }
 0x170   : > { %v1422_v32 = vpop.permute.xlu0 %1421  ;;  %v2115_v38 = vsel %vm2083_vm7, %v2082_v30, %v1438_v29 }
 0x171   : > { %v2099_v62 = vsel %vm2083_vm7, %v2066_v8, %v1422_v32 }
 0x173   : > { %v1548_v44 = vpop.permute.xlu1 %1547 }
 0x174   : > { %v1532_v47 = vpop.permute.xlu0 %1531  ;;  %v2146_v9 = vsel %vm2116_vm8, %v2113_v52, %v1548_v44 }
 0x175   : > { %v2130_v42 = vsel %vm2116_vm8, %v2097_v26, %v1532_v47 }
 0x177   : > { %v1550_v0 = vpop.permute.xlu1 %1549 }
 0x178   : > { %v1534_v57 = vpop.permute.xlu0 %1533  ;;  %v2148_v49 = vsel %vm2116_vm8, %v2115_v38, %v1550_v0 }
 0x179   : > { %v2132_v58 = vsel %vm2116_vm8, %v2099_v62, %v1534_v57 }
 0x17b   : > { %v1820_v33 = vpop.permute.xlu1 %1819 }
 0x17c   : > { %v1804_v60 = vpop.permute.xlu0 %1803  ;;  %v2179_v50 = vsel %vm2149_vm9, %v2146_v9, %v1820_v33 }
 0x17d   : > { %v2163_v34 = vsel %vm2149_vm9, %v2130_v42, %v1804_v60 }
 0x17f   : > { %v1822_v40 = vpop.permute.xlu1 %1821 }
 0x180   : > { %v1806_v20 = vpop.permute.xlu0 %1805  ;;  %v2181_v63 = vsel %vm2149_vm9, %v2148_v49, %v1822_v40 }
 0x181   : > { %v2165_v14 = vsel %vm2149_vm9, %v2132_v58, %v1806_v20 }
 0x183   : > { %v1948_v12 = vpop.permute.xlu1 %1947 }
 0x184   : > { %v2212_v22 = vsel %vm2182_vm10, %v2179_v50, %v1948_v12  ;;  %v1932_v56 = vpop.permute.xlu0 %1931 }
 0x185   : > { %v2196_v1 = vsel %vm2182_vm10, %v2163_v34, %v1932_v56  ;;  %3280 = vmatprep.mubr.msk.bf16.mxu1 %vm2242_vm11, %v2212_v22 }
 0x186   : > { %3264 = vmatprep.mubr.msk.bf16.mxu0 %vm2242_vm11, %v2196_v1 }
 0x187   : > { %v1950_v16 = vpop.permute.xlu1 %1949 }
 0x188   : > { %v2214_v43 = vsel %vm2182_vm10, %v2181_v63, %v1950_v16  ;;  %v1934_v2 = vpop.permute.xlu0 %1933 }
 0x189   : > { %v2198_v55 = vsel %vm2182_vm10, %v2165_v14, %v1934_v2  ;;  %3281 = vmatmul.mubr.msk.bf16.gmra.mrb[12].mxu1 %vm2242_vm11, %v2214_v43 }
 0x18a   : > { %3265 = vmatmul.mubr.msk.bf16.gmra.mrb[12].mxu0 %vm2242_vm11, %v2198_v55 }
 0x1a0   : > { %v3270_v23 = vpop.f32.mrb[0].mxu1 }
 0x1a1   : > { %v3254_v31 = vpop.f32.mrb[0].mxu0  ;;  %v2386_v41 = vadd.f32 %v3270_v23, %v4760_v19  ;;  %v2377_v48 = vpop.f32.mrb[1].mxu1 }
 0x1a2   : > { %v2322_v17 = vadd.f32 %v3254_v31, %v4760_v19  ;;  %v2313_v10 = vpop.f32.mrb[1].mxu0  ;;  %v2378_v25 = vadd.f32 %v4760_v19, %v2377_v48  ;;  %v3271_v7 = vpop.f32.mrb[2].mxu1 }
 0x1a3   : > { %v2314_v18 = vadd.f32 %v4760_v19, %v2313_v10  ;;  %v3255_v6 = vpop.f32.mrb[2].mxu0  ;;  %v2389_v61 = vadd.f32 %v3271_v7, %v4760_v19  ;;  %v2380_v5 = vpop.f32.mrb[3].mxu1  ;;  %v2458_v28 = vmax.f32 %v2386_v41, 0.0 }
 0x1a4   : > { %v2325_v13 = vadd.f32 %v3255_v6, %v4760_v19  ;;  %v2316_v4 = vpop.f32.mrb[3].mxu0  ;;  %v2381_v37 = vadd.f32 %v4760_v19, %v2380_v5  ;;  %v2442_v32 = vmax.f32 %v2322_v17, 0.0  ;;  %v2456_v44 = vmax.f32 %v2378_v25, 0.0 }
 0x1a5   : > { %v2459_v3 = vmax.f32 %v2389_v61, 0.0  ;;  %v2317_v29 = vadd.f32 %v4760_v19, %v2316_v4  ;;  %v2440_v57 = vmax.f32 %v2314_v18, 0.0 }
 0x1a6   : > { %v2443_v47 = vmax.f32 %v2325_v13, 0.0  ;;  %v2457_v0 = vmax.f32 %v2381_v37, 0.0 }
 0x1a7   : > { %v3180_v33 = vpack.c.bf16 %v2459_v3, %v2458_v28  ;;  %v2441_v60 = vmax.f32 %v2317_v29, 0.0 }
 0x1a8   : > { %v3140_v24 = vpack.c.bf16 %v2443_v47, %v2442_v32  ;;  %v3175_v27 = vpack.c.bf16 %v2457_v0, %v2456_v44 }
 0x1a9   : > { %3220 = vst [vmem:[%s4774_s16 + $0x48] sm:$0xff] %v3180_v33   ;;  %v3135_v54 = vpack.c.bf16 %v2441_v60, %v2440_v57 }
 0x1aa   : > { %3212 = vst [vmem:[%s4774_s16 + $0x8] sm:$0xff] %v3140_v24   ;;  %3219 = vst [vmem:[%s4774_s16 + $0x40] sm:$0xff] %v3175_v27  }
 0x1ab   : > { %3136 = vst [vmem:[%s4774_s16] sm:$0xff] %v3135_v54  }
 0x1e0   : > { %v3274_v11 = vpop.f32.mrb[4].mxu1 }
 0x1e1   : > { %v3258_v53 = vpop.f32.mrb[4].mxu0  ;;  %v2402_v40 = vadd.f32 %v3274_v11, %v4760_v19  ;;  %v2393_v51 = vpop.f32.mrb[5].mxu1 }
 0x1e2   : > { %v2338_v21 = vadd.f32 %v3258_v53, %v4760_v19  ;;  %v2329_v20 = vpop.f32.mrb[5].mxu0  ;;  %v2394_v36 = vadd.f32 %v4760_v19, %v2393_v51  ;;  %v3275_v46 = vpop.f32.mrb[6].mxu1 }
 0x1e3   : > { %v2330_v52 = vadd.f32 %v4760_v19, %v2329_v20  ;;  %v3259_v15 = vpop.f32.mrb[6].mxu0  ;;  %v2405_v45 = vadd.f32 %v3275_v46, %v4760_v19  ;;  %v2396_v26 = vpop.f32.mrb[7].mxu1  ;;  %v2462_v42 = vmax.f32 %v2402_v40, 0.0 }
 0x1e4   : > { %v2341_v9 = vadd.f32 %v3259_v15, %v4760_v19  ;;  %v2332_v39 = vpop.f32.mrb[7].mxu0  ;;  %v2397_v35 = vadd.f32 %v4760_v19, %v2396_v26  ;;  %v2446_v59 = vmax.f32 %v2338_v21, 0.0  ;;  %v2460_v30 = vmax.f32 %v2394_v36, 0.0 }
 0x1e5   : > { %v2463_v50 = vmax.f32 %v2405_v45, 0.0  ;;  %v2333_v12 = vadd.f32 %v4760_v19, %v2332_v39  ;;  %v2444_v56 = vmax.f32 %v2330_v52, 0.0 }
 0x1e6   : > { %v2447_v34 = vmax.f32 %v2341_v9, 0.0  ;;  %v2461_v22 = vmax.f32 %v2397_v35, 0.0 }
 0x1e7   : > { %v3190_v8 = vpack.c.bf16 %v2463_v50, %v2462_v42  ;;  %v2445_v38 = vmax.f32 %v2333_v12, 0.0 }
 0x1e8   : > { %v3150_v1 = vpack.c.bf16 %v2447_v34, %v2446_v59  ;;  %v3185_v62 = vpack.c.bf16 %v2461_v22, %v2460_v30 }
 0x1e9   : > { %3222 = vst [vmem:[%s4774_s16 + $0x58] sm:$0xff] %v3190_v8   ;;  %v3145_v49 = vpack.c.bf16 %v2445_v38, %v2444_v56 }
 0x1ea   : > { %3214 = vst [vmem:[%s4774_s16 + $0x18] sm:$0xff] %v3150_v1   ;;  %3221 = vst [vmem:[%s4774_s16 + $0x50] sm:$0xff] %v3185_v62  }
 0x1eb   : > { %3213 = vst [vmem:[%s4774_s16 + $0x10] sm:$0xff] %v3145_v49  }
 0x220   : > { %v3278_v58 = vpop.f32.mrb[8].mxu1 }
 0x221   : > { %v3262_v63 = vpop.f32.mrb[8].mxu0  ;;  %v2418_v16 = vadd.f32 %v3278_v58, %v4760_v19  ;;  %v2409_v14 = vpop.f32.mrb[9].mxu1 }
 0x222   : > { %v2354_v43 = vadd.f32 %v3262_v63, %v4760_v19  ;;  %v2345_v2 = vpop.f32.mrb[9].mxu0  ;;  %v2410_v55 = vadd.f32 %v4760_v19, %v2409_v14  ;;  %v3279_v23 = vpop.f32.mrb[10].mxu1 }
 0x223   : > { %v2346_v31 = vadd.f32 %v4760_v19, %v2345_v2  ;;  %v3263_v41 = vpop.f32.mrb[10].mxu0  ;;  %v2421_v48 = vadd.f32 %v3279_v23, %v4760_v19  ;;  %v2412_v17 = vpop.f32.mrb[11].mxu1  ;;  %v2466_v18 = vmax.f32 %v2418_v16, 0.0 }
 0x224   : > { %v2357_v10 = vadd.f32 %v3263_v41, %v4760_v19  ;;  %v2348_v25 = vpop.f32.mrb[11].mxu0  ;;  %v2413_v7 = vadd.f32 %v4760_v19, %v2412_v17  ;;  %v2450_v5 = vmax.f32 %v2354_v43, 0.0  ;;  %v2464_v13 = vmax.f32 %v2410_v55, 0.0 }
 0x225   : > { %v2467_v6 = vmax.f32 %v2421_v48, 0.0  ;;  %v2349_v61 = vadd.f32 %v4760_v19, %v2348_v25  ;;  %v2448_v28 = vmax.f32 %v2346_v31, 0.0 }
 0x226   : > { %v2451_v4 = vmax.f32 %v2357_v10, 0.0  ;;  %v2465_v37 = vmax.f32 %v2413_v7, 0.0 }
 0x227   : > { %v3200_v3 = vpack.c.bf16 %v2467_v6, %v2466_v18  ;;  %v2449_v29 = vmax.f32 %v2349_v61, 0.0 }
 0x228   : > { %v3160_v32 = vpack.c.bf16 %v2451_v4, %v2450_v5  ;;  %v3195_v44 = vpack.c.bf16 %v2465_v37, %v2464_v13 }
 0x229   : > { %3224 = vst [vmem:[%s4774_s16 + $0x68] sm:$0xff] %v3200_v3   ;;  %v3155_v47 = vpack.c.bf16 %v2449_v29, %v2448_v28 }
 0x22a   : > { %3216 = vst [vmem:[%s4774_s16 + $0x28] sm:$0xff] %v3160_v32   ;;  %3223 = vst [vmem:[%s4774_s16 + $0x60] sm:$0xff] %v3195_v44  }
 0x22b   : > { %3215 = vst [vmem:[%s4774_s16 + $0x20] sm:$0xff] %v3155_v47  }
 0x25c   : > { %v3282_v0 = vpop.f32.mrb[12].mxu1 }
 0x25d   : > { %v3266_v57 = vpop.f32.mrb[12].mxu0  ;;  %v2434_v33 = vadd.f32 %v3282_v0, %v4760_v19  ;;  %v2425_v60 = vpop.f32.mrb[13].mxu1 }
 0x25e   : > { %v2370_v24 = vadd.f32 %v3266_v57, %v4760_v19  ;;  %v2361_v27 = vpop.f32.mrb[13].mxu0  ;;  %v2426_v54 = vadd.f32 %v4760_v19, %v2425_v60  ;;  %v3283_v11 = vpop.f32.mrb[14].mxu1 }
 0x25f   : > { %v2362_v53 = vadd.f32 %v4760_v19, %v2361_v27  ;;  %v3267_v40 = vpop.f32.mrb[14].mxu0  ;;  %v2437_v51 = vadd.f32 %v3283_v11, %v4760_v19  ;;  %v2428_v21 = vpop.f32.mrb[15].mxu1  ;;  %v2470_v52 = vmax.f32 %v2434_v33, 0.0 }
 0x260   : > { %v2373_v20 = vadd.f32 %v3267_v40, %v4760_v19  ;;  %v2364_v36 = vpop.f32.mrb[15].mxu0  ;;  %v2429_v46 = vadd.f32 %v4760_v19, %v2428_v21  ;;  %v2454_v26 = vmax.f32 %v2370_v24, 0.0  ;;  %v2468_v9 = vmax.f32 %v2426_v54, 0.0 }
 0x261   : > { %v2471_v15 = vmax.f32 %v2437_v51, 0.0  ;;  %v2365_v45 = vadd.f32 %v4760_v19, %v2364_v36  ;;  %v2452_v42 = vmax.f32 %v2362_v53, 0.0 }
 0x262   : > { %v2455_v39 = vmax.f32 %v2373_v20, 0.0  ;;  %v2469_v35 = vmax.f32 %v2429_v46, 0.0 }
 0x263   : > { %v3210_v50 = vpack.c.bf16 %v2471_v15, %v2470_v52  ;;  %v2453_v12 = vmax.f32 %v2365_v45, 0.0 }
 0x264   : > { %v3170_v59 = vpack.c.bf16 %v2455_v39, %v2454_v26  ;;  %v3205_v30 = vpack.c.bf16 %v2469_v35, %v2468_v9 }
 0x265   : > { %3226 = vst [vmem:[%s4774_s16 + $0x78] sm:$0xff] %v3210_v50   ;;  %v3165_v34 = vpack.c.bf16 %v2453_v12, %v2452_v42 }
 0x266   : > { %3218 = vst [vmem:[%s4774_s16 + $0x38] sm:$0xff] %v3170_v59   ;;  %3225 = vst [vmem:[%s4774_s16 + $0x70] sm:$0xff] %v3205_v30  }
 0x267   : > { %3217 = vst [vmem:[%s4774_s16 + $0x30] sm:$0xff] %v3165_v34  }
 0x268 PF: > { %s13_s14 = sadd.s32 1, %s3494_s14   ;;  %s4841_s12 = smov %s3490_s13 }
 0x269   : > { %p10_p5 = scmp.ge.s32.totalorder %s13_s14, 4   ;;  %s4842_s13 = smov %s4844_s15 }
 0x26b   :  { %12 = sbr.rel (!%p10_p5) target bundleno = 2 (0x2), region = 71 }

</bundles_post_ra>
